<compile_context>
chip_gen: v7x
topology: tpu7x:2x2x1
jax: 0.10.0
libtpu: 0.0.40
codegen_flags: <defaults>
</compile_context>

<pallas_src>
import functools

import jax
import jax.numpy as jnp
import numpy as np
from jax import lax
from jax.experimental import pallas as pl
from jax.experimental.pallas import tpu as pltpu


# ------------------------------- fused kernel -------------------------------

def _downsample_fused_kernel(xp_ref, w_ref, cb_ref, g_ref, bt_ref, o_ref, *, Ho, Wo, eps):
    # xp_ref : (4, Hh, Wh, C)   phase-split channels-last input for one batch image,
    #                            plane index = (h % 2) * 2 + (w % 2)
    # w_ref  : (9, C, C_out)    per-tap weight matrices, tap = kh*3 + kw
    # cb_ref : (1, C_out)       conv bias
    # g_ref  : (1, C)           LayerNorm gamma
    # bt_ref : (1, C)           LayerNorm beta
    # o_ref  : (1, Ho*Wo, C_out)
    x = xp_ref[...].astype(jnp.float32)                       # (4, Hh, Wh, C)
    c_in = x.shape[-1]
    inv_c = jnp.float32(1.0 / c_in)

    # LayerNorm(channels_first): per-pixel over C, biased variance, eps inside sqrt.
    u = jnp.sum(x, axis=-1, keepdims=True) * inv_c
    d = x - u
    s = jnp.sum(d * d, axis=-1, keepdims=True) * inv_c
    xn = d * lax.rsqrt(s + eps)
    xn = xn * g_ref[...] + bt_ref[...]                        # (4, Hh, Wh, C)

    c_out = o_ref.shape[-1]
    acc = jnp.zeros((Ho * Wo, c_out), jnp.float32)
    # 3x3 stride-2 conv == 9 accumulated matmuls, each tap a contiguous slice of a phase plane:
    #   input pixel (2*oh+kh, 2*ow+kw)  ==  plane (kh%2, kw%2) at (oh + kh//2, ow + kw//2)
    for kh in range(3):
        for kw in range(3):
            p, q = kh % 2, kw % 2
            dh, dw = kh // 2, kw // 2
            patch = xn[2 * p + q, dh:dh + Ho, dw:dw + Wo, :]  # (Ho, Wo, C), unit stride
            acc = acc + jnp.dot(
                patch.reshape(Ho * Wo, c_in),
                w_ref[kh * 3 + kw],
                preferred_element_type=jnp.float32,
            )
    o_ref[0] = (acc + cb_ref[...]).astype(o_ref.dtype)


# --------------------------------- wrapper ----------------------------------

def downsample(x_nchw, params, K=3, stride=2, eps=1e-6):
    assert K == 3 and stride == 2, "kernel specialized for Downsample's 3x3 / stride-2 conv"
    B, C, H, W = x_nchw.shape
    C_out = params["conv_w"].shape[0]
    Ho = (H - K) // stride + 1
    Wo = (W - K) // stride + 1
    out_dtype = x_nchw.dtype

    # Pad H/W up to even so the stride-phase split is exact (padded pixels are never read
    # by any valid-output tap, so this does not change the result).
    Hp, Wp = H + (H % 2), W + (W % 2)
    x = x_nchw.astype(jnp.float32)
    if (Hp, Wp) != (H, W):
        x = jnp.pad(x, ((0, 0), (0, 0), (0, Hp - H), (0, Wp - W)))
    Hh, Wh = Hp // 2, Wp // 2

    # Single layout transform: NCHW -> (B*4, Hh, Wh, C) channels-last phase planes.
    xp = x.reshape(B, C, Hh, 2, Wh, 2)
    xp = jnp.transpose(xp, (0, 3, 5, 2, 4, 1)).reshape(B * 4, Hh, Wh, C)

    # Per-tap weight matrices (C, C_out), tap = kh*3 + kw; epilogue params kept 2-D
    # (lane dim = C / C_out) so they broadcast cleanly inside the kernel.
    w_taps = jnp.transpose(params["conv_w"].astype(jnp.float32), (2, 3, 1, 0)).reshape(
        K * K, C, C_out)
    cb = params["conv_b"].reshape(1, C_out).astype(jnp.float32)
    g = params["ln_gamma"].reshape(1, C).astype(jnp.float32)
    bt = params["ln_beta"].reshape(1, C).astype(jnp.float32)

    # VMEM budget: BlockSpec double-buffers every operand; add headroom for the f32
    # LayerNorm temporaries and the in-register/VMEM accumulator.
    itemsize = 4
    xp_block = 4 * Hh * Wh * C * itemsize
    w_bytes = K * K * C * C_out * itemsize
    out_block = Ho * Wo * C_out * itemsize
    vmem_est = 2 * (xp_block + w_bytes + out_block) + 3 * xp_block + (4 << 20)
    vmem_limit = int(min(max(vmem_est, 16 << 20), 64 << 20))   # safe on v5e/v6e/v7x

    kernel = functools.partial(_downsample_fused_kernel, Ho=Ho, Wo=Wo, eps=eps)
    out2d = pl.pallas_call(
        kernel,
        out_shape=jax.ShapeDtypeStruct((B, Ho * Wo, C_out), out_dtype),
        grid=(B,),
        in_specs=[
            pl.BlockSpec((4, Hh, Wh, C), lambda b: (b, 0, 0, 0)),
            pl.BlockSpec((K * K, C, C_out), lambda b: (0, 0, 0)),
            pl.BlockSpec((1, C_out), lambda b: (0, 0)),
            pl.BlockSpec((1, C), lambda b: (0, 0)),
            pl.BlockSpec((1, C), lambda b: (0, 0)),
        ],
        out_specs=pl.BlockSpec((1, Ho * Wo, C_out), lambda b: (b, 0, 0)),
        compiler_params=pltpu.CompilerParams(
            dimension_semantics=("parallel",),
            vmem_limit_bytes=vmem_limit,
        ),
    )(xp, w_taps, cb, g, bt)

    # Only layout op after the kernel: small (downsampled) output back to NCHW.
    return jnp.transpose(out2d.reshape(B, Ho, Wo, C_out), (0, 3, 1, 2))


# --------------------------- reference (pure JAX) ---------------------------

def downsample_ref(x_nchw, params, K=3, stride=2, eps=1e-6):
    x = x_nchw.astype(jnp.float32)
    u = jnp.mean(x, axis=1, keepdims=True)
    s = jnp.mean((x - u) ** 2, axis=1, keepdims=True)
    xn = (x - u) / jnp.sqrt(s + eps)
    xn = params["ln_gamma"][None, :, None, None] * xn + params["ln_beta"][None, :, None, None]
    out = lax.conv_general_dilated(
        xn, params["conv_w"].astype(jnp.float32),
        window_strides=(stride, stride), padding="VALID",
        dimension_numbers=("NCHW", "OIHW", "NCHW"),
        precision=lax.Precision.HIGHEST,
    )
    return out + params["conv_b"][None, :, None, None]


# ----------------------------------- main ------------------------------------

if __name__ == "__main__":
    B, C_in, H, W = 2, 4, 16, 16
    C_out, K, stride = 8, 3, 2

    key = jax.random.PRNGKey(0)
    kx, kw, kb, kg, kbeta = jax.random.split(key, 5)

    x = jax.random.normal(kx, (B, C_in, H, W), dtype=jnp.float32)
    params = {
        # LayerNorm params (init is ones/zeros; perturb to exercise the affine path)
        "ln_gamma": 1.0 + 0.1 * jax.random.normal(kg, (C_in,), dtype=jnp.float32),
        "ln_beta": 0.1 * jax.random.normal(kbeta, (C_in,), dtype=jnp.float32),
        # Conv2d(in_dim, out_dim, kernel=3, stride=2): deterministic synthetic init
        "conv_w": 0.1 * jax.random.normal(kw, (C_out, C_in, K, K), dtype=jnp.float32),
        "conv_b": 0.1 * jax.random.normal(kb, (C_out,), dtype=jnp.float32),
    }

    fwd = jax.jit(lambda xx, pp: downsample(xx, pp))
    out = jax.block_until_ready(fwd(x, params))
    ref = jax.block_until_ready(downsample_ref(x, params))

    assert out.shape == (B, C_out, (H - K) // stride + 1, (W - K) // stride + 1)
    np.testing.assert_allclose(np.asarray(out), np.asarray(ref), rtol=1e-5, atol=1e-5)
    print("KERNEL_OK")
</pallas_src>

<mosaic_0001>
module attributes {stable_mosaic.version = 11 : i64} {
  func.func @_downsample_fused_kernel(%arg0: i32, %arg1: memref<4x8x8x4xf32, #tpu.memory_space<vmem>>, %arg2: memref<9x4x8xf32, #tpu.memory_space<vmem>>, %arg3: memref<1x8xf32, #tpu.memory_space<vmem>>, %arg4: memref<1x4xf32, #tpu.memory_space<vmem>>, %arg5: memref<1x4xf32, #tpu.memory_space<vmem>>, %arg6: memref<1x49x8xf32, #tpu.memory_space<vmem>>) attributes {dimension_semantics = [#tpu.dimension_semantics<parallel>], iteration_bounds = array<i64: 2>, scalar_prefetch = 0 : i64, scratch_operands = 0 : i64, tpu.core_type = #tpu.core_type<tc>, window_params = [{transform_indices = @transform_0, window_bounds = array<i64: 4, 8, 8, 4>}, {pipeline_mode = #tpu.pipeline_mode<synchronous>, transform_indices = @transform_1, window_bounds = array<i64: 9, 4, 8>}, {pipeline_mode = #tpu.pipeline_mode<synchronous>, transform_indices = @transform_2, window_bounds = array<i64: 1, 8>}, {pipeline_mode = #tpu.pipeline_mode<synchronous>, transform_indices = @transform_3, window_bounds = array<i64: 1, 4>}, {pipeline_mode = #tpu.pipeline_mode<synchronous>, transform_indices = @transform_4, window_bounds = array<i64: 1, 4>}, {transform_indices = @transform_5, window_bounds = array<i64: 1, 49, 8>}]} {
    %c0 = arith.constant 0 : index
    %c0_0 = arith.constant 0 : index
    %c0_1 = arith.constant 0 : index
    %c0_2 = arith.constant 0 : index
    %0 = vector.load %arg1[%c0, %c0_0, %c0_1, %c0_2] : memref<4x8x8x4xf32, #tpu.memory_space<vmem>>, vector<4x8x8x4xf32>
    %cst = arith.constant dense<0.000000e+00> : vector<4x8x8xf32>
    %1 = vector.multi_reduction <add>, %0, %cst [3] : vector<4x8x8x4xf32> to vector<4x8x8xf32>
    %2 = vector.shape_cast %1 : vector<4x8x8xf32> to vector<4x8x8x1xf32>
    %cst_3 = arith.constant 2.500000e-01 : f32
    %3 = vector.broadcast %cst_3 : f32 to vector<4x8x8x1xf32>
    %4 = arith.mulf %2, %3 : vector<4x8x8x1xf32>
    %5 = vector.broadcast %4 : vector<4x8x8x1xf32> to vector<4x8x8x4xf32>
    %6 = arith.subf %0, %5 : vector<4x8x8x4xf32>
    %7 = arith.mulf %6, %6 : vector<4x8x8x4xf32>
    %cst_4 = arith.constant dense<0.000000e+00> : vector<4x8x8xf32>
    %8 = vector.multi_reduction <add>, %7, %cst_4 [3] : vector<4x8x8x4xf32> to vector<4x8x8xf32>
    %9 = vector.shape_cast %8 : vector<4x8x8xf32> to vector<4x8x8x1xf32>
    %cst_5 = arith.constant 2.500000e-01 : f32
    %10 = vector.broadcast %cst_5 : f32 to vector<4x8x8x1xf32>
    %11 = arith.mulf %9, %10 : vector<4x8x8x1xf32>
    %cst_6 = arith.constant 9.99999997E-7 : f32
    %12 = vector.broadcast %cst_6 : f32 to vector<4x8x8x1xf32>
    %13 = arith.addf %11, %12 : vector<4x8x8x1xf32>
    %14 = math.rsqrt %13 : vector<4x8x8x1xf32>
    %15 = vector.broadcast %14 : vector<4x8x8x1xf32> to vector<4x8x8x4xf32>
    %16 = arith.mulf %6, %15 : vector<4x8x8x4xf32>
    %c0_7 = arith.constant 0 : index
    %c0_8 = arith.constant 0 : index
    %17 = vector.load %arg4[%c0_7, %c0_8] : memref<1x4xf32, #tpu.memory_space<vmem>>, vector<1x4xf32>
    %18 = vector.shape_cast %17 : vector<1x4xf32> to vector<1x1x1x4xf32>
    %19 = vector.broadcast %18 : vector<1x1x1x4xf32> to vector<4x8x8x4xf32>
    %20 = arith.mulf %16, %19 : vector<4x8x8x4xf32>
    %c0_9 = arith.constant 0 : index
    %c0_10 = arith.constant 0 : index
    %21 = vector.load %arg5[%c0_9, %c0_10] : memref<1x4xf32, #tpu.memory_space<vmem>>, vector<1x4xf32>
    %22 = vector.shape_cast %21 : vector<1x4xf32> to vector<1x1x1x4xf32>
    %23 = vector.broadcast %22 : vector<1x1x1x4xf32> to vector<4x8x8x4xf32>
    %24 = arith.addf %20, %23 : vector<4x8x8x4xf32>
    %cst_11 = arith.constant 0.000000e+00 : f32
    %25 = vector.broadcast %cst_11 : f32 to vector<49x8xf32>
    %26 = vector.extract_strided_slice %24 {offsets = [0, 0, 0, 0], sizes = [1, 7, 7, 4], strides = [1, 1, 1, 1]} : vector<4x8x8x4xf32> to vector<1x7x7x4xf32>
    %27 = vector.shape_cast %26 : vector<1x7x7x4xf32> to vector<7x7x4xf32>
    %28 = vector.shape_cast %27 : vector<7x7x4xf32> to vector<49x4xf32>
    %c0_12 = arith.constant 0 : index
    %c0_13 = arith.constant 0 : index
    %c0_14 = arith.constant 0 : index
    %29 = vector.load %arg2[%c0_12, %c0_13, %c0_14] : memref<9x4x8xf32, #tpu.memory_space<vmem>>, vector<1x4x8xf32>
    %30 = vector.shape_cast %29 : vector<1x4x8xf32> to vector<4x8xf32>
    %cst_15 = arith.constant dense<0.000000e+00> : vector<49x8xf32>
    %31 = tpu.matmul %28, %30, %cst_15 {dimension_numbers = #tpu.dot_dimension_numbers<[1], [0], [0], [1], [0, 0, 1, 1], [], []>} : vector<49x4xf32>, vector<4x8xf32>, vector<49x8xf32> -> vector<49x8xf32>
    %32 = arith.addf %25, %31 : vector<49x8xf32>
    %33 = vector.extract_strided_slice %24 {offsets = [1, 0, 0, 0], sizes = [1, 7, 7, 4], strides = [1, 1, 1, 1]} : vector<4x8x8x4xf32> to vector<1x7x7x4xf32>
    %34 = vector.shape_cast %33 : vector<1x7x7x4xf32> to vector<7x7x4xf32>
    %35 = vector.shape_cast %34 : vector<7x7x4xf32> to vector<49x4xf32>
    %c1 = arith.constant 1 : index
    %c0_16 = arith.constant 0 : index
    %c0_17 = arith.constant 0 : index
    %36 = vector.load %arg2[%c1, %c0_16, %c0_17] : memref<9x4x8xf32, #tpu.memory_space<vmem>>, vector<1x4x8xf32>
    %37 = vector.shape_cast %36 : vector<1x4x8xf32> to vector<4x8xf32>
    %cst_18 = arith.constant dense<0.000000e+00> : vector<49x8xf32>
    %38 = tpu.matmul %35, %37, %cst_18 {dimension_numbers = #tpu.dot_dimension_numbers<[1], [0], [0], [1], [0, 0, 1, 1], [], []>} : vector<49x4xf32>, vector<4x8xf32>, vector<49x8xf32> -> vector<49x8xf32>
    %39 = arith.addf %32, %38 : vector<49x8xf32>
    %40 = vector.extract_strided_slice %24 {offsets = [0, 0, 1, 0], sizes = [1, 7, 7, 4], strides = [1, 1, 1, 1]} : vector<4x8x8x4xf32> to vector<1x7x7x4xf32>
    %41 = vector.shape_cast %40 : vector<1x7x7x4xf32> to vector<7x7x4xf32>
    %42 = vector.shape_cast %41 : vector<7x7x4xf32> to vector<49x4xf32>
    %c2 = arith.constant 2 : index
    %c0_19 = arith.constant 0 : index
    %c0_20 = arith.constant 0 : index
    %43 = vector.load %arg2[%c2, %c0_19, %c0_20] : memref<9x4x8xf32, #tpu.memory_space<vmem>>, vector<1x4x8xf32>
    %44 = vector.shape_cast %43 : vector<1x4x8xf32> to vector<4x8xf32>
    %cst_21 = arith.constant dense<0.000000e+00> : vector<49x8xf32>
    %45 = tpu.matmul %42, %44, %cst_21 {dimension_numbers = #tpu.dot_dimension_numbers<[1], [0], [0], [1], [0, 0, 1, 1], [], []>} : vector<49x4xf32>, vector<4x8xf32>, vector<49x8xf32> -> vector<49x8xf32>
    %46 = arith.addf %39, %45 : vector<49x8xf32>
    %47 = vector.extract_strided_slice %24 {offsets = [2, 0, 0, 0], sizes = [1, 7, 7, 4], strides = [1, 1, 1, 1]} : vector<4x8x8x4xf32> to vector<1x7x7x4xf32>
    %48 = vector.shape_cast %47 : vector<1x7x7x4xf32> to vector<7x7x4xf32>
    %49 = vector.shape_cast %48 : vector<7x7x4xf32> to vector<49x4xf32>
    %c3 = arith.constant 3 : index
    %c0_22 = arith.constant 0 : index
    %c0_23 = arith.constant 0 : index
    %50 = vector.load %arg2[%c3, %c0_22, %c0_23] : memref<9x4x8xf32, #tpu.memory_space<vmem>>, vector<1x4x8xf32>
    %51 = vector.shape_cast %50 : vector<1x4x8xf32> to vector<4x8xf32>
    %cst_24 = arith.constant dense<0.000000e+00> : vector<49x8xf32>
    %52 = tpu.matmul %49, %51, %cst_24 {dimension_numbers = #tpu.dot_dimension_numbers<[1], [0], [0], [1], [0, 0, 1, 1], [], []>} : vector<49x4xf32>, vector<4x8xf32>, vector<49x8xf32> -> vector<49x8xf32>
    %53 = arith.addf %46, %52 : vector<49x8xf32>
    %54 = vector.extract_strided_slice %24 {offsets = [3, 0, 0, 0], sizes = [1, 7, 7, 4], strides = [1, 1, 1, 1]} : vector<4x8x8x4xf32> to vector<1x7x7x4xf32>
    %55 = vector.shape_cast %54 : vector<1x7x7x4xf32> to vector<7x7x4xf32>
    %56 = vector.shape_cast %55 : vector<7x7x4xf32> to vector<49x4xf32>
    %c4 = arith.constant 4 : index
    %c0_25 = arith.constant 0 : index
    %c0_26 = arith.constant 0 : index
    %57 = vector.load %arg2[%c4, %c0_25, %c0_26] : memref<9x4x8xf32, #tpu.memory_space<vmem>>, vector<1x4x8xf32>
    %58 = vector.shape_cast %57 : vector<1x4x8xf32> to vector<4x8xf32>
    %cst_27 = arith.constant dense<0.000000e+00> : vector<49x8xf32>
    %59 = tpu.matmul %56, %58, %cst_27 {dimension_numbers = #tpu.dot_dimension_numbers<[1], [0], [0], [1], [0, 0, 1, 1], [], []>} : vector<49x4xf32>, vector<4x8xf32>, vector<49x8xf32> -> vector<49x8xf32>
    %60 = arith.addf %53, %59 : vector<49x8xf32>
    %61 = vector.extract_strided_slice %24 {offsets = [2, 0, 1, 0], sizes = [1, 7, 7, 4], strides = [1, 1, 1, 1]} : vector<4x8x8x4xf32> to vector<1x7x7x4xf32>
    %62 = vector.shape_cast %61 : vector<1x7x7x4xf32> to vector<7x7x4xf32>
    %63 = vector.shape_cast %62 : vector<7x7x4xf32> to vector<49x4xf32>
    %c5 = arith.constant 5 : index
    %c0_28 = arith.constant 0 : index
    %c0_29 = arith.constant 0 : index
    %64 = vector.load %arg2[%c5, %c0_28, %c0_29] : memref<9x4x8xf32, #tpu.memory_space<vmem>>, vector<1x4x8xf32>
    %65 = vector.shape_cast %64 : vector<1x4x8xf32> to vector<4x8xf32>
    %cst_30 = arith.constant dense<0.000000e+00> : vector<49x8xf32>
    %66 = tpu.matmul %63, %65, %cst_30 {dimension_numbers = #tpu.dot_dimension_numbers<[1], [0], [0], [1], [0, 0, 1, 1], [], []>} : vector<49x4xf32>, vector<4x8xf32>, vector<49x8xf32> -> vector<49x8xf32>
    %67 = arith.addf %60, %66 : vector<49x8xf32>
    %68 = vector.extract_strided_slice %24 {offsets = [0, 1, 0, 0], sizes = [1, 7, 7, 4], strides = [1, 1, 1, 1]} : vector<4x8x8x4xf32> to vector<1x7x7x4xf32>
    %69 = vector.shape_cast %68 : vector<1x7x7x4xf32> to vector<7x7x4xf32>
    %70 = vector.shape_cast %69 : vector<7x7x4xf32> to vector<49x4xf32>
    %c6 = arith.constant 6 : index
    %c0_31 = arith.constant 0 : index
    %c0_32 = arith.constant 0 : index
    %71 = vector.load %arg2[%c6, %c0_31, %c0_32] : memref<9x4x8xf32, #tpu.memory_space<vmem>>, vector<1x4x8xf32>
    %72 = vector.shape_cast %71 : vector<1x4x8xf32> to vector<4x8xf32>
    %cst_33 = arith.constant dense<0.000000e+00> : vector<49x8xf32>
    %73 = tpu.matmul %70, %72, %cst_33 {dimension_numbers = #tpu.dot_dimension_numbers<[1], [0], [0], [1], [0, 0, 1, 1], [], []>} : vector<49x4xf32>, vector<4x8xf32>, vector<49x8xf32> -> vector<49x8xf32>
    %74 = arith.addf %67, %73 : vector<49x8xf32>
    %75 = vector.extract_strided_slice %24 {offsets = [1, 1, 0, 0], sizes = [1, 7, 7, 4], strides = [1, 1, 1, 1]} : vector<4x8x8x4xf32> to vector<1x7x7x4xf32>
    %76 = vector.shape_cast %75 : vector<1x7x7x4xf32> to vector<7x7x4xf32>
    %77 = vector.shape_cast %76 : vector<7x7x4xf32> to vector<49x4xf32>
    %c7 = arith.constant 7 : index
    %c0_34 = arith.constant 0 : index
    %c0_35 = arith.constant 0 : index
    %78 = vector.load %arg2[%c7, %c0_34, %c0_35] : memref<9x4x8xf32, #tpu.memory_space<vmem>>, vector<1x4x8xf32>
    %79 = vector.shape_cast %78 : vector<1x4x8xf32> to vector<4x8xf32>
    %cst_36 = arith.constant dense<0.000000e+00> : vector<49x8xf32>
    %80 = tpu.matmul %77, %79, %cst_36 {dimension_numbers = #tpu.dot_dimension_numbers<[1], [0], [0], [1], [0, 0, 1, 1], [], []>} : vector<49x4xf32>, vector<4x8xf32>, vector<49x8xf32> -> vector<49x8xf32>
    %81 = arith.addf %74, %80 : vector<49x8xf32>
    %82 = vector.extract_strided_slice %24 {offsets = [0, 1, 1, 0], sizes = [1, 7, 7, 4], strides = [1, 1, 1, 1]} : vector<4x8x8x4xf32> to vector<1x7x7x4xf32>
    %83 = vector.shape_cast %82 : vector<1x7x7x4xf32> to vector<7x7x4xf32>
    %84 = vector.shape_cast %83 : vector<7x7x4xf32> to vector<49x4xf32>
    %c8 = arith.constant 8 : index
    %c0_37 = arith.constant 0 : index
    %c0_38 = arith.constant 0 : index
    %85 = vector.load %arg2[%c8, %c0_37, %c0_38] : memref<9x4x8xf32, #tpu.memory_space<vmem>>, vector<1x4x8xf32>
    %86 = vector.shape_cast %85 : vector<1x4x8xf32> to vector<4x8xf32>
    %cst_39 = arith.constant dense<0.000000e+00> : vector<49x8xf32>
    %87 = tpu.matmul %84, %86, %cst_39 {dimension_numbers = #tpu.dot_dimension_numbers<[1], [0], [0], [1], [0, 0, 1, 1], [], []>} : vector<49x4xf32>, vector<4x8xf32>, vector<49x8xf32> -> vector<49x8xf32>
    %88 = arith.addf %81, %87 : vector<49x8xf32>
    %c0_40 = arith.constant 0 : index
    %c0_41 = arith.constant 0 : index
    %89 = vector.load %arg3[%c0_40, %c0_41] : memref<1x8xf32, #tpu.memory_space<vmem>>, vector<1x8xf32>
    %90 = vector.broadcast %89 : vector<1x8xf32> to vector<49x8xf32>
    %91 = arith.addf %88, %90 : vector<49x8xf32>
    %c0_42 = arith.constant 0 : index
    %c0_43 = arith.constant 0 : index
    %c0_44 = arith.constant 0 : index
    %92 = vector.load %arg6[%c0_42, %c0_43, %c0_44] : memref<1x49x8xf32, #tpu.memory_space<vmem>>, vector<1x49x8xf32>
    %93 = vector.shape_cast %92 : vector<1x49x8xf32> to vector<49x8xf32>
    %94 = vector.shape_cast %91 : vector<49x8xf32> to vector<1x49x8xf32>
    tpu.vector_store %arg6[%c0_42, %c0_43, %c0_44], %94 {strides = array<i32>} : memref<1x49x8xf32, #tpu.memory_space<vmem>>, vector<1x49x8xf32>,
    return
  }
  func.func @transform_0(%arg0: i32) -> (i32, i32, i32, i32) {
    %c0_i32 = arith.constant 0 : i32
    %c0_i32_0 = arith.constant 0 : i32
    %c0_i32_1 = arith.constant 0 : i32
    %c0_i32_2 = arith.constant 0 : i32
    return %arg0, %c0_i32, %c0_i32_0, %c0_i32_1 : i32, i32, i32, i32
  }
  func.func @transform_1(%arg0: i32) -> (i32, i32, i32) {
    %c0_i32 = arith.constant 0 : i32
    %c0_i32_0 = arith.constant 0 : i32
    %c0_i32_1 = arith.constant 0 : i32
    %c0_i32_2 = arith.constant 0 : i32
    return %c0_i32, %c0_i32_0, %c0_i32_1 : i32, i32, i32
  }
  func.func @transform_2(%arg0: i32) -> (i32, i32) {
    %c0_i32 = arith.constant 0 : i32
    %c0_i32_0 = arith.constant 0 : i32
    %c0_i32_1 = arith.constant 0 : i32
    return %c0_i32, %c0_i32_0 : i32, i32
  }
  func.func @transform_3(%arg0: i32) -> (i32, i32) {
    %c0_i32 = arith.constant 0 : i32
    %c0_i32_0 = arith.constant 0 : i32
    %c0_i32_1 = arith.constant 0 : i32
    return %c0_i32, %c0_i32_0 : i32, i32
  }
  func.func @transform_4(%arg0: i32) -> (i32, i32) {
    %c0_i32 = arith.constant 0 : i32
    %c0_i32_0 = arith.constant 0 : i32
    %c0_i32_1 = arith.constant 0 : i32
    return %c0_i32, %c0_i32_0 : i32, i32
  }
  func.func @transform_5(%arg0: i32) -> (i32, i32, i32) {
    %c0_i32 = arith.constant 0 : i32
    %c0_i32_0 = arith.constant 0 : i32
    %c0_i32_1 = arith.constant 0 : i32
    return %arg0, %c0_i32, %c0_i32_0 : i32, i32, i32
  }
}

</mosaic_0001>

<bundles_post_ra>
// kernel: _lambda_.1
= control target key start
LH: loop header
LB: loop body
LE: loop exit
PB: predicated region body
PF: predicated region fallthrough
CT: control target
= control target key end

     0   :  { %s6429_s18 = smov 0   ;;  %s8639_s0 = inlined_call_operand.vmem [shape: f32[8,8,8,4], index: 0, kind: input, shape index: {}]   ;;  %s8640_s1 = inlined_call_operand.vmem [shape: f32[9,4,8], index: 1, kind: input, shape index: {}]   ;;  %s8641_s2 = inlined_call_operand.vmem [shape: f32[1,8], index: 2, kind: input, shape index: {}]   ;;  %s8642_s3 = inlined_call_operand.vmem [shape: f32[1,4], index: 3, kind: input, shape index: {}]   ;;  %s8643_s4 = inlined_call_operand.vmem [shape: f32[1,4], index: 4, kind: input, shape index: {}]   ;;  %s8644_s5 = inlined_call_operand.vmem [shape: f32[2,49,8], index: 5, kind: output, shape index: {}]  }
   0x1 LB: > { %s6435_s19 = sadd.s32 4294967295, %s6394_s18   ;;  %p5904_p0 = scmp.ge.s32.totalorder %s6394_s18, 1  ;;  %s6394_s18 = sphi %s6429_s18, %s15_s18  }
   0x2   : > { %p189_p1 = scmp.lt.s32.totalorder %s6394_s18, 3 }
   0x4   : > { %p190_p2 = pnand %p5904_p0, %p189_p1 }
   0x6   : > { %193 = sbr.rel (%p190_p2) target bundleno = 875 (0x36b), region = 40 }
   0xd   : > { %s5905_s20 = sshll.u32 %s6435_s19, 2  ;;  %vm260_vm0 = vcmask 31744   ;;  %vm1736_vm1 = vcmask 1043456   ;;  %vm6397_vm2 = vmmov 0   ;;  %p225_p4 = scmp.lt.s32.totalorder %s6435_s19, 1  ;;  %vm5836_vm3 = vcmask 64512  }
   0xe   : > { %p219_p3 = scmp.lt.s32.totalorder %s5905_s20, 7  ;;  %vm5843_vm4 = vcmask 57344  }
   0xf   : > { %s9005_s19 = smov (!%p225_p4, %s6435_s19), 1 }
  0x10   : > { %s9003_s20 = smov (!%p219_p3, %s5905_s20), 7  ;;  %s6312_s7 = smul.u32 56, %s9005_s19 }
  0x11   : > { %s6030_s21 = sshll.u32 %s9003_s20, 6 }
  0x12   : > { %s6443_s24 = scalar_lea.vmem %s8639_s0, %s6030_s21  ;;  %s8621_s12 = scalar_lea.vmem %s8644_s5, %s6312_s7 }
  0x13   : > { %v6446_v0 = vld [vmem:[%s6443_s24 + $0x40] sm:$0xff]  ;;  %v6449_v1 = vld [vmem:[%s6443_s24 + $0x68] sm:$0xff]  ;;  %v6466_v8 = vld [vmem:[%s6443_s24 + $0x50] sm:$0xff] }
  0x14   : > { %v6452_v2 = vld [vmem:[%s6443_s24 + $0x60] sm:$0xff]  ;;  %v285_v3 = vsel %vm260_vm0, %v6446_v0, 0.0  ;;  %v300_v4 = vsel %vm260_vm0, %v6449_v1, 0.0  ;;  %v6459_v5 = vld [vmem:[%s6443_s24 + $0x48] sm:$0xff]  ;;  %v6469_v9 = vld [vmem:[%s6443_s24 + $0x70] sm:$0xff]  ;;  %v291_v10 = vsel %vm260_vm0, %v6466_v8, 0.0 }
  0x15   : > { %286 = vadd.xlane.f32.xlu0 %v285_v3  ;;  %301 = vadd.xlane.f32.xlu1 %v300_v4  ;;  %v297_v6 = vsel %vm260_vm0, %v6452_v2, 0.0  ;;  %v288_v7 = vsel %vm260_vm0, %v6459_v5, 0.0  ;;  %v303_v11 = vsel %vm260_vm0, %v6469_v9, 0.0  ;;  %v6476_v12 = vld [vmem:[%s6443_s24 + $0x58] sm:$0xff]  ;;  %v6479_v13 = vld [vmem:[%s6443_s24] sm:$0xff]  ;;  %v6486_v16 = vld [vmem:[%s6443_s24 + $0x8] sm:$0xff] }
  0x16   : > { %v294_v14 = vsel %vm260_vm0, %v6476_v12, 0.0  ;;  %v261_v15 = vsel %vm260_vm0, %v6479_v13, 0.0  ;;  %v6489_v17 = vld [vmem:[%s6443_s24 + $0x10] sm:$0xff]  ;;  %v264_v18 = vsel %vm260_vm0, %v6486_v16, 0.0  ;;  %v6496_v20 = vld [vmem:[%s6443_s24 + $0x18] sm:$0xff]  ;;  %v6499_v21 = vld [vmem:[%s6443_s24 + $0x20] sm:$0xff] }
  0x17   : > { %v267_v19 = vsel %vm260_vm0, %v6489_v17, 0.0  ;;  %v270_v22 = vsel %vm260_vm0, %v6496_v20, 0.0  ;;  %v273_v23 = vsel %vm260_vm0, %v6499_v21, 0.0  ;;  %v6506_v24 = vld [vmem:[%s6443_s24 + $0x28] sm:$0xff]  ;;  %v6509_v25 = vld [vmem:[%s6443_s24 + $0x30] sm:$0xff]  ;;  %v6516_v28 = vld [vmem:[%s6443_s24 + $0x80] sm:$0xff] }
  0x18   : > { %v276_v26 = vsel %vm260_vm0, %v6506_v24, 0.0  ;;  %v279_v27 = vsel %vm260_vm0, %v6509_v25, 0.0  ;;  %v6519_v29 = vld [vmem:[%s6443_s24 + $0xc0] sm:$0xff]  ;;  %v309_v30 = vsel %vm260_vm0, %v6516_v28, 0.0  ;;  %v6526_v32 = vld [vmem:[%s6443_s24 + $0x88] sm:$0xff]  ;;  %v6529_v33 = vld [vmem:[%s6443_s24 + $0x90] sm:$0xff] }
  0x19   : > { %298 = vadd.xlane.f32.xlu0 %v297_v6  ;;  %289 = vadd.xlane.f32.xlu1 %v288_v7  ;;  %v330_v31 = vsel %vm260_vm0, %v6519_v29, 0.0  ;;  %v312_v34 = vsel %vm260_vm0, %v6526_v32, 0.0  ;;  %v315_v35 = vsel %vm260_vm0, %v6529_v33, 0.0  ;;  %v6536_v36 = vld [vmem:[%s6443_s24 + $0xc8] sm:$0xff]  ;;  %v6539_v37 = vld [vmem:[%s6443_s24 + $0xd0] sm:$0xff]  ;;  %v6546_v40 = vld [vmem:[%s6443_s24 + $0x98] sm:$0xff] }
  0x1a   : > { %v333_v38 = vsel %vm260_vm0, %v6536_v36, 0.0  ;;  %v336_v39 = vsel %vm260_vm0, %v6539_v37, 0.0  ;;  %v6549_v41 = vld [vmem:[%s6443_s24 + $0xd8] sm:$0xff]  ;;  %v318_v42 = vsel %vm260_vm0, %v6546_v40, 0.0  ;;  %v6556_v44 = vld [vmem:[%s6443_s24 + $0xa0] sm:$0xff]  ;;  %v6559_v45 = vld [vmem:[%s6443_s24 + $0xa8] sm:$0xff] }
  0x1b   : > { %v339_v43 = vsel %vm260_vm0, %v6549_v41, 0.0  ;;  %v321_v46 = vsel %vm260_vm0, %v6556_v44, 0.0  ;;  %v324_v47 = vsel %vm260_vm0, %v6559_v45, 0.0  ;;  %v6566_v48 = vld [vmem:[%s6443_s24 + $0xe0] sm:$0xff]  ;;  %v6569_v49 = vld [vmem:[%s6443_s24 + $0xe8] sm:$0xff]  ;;  %v6576_v52 = vld [vmem:[%s6443_s24 + $0xb0] sm:$0xff] }
  0x1c   : > { %v342_v50 = vsel %vm260_vm0, %v6566_v48, 0.0  ;;  %v345_v51 = vsel %vm260_vm0, %v6569_v49, 0.0  ;;  %v6579_v53 = vld [vmem:[%s6443_s24 + $0xf0] sm:$0xff]  ;;  %v327_v54 = vsel %vm260_vm0, %v6576_v52, 0.0 }
  0x1d   : > { %292 = vadd.xlane.f32.xlu0 %v291_v10  ;;  %304 = vadd.xlane.f32.xlu1 %v303_v11  ;;  %v348_v55 = vsel %vm260_vm0, %v6579_v53, 0.0 }
  0x21   : > { %295 = vadd.xlane.f32.xlu0 %v294_v14  ;;  %262 = vadd.xlane.f32.xlu1 %v261_v15 }
  0x25   : > { %265 = vadd.xlane.f32.xlu0 %v264_v18  ;;  %268 = vadd.xlane.f32.xlu1 %v267_v19 }
  0x29   : > { %271 = vadd.xlane.f32.xlu0 %v270_v22  ;;  %274 = vadd.xlane.f32.xlu1 %v273_v23 }
  0x2d   : > { %277 = vadd.xlane.f32.xlu0 %v276_v26  ;;  %280 = vadd.xlane.f32.xlu1 %v279_v27 }
  0x31   : > { %310 = vadd.xlane.f32.xlu0 %v309_v30  ;;  %331 = vadd.xlane.f32.xlu1 %v330_v31 }
  0x35   : > { %313 = vadd.xlane.f32.xlu0 %v312_v34  ;;  %316 = vadd.xlane.f32.xlu1 %v315_v35 }
  0x39   : > { %334 = vadd.xlane.f32.xlu0 %v333_v38  ;;  %337 = vadd.xlane.f32.xlu1 %v336_v39 }
  0x3d   : > { %319 = vadd.xlane.f32.xlu0 %v318_v42  ;;  %340 = vadd.xlane.f32.xlu1 %v339_v43 }
  0x41   : > { %322 = vadd.xlane.f32.xlu0 %v321_v46  ;;  %325 = vadd.xlane.f32.xlu1 %v324_v47 }
  0x45   : > { %343 = vadd.xlane.f32.xlu0 %v342_v50  ;;  %346 = vadd.xlane.f32.xlu1 %v345_v51 }
  0x49   : > { %328 = vadd.xlane.f32.xlu0 %v327_v54  ;;  %349 = vadd.xlane.f32.xlu1 %v348_v55  ;;  %v6630_v55 = vld [vmem:[%s6443_s24 + $0x38] sm:$0xff] }
  0xa2   : > { %v287_v56 = vpop.xlane.xlu0 %286  ;;  %v302_v57 = vpop.xlane.xlu1 %301 }
  0xa3   : > { %v359_v58 = vmul.f32 0.25, %v287_v56  ;;  %v364_v59 = vmul.f32 0.25, %v302_v57 }
  0xa5   : > { %v6586_v60 = vsub.f32 %v6446_v0, %v359_v58  ;;  %v6589_v61 = vsub.f32 %v6449_v1, %v364_v59  ;;  %v282_v59 = vsel %vm260_vm0, %v6630_v55, 0.0 }
  0xa6   : > { %v299_v62 = vpop.xlane.xlu0 %298  ;;  %v290_v63 = vpop.xlane.xlu1 %289 }
  0xa7   : > { %v363_v3 = vmul.f32 0.25, %v299_v62  ;;  %v360_v4 = vmul.f32 0.25, %v290_v63  ;;  %v419_v6 = vmul.f32 %v6586_v60, %v6586_v60  ;;  %v424_v7 = vmul.f32 %v6589_v61, %v6589_v61 }
  0xa9   : > { %v6596_v10 = vsub.f32 %v6452_v2, %v363_v3  ;;  %v6599_v11 = vsub.f32 %v6459_v5, %v360_v4  ;;  %v465_v0 = vsel %vm260_vm0, %v419_v6, 0.0  ;;  %v480_v15 = vsel %vm260_vm0, %v424_v7, 0.0 }
  0xaa   : > { %v293_v1 = vpop.xlane.xlu0 %292  ;;  %466 = vadd.xlane.f32.xlu0 %v465_v0  ;;  %v305_v14 = vpop.xlane.xlu1 %304 }
  0xab   : > { %v361_v18 = vmul.f32 0.25, %v293_v1  ;;  %v365_v19 = vmul.f32 0.25, %v305_v14  ;;  %v423_v22 = vmul.f32 %v6596_v10, %v6596_v10  ;;  %v420_v23 = vmul.f32 %v6599_v11, %v6599_v11 }
  0xad   : > { %v6608_v2 = vsub.f32 %v6466_v8, %v361_v18  ;;  %v6611_v5 = vsub.f32 %v6469_v9, %v365_v19  ;;  %v477_v26 = vsel %vm260_vm0, %v423_v22, 0.0  ;;  %v468_v30 = vsel %vm260_vm0, %v420_v23, 0.0 }
  0xae   : > { %v296_v27 = vpop.xlane.xlu0 %295  ;;  %481 = vadd.xlane.f32.xlu0 %v480_v15  ;;  %478 = vadd.xlane.f32.xlu1 %v477_v26  ;;  %v263_v31 = vpop.xlane.xlu1 %262 }
  0xaf   : > { %v362_v34 = vmul.f32 0.25, %v296_v27  ;;  %v421_v35 = vmul.f32 %v6608_v2, %v6608_v2  ;;  %v351_v38 = vmul.f32 0.25, %v263_v31  ;;  %v425_v8 = vmul.f32 %v6611_v5, %v6611_v5 }
  0xb1   : > { %v6620_v9 = vsub.f32 %v6476_v12, %v362_v34  ;;  %v471_v39 = vsel %vm260_vm0, %v421_v35, 0.0  ;;  %v6624_v42 = vsub.f32 %v6479_v13, %v351_v38  ;;  %v483_v46 = vsel %vm260_vm0, %v425_v8, 0.0 }
  0xb2   : > { %472 = vadd.xlane.f32.xlu0 %v471_v39  ;;  %469 = vadd.xlane.f32.xlu1 %v468_v30  ;;  %v266_v43 = vpop.xlane.xlu0 %265  ;;  %v269_v47 = vpop.xlane.xlu1 %268 }
  0xb3   : > { %v422_v50 = vmul.f32 %v6620_v9, %v6620_v9  ;;  %v352_v51 = vmul.f32 0.25, %v266_v43  ;;  %v353_v54 = vmul.f32 0.25, %v269_v47  ;;  %v411_v12 = vmul.f32 %v6624_v42, %v6624_v42 }
  0xb5   : > { %v474_v56 = vsel %vm260_vm0, %v422_v50, 0.0  ;;  %v6636_v13 = vsub.f32 %v6486_v16, %v352_v51  ;;  %v6639_v57 = vsub.f32 %v6489_v17, %v353_v54  ;;  %v441_v62 = vsel %vm260_vm0, %v411_v12, 0.0  ;;  %v6681_v51 = vld [vmem:[%s6443_s24 + $0x78] sm:$0xff] }
  0xb6   : > { %475 = vadd.xlane.f32.xlu0 %v474_v56  ;;  %484 = vadd.xlane.f32.xlu1 %v483_v46  ;;  %v272_v58 = vpop.xlane.xlu0 %271  ;;  %v275_v63 = vpop.xlane.xlu1 %274 }
  0xb7   : > { %v354_v3 = vmul.f32 0.25, %v272_v58  ;;  %v355_v4 = vmul.f32 0.25, %v275_v63  ;;  %v412_v6 = vmul.f32 %v6636_v13, %v6636_v13  ;;  %v413_v16 = vmul.f32 %v6639_v57, %v6639_v57 }
  0xb9   : > { %v6649_v17 = vsub.f32 %v6496_v20, %v354_v3  ;;  %v6652_v7 = vsub.f32 %v6499_v21, %v355_v4  ;;  %v444_v1 = vsel %vm260_vm0, %v412_v6, 0.0  ;;  %v447_v14 = vsel %vm260_vm0, %v413_v16, 0.0 }
  0xba   : > { %283 = vadd.xlane.f32.xlu1 %v282_v59  ;;  %442 = vadd.xlane.f32.xlu0 %v441_v62  ;;  %v278_v0 = vpop.xlane.xlu0 %277  ;;  %v281_v15 = vpop.xlane.xlu1 %280 }
  0xbb   : > { %v356_v18 = vmul.f32 0.25, %v278_v0  ;;  %v357_v19 = vmul.f32 0.25, %v281_v15  ;;  %v414_v22 = vmul.f32 %v6649_v17, %v6649_v17  ;;  %v415_v20 = vmul.f32 %v6652_v7, %v6652_v7 }
  0xbd   : > { %v6661_v23 = vsub.f32 %v6506_v24, %v356_v18  ;;  %v6664_v21 = vsub.f32 %v6509_v25, %v357_v19  ;;  %v450_v27 = vsel %vm260_vm0, %v414_v22, 0.0  ;;  %v453_v30 = vsel %vm260_vm0, %v415_v20, 0.0 }
  0xbe   : > { %445 = vadd.xlane.f32.xlu1 %v444_v1  ;;  %448 = vadd.xlane.f32.xlu0 %v447_v14  ;;  %v311_v26 = vpop.xlane.xlu0 %310  ;;  %v332_v31 = vpop.xlane.xlu1 %331 }
  0xbf   : > { %v367_v34 = vmul.f32 0.25, %v311_v26  ;;  %v416_v35 = vmul.f32 %v6661_v23, %v6661_v23  ;;  %v417_v24 = vmul.f32 %v6664_v21, %v6664_v21  ;;  %v374_v38 = vmul.f32 0.25, %v332_v31 }
  0xc1   : > { %v6673_v25 = vsub.f32 %v6516_v28, %v367_v34  ;;  %v456_v39 = vsel %vm260_vm0, %v416_v35, 0.0  ;;  %v6677_v43 = vsub.f32 %v6519_v29, %v374_v38  ;;  %v459_v50 = vsel %vm260_vm0, %v417_v24, 0.0 }
  0xc2   : > { %451 = vadd.xlane.f32.xlu1 %v450_v27  ;;  %454 = vadd.xlane.f32.xlu0 %v453_v30  ;;  %v314_v8 = vpop.xlane.xlu0 %313  ;;  %v317_v46 = vpop.xlane.xlu1 %316  ;;  %v306_v29 = vsel %vm260_vm0, %v6681_v51, 0.0 }
  0xc3   : > { %v368_v47 = vmul.f32 0.25, %v314_v8  ;;  %v427_v54 = vmul.f32 %v6673_v25, %v6673_v25  ;;  %v369_v12 = vmul.f32 0.25, %v317_v46  ;;  %v434_v59 = vmul.f32 %v6677_v43, %v6677_v43 }
  0xc5   : > { %v6686_v28 = vsub.f32 %v6526_v32, %v368_v47  ;;  %v6691_v58 = vsub.f32 %v6529_v33, %v369_v12  ;;  %v489_v3 = vsel %vm260_vm0, %v427_v54, 0.0  ;;  %v510_v33 = vsel %vm260_vm0, %v434_v59, 0.0 }
  0xc6   : > { %457 = vadd.xlane.f32.xlu1 %v456_v39  ;;  %460 = vadd.xlane.f32.xlu0 %v459_v50  ;;  %v335_v56 = vpop.xlane.xlu0 %334  ;;  %v338_v62 = vpop.xlane.xlu1 %337 }
  0xc7   : > { %v375_v63 = vmul.f32 0.25, %v335_v56  ;;  %v428_v32 = vmul.f32 %v6686_v28, %v6686_v28  ;;  %v376_v4 = vmul.f32 0.25, %v338_v62  ;;  %v429_v1 = vmul.f32 %v6691_v58, %v6691_v58 }
  0xc9   : > { %v6699_v6 = vsub.f32 %v6536_v36, %v375_v63  ;;  %v6703_v0 = vsub.f32 %v6539_v37, %v376_v4  ;;  %v492_v18 = vsel %vm260_vm0, %v428_v32, 0.0  ;;  %v495_v37 = vsel %vm260_vm0, %v429_v1, 0.0 }
  0xca   : > { %307 = vadd.xlane.f32.xlu1 %v306_v29  ;;  %490 = vadd.xlane.f32.xlu0 %v489_v3  ;;  %v320_v16 = vpop.xlane.xlu0 %319  ;;  %v341_v14 = vpop.xlane.xlu1 %340 }
  0xcb   : > { %v370_v15 = vmul.f32 0.25, %v320_v16  ;;  %v435_v19 = vmul.f32 %v6699_v6, %v6699_v6  ;;  %v377_v36 = vmul.f32 0.25, %v341_v14  ;;  %v436_v27 = vmul.f32 %v6703_v0, %v6703_v0 }
  0xcd   : > { %v6711_v22 = vsub.f32 %v6546_v40, %v370_v15  ;;  %v6715_v26 = vsub.f32 %v6549_v41, %v377_v36  ;;  %v513_v34 = vsel %vm260_vm0, %v435_v19, 0.0  ;;  %v516_v41 = vsel %vm260_vm0, %v436_v27, 0.0  ;;  %v5911_v36 = vld [vmem:[%s8640_s1 + $0x4] sm:$0xf] }
  0xce   : > { %493 = vadd.xlane.f32.xlu0 %v492_v18  ;;  %511 = vadd.xlane.f32.xlu1 %v510_v33  ;;  %v323_v20 = vpop.xlane.xlu0 %322  ;;  %v326_v30 = vpop.xlane.xlu1 %325  ;;  %v8645_v19 = vmov 0.0  }
  0xcf   : > { %v371_v31 = vmul.f32 0.25, %v323_v20  ;;  %v430_v35 = vmul.f32 %v6711_v22, %v6711_v22  ;;  %v372_v40 = vmul.f32 0.25, %v326_v30  ;;  %v437_v39 = vmul.f32 %v6715_v26, %v6715_v26  ;;  %6103 = vmatprep.subr.mxu0 %v8645_v19  ;;  %6310 = vmatprep.subr.mxu1 %v8645_v19 }
  0xd0   : > { %6104 = vmatpush3.msk.msra.mxu0 %vm1736_vm1, %v5911_v36  ;;  %6311 = vmatpush3.msk.msra.mxu1 %vm1736_vm1, %v5911_v36 }
  0xd1   : > { %v6723_v24 = vsub.f32 %v6556_v44, %v371_v31  ;;  %v6727_v8 = vsub.f32 %v6559_v45, %v372_v40  ;;  %v498_v50 = vsel %vm260_vm0, %v430_v35, 0.0  ;;  %v519_v29 = vsel %vm260_vm0, %v437_v39, 0.0  ;;  %6105 = vmatprep.mubr.msk.f32.mxu0 %vm6397_vm2, %v8645_v19  ;;  %6117 = vmatprep.mubr.msk.f32.mxu1 %vm6397_vm2, %v8645_v19 }
  0xd2   : > { %514 = vadd.xlane.f32.xlu0 %v513_v34  ;;  %496 = vadd.xlane.f32.xlu1 %v495_v37  ;;  %v344_v38 = vpop.xlane.xlu0 %343  ;;  %v347_v46 = vpop.xlane.xlu1 %346 }
  0xd3   : > { %8770 = vst [vmem:[#allocation2_spill] sm:$0xff] %v6727_v8  ;;  %v378_v47 = vmul.f32 0.25, %v344_v38  ;;  %v431_v54 = vmul.f32 %v6723_v24, %v6723_v24  ;;  %v379_v44 = vmul.f32 0.25, %v347_v46  ;;  %v432_v59 = vmul.f32 %v6727_v8, %v6727_v8  ;;  %6126 = vmatprep.subr.mxu1 %v8645_v19  ;;  %6149 = vmatprep.subr.mxu0 %v8645_v19 }
  0xd5   : > { %v6735_v12 = vsub.f32 %v6566_v48, %v378_v47  ;;  %v501_v45 = vsel %vm260_vm0, %v431_v54, 0.0  ;;  %v6742_v3 = vsub.f32 %v6569_v49, %v379_v44  ;;  %v504_v16 = vsel %vm260_vm0, %v432_v59, 0.0 }
  0xd6   : > { %499 = vadd.xlane.f32.xlu0 %v498_v50  ;;  %517 = vadd.xlane.f32.xlu1 %v516_v41  ;;  %v329_v56 = vpop.xlane.xlu0 %328  ;;  %v350_v62 = vpop.xlane.xlu1 %349  ;;  %v6398_v44 = vmov 1966171168  }
  0xd7   : > { %v373_v63 = vmul.f32 0.25, %v329_v56  ;;  %8771 = vst [vmem:[#allocation3_spill] sm:$0xff] %v6742_v3  ;;  %v438_v32 = vmul.f32 %v6735_v12, %v6735_v12  ;;  %v380_v48 = vmul.f32 0.25, %v350_v62  ;;  %v439_v14 = vmul.f32 %v6742_v3, %v6742_v3 }
  0xd8   : > { %v734_v56 = vunpack.c.l.s4 %v6398_v44 }
  0xd9   : > { %v6747_v4 = vsub.f32 %v6576_v52, %v373_v63  ;;  %v522_v33 = vsel %vm260_vm0, %v438_v32, 0.0  ;;  %v6752_v1 = vsub.f32 %v6579_v53, %v380_v48  ;;  %v525_v15 = vsel %vm260_vm0, %v439_v14, 0.0  ;;  %v6779_v48 = vld [vmem:[%s8642_s3] ss:$0 sm:$0xff] }
  0xda   : > { %502 = vadd.xlane.f32.xlu0 %v501_v45  ;;  %520 = vadd.xlane.f32.xlu1 %v519_v29  ;;  %v736_v45 = vlaneseq }
  0xdb   : > { %8772 = vst [vmem:[#allocation4_spill] sm:$0xff] %v6747_v4  ;;  %8773 = vst [vmem:[#allocation5_spill] sm:$0xff] %v6752_v1  ;;  %v433_v49 = vmul.f32 %v6747_v4, %v6747_v4  ;;  %v440_v18 = vmul.f32 %v6752_v1, %v6752_v1 }
  0xdc   : > { %v737_v14 = vshrl.u32 %v736_v45, 7 }
  0xdd   : > { %v507_v52 = vsel %vm260_vm0, %v433_v49, 0.0  ;;  %v528_v53 = vsel %vm260_vm0, %v440_v18, 0.0  ;;  %v735_v49 = vunpack.c.0.s8 %v734_v56 }
  0xde   : > { %523 = vadd.xlane.f32.xlu0 %v522_v33  ;;  %505 = vadd.xlane.f32.xlu1 %v504_v16 }
  0xe2   : > { %508 = vadd.xlane.f32.xlu0 %v507_v52  ;;  %526 = vadd.xlane.f32.xlu1 %v525_v15 }
  0xe6   : > { %529 = vadd.xlane.f32.xlu1 %v528_v53  ;;  %v6785_v53 = vld [vmem:[%s8643_s4] ss:$0 sm:$0xff] }
 0x137   : > { %v467_v20 = vpop.xlane.xlu0 %466 }
 0x138   : > { %v539_v37 = vmul.f32 0.25, %v467_v20 }
 0x13a   : > { %v569_v27 = vadd.f32 1e-06, %v539_v37 }
 0x13b   : > { %v482_v30 = vpop.xlane.xlu0 %481  ;;  %v479_v31 = vpop.xlane.xlu1 %478 }
 0x13c   : > { %6324 = vrsqrt.f32 %v569_v27  ;;  %v544_v34 = vmul.f32 0.25, %v482_v30  ;;  %v543_v35 = vmul.f32 0.25, %v479_v31 }
 0x13e   : > { %v574_v40 = vadd.f32 1e-06, %v544_v34  ;;  %v573_v38 = vadd.f32 1e-06, %v543_v35 }
 0x13f   : > { %v473_v41 = vpop.xlane.xlu0 %472  ;;  %v470_v39 = vpop.xlane.xlu1 %469 }
 0x140   : > { %6326 = vrsqrt.f32 %v574_v40  ;;  %v541_v46 = vmul.f32 0.25, %v473_v41  ;;  %v540_v47 = vmul.f32 0.25, %v470_v39 }
 0x141   : > { %6328 = vrsqrt.f32 %v573_v38 }
 0x142   : > { %v571_v50 = vadd.f32 1e-06, %v541_v46  ;;  %v570_v54 = vadd.f32 1e-06, %v540_v47 }
 0x143   : > { %v476_v29 = vpop.xlane.xlu0 %475  ;;  %v485_v59 = vpop.xlane.xlu1 %484 }
 0x144   : > { %6330 = vrsqrt.f32 %v571_v50  ;;  %v542_v62 = vmul.f32 0.25, %v476_v29  ;;  %v545_v63 = vmul.f32 0.25, %v485_v59 }
 0x145   : > { %6332 = vrsqrt.f32 %v570_v54 }
 0x146   : > { %v6325_v32 = vpop.eup %6324  ;;  %v572_v16 = vadd.f32 1e-06, %v542_v62  ;;  %v575_v33 = vadd.f32 1e-06, %v545_v63 }
 0x147   : > { %v629_v52 = vmul.f32 %v6325_v32, %v6586_v60  ;;  %v443_v15 = vpop.xlane.xlu0 %442  ;;  %v284_v18 = vpop.xlane.xlu1 %283  ;;  %v6791_v60 = vsub.s32 %v735_v49, %v737_v14 }
 0x148   : > { %6334 = vrsqrt.f32 %v572_v16  ;;  %v531_v36 = vmul.f32 0.25, %v443_v15  ;;  %v358_v20 = vmul.f32 0.25, %v284_v18 }
 0x149   : > { %v666_v37 = vmul.f32 %v6779_v48, %v629_v52  ;;  %6336 = vrsqrt.f32 %v575_v33 }
 0x14a   : > { %v6327_v27 = vpop.eup %6326  ;;  %v561_v30 = vadd.f32 1e-06, %v531_v36  ;;  %v6789_v31 = vsub.f32 %v6630_v55, %v358_v20 }
 0x14b   : > { %v6329_v34 = vpop.eup %6328  ;;  %v703_v35 = vadd.f32 %v6785_v53, %v666_v37  ;;  %v634_v40 = vmul.f32 %v6327_v27, %v6589_v61  ;;  %v449_v38 = vpop.xlane.xlu0 %448 }
 0x14c   : > { %8774 = vst [vmem:[#allocation6_spill] sm:$0xff] %v6789_v31  ;;  %v446_v41 = vpop.xlane.xlu1 %445  ;;  %v633_v39 = vmul.f32 %v6329_v34, %v6596_v10  ;;  %6338 = vrsqrt.f32 %v561_v30  ;;  %v533_v46 = vmul.f32 0.25, %v449_v38  ;;  %v418_v55 = vmul.f32 %v6789_v31, %v6789_v31 }
 0x14d   : > { %v532_v47 = vmul.f32 0.25, %v446_v41  ;;  %v671_v50 = vmul.f32 %v6779_v48, %v634_v40  ;;  %v1076_v44 = vcombine.high %v703_v35, %v703_v35  ;;  %v6801_v61 = vrot.slane %v703_v35, %v6791_v60 }
 0x14e   : > { %v6331_v54 = vpop.eup %6330  ;;  %v670_v56 = vmul.f32 %v6779_v48, %v633_v39  ;;  %v563_v45 = vadd.f32 1e-06, %v533_v46  ;;  %v462_v32 = vsel %vm260_vm0, %v418_v55, 0.0 }
 0x14f   : > { %v562_v29 = vadd.f32 1e-06, %v532_v47  ;;  %v6333_v59 = vpop.eup %6332  ;;  %v708_v10 = vadd.f32 %v6785_v53, %v671_v50  ;;  %v631_v62 = vmul.f32 %v6331_v54, %v6608_v2  ;;  %v455_v63 = vpop.xlane.xlu0 %454  ;;  %463 = vadd.xlane.f32.xlu0 %v462_v32  ;;  %v6813_v27 = vrot.slane %v1076_v44, %v6791_v60 }
 0x150   : > { %v707_v16 = vadd.f32 %v6785_v53, %v670_v56  ;;  %v630_v33 = vmul.f32 %v6333_v59, %v6599_v11  ;;  %6340 = vrsqrt.f32 %v563_v45  ;;  %v535_v49 = vmul.f32 0.25, %v455_v63  ;;  %v452_v18 = vpop.xlane.xlu1 %451 }
 0x151   : > { %v1316_v14 = vcombine.high %v708_v10, %v708_v10  ;;  %v1323_v52 = vrot.slane %v708_v10, %v6791_v60  ;;  %v668_v15 = vmul.f32 %v6779_v48, %v631_v62  ;;  %6342 = vrsqrt.f32 %v562_v29 }
 0x152   : > { %v6335_v36 = vpop.eup %6334  ;;  %v1268_v20 = vcombine.high %v707_v16, %v707_v16  ;;  %v1275_v2 = vrot.slane %v707_v16, %v6791_v60  ;;  %v667_v37 = vmul.f32 %v6779_v48, %v630_v33  ;;  %v565_v40 = vadd.f32 1e-06, %v535_v49 }
 0x153   : > { %v6337_v11 = vpop.eup %6336  ;;  %v6816_v30 = vrot.slane %v1316_v14, %v6791_v60  ;;  %v1331_v34 = vcombine.high %v1323_v52, %v1323_v52  ;;  %v705_v35 = vadd.f32 %v6785_v53, %v668_v15  ;;  %v461_v38 = vpop.xlane.xlu0 %460  ;;  %v6820_v41 = vrot.slane %v1323_v52, %v6791_v60 }
 0x154   : > { %v6823_v39 = vrot.slane %v1268_v20, %v6791_v60  ;;  %v1283_v46 = vcombine.high %v1275_v2, %v1275_v2  ;;  %v704_v47 = vadd.f32 %v6785_v53, %v667_v37  ;;  %v6827_v50 = vrot.slane %v1275_v2, %v6791_v60  ;;  %v458_v33 = vpop.xlane.xlu1 %457 }
 0x155   : > { %8775 = vst [vmem:[#allocation7_spill] sm:$0xff] %v6820_v41  ;;  %v1172_v55 = vcombine.high %v705_v35, %v705_v35  ;;  %v1179_v54 = vrot.slane %v705_v35, %v6791_v60  ;;  %v632_v44 = vmul.f32 %v6335_v36, %v6620_v9  ;;  %v6832_v45 = vrot.slane %v1331_v34, %v6791_v60 }
 0x156   : > { %8776 = vst [vmem:[#allocation8_spill] sm:$0xff] %v6827_v50  ;;  %v6339_v56 = vpop.eup %6338  ;;  %v1124_v29 = vcombine.high %v704_v47, %v704_v47  ;;  %v1131_v59 = vrot.slane %v704_v47, %v6791_v60  ;;  %v635_v10 = vmul.f32 %v6337_v11, %v6611_v5  ;;  %v6837_v62 = vrot.slane %v1283_v46, %v6791_v60 }
 0x157   : > { %8777 = vst [vmem:[#allocation9_spill] sm:$0xff] %v6832_v45  ;;  %v6840_v63 = vrot.slane %v1172_v55, %v6791_v60  ;;  %v1187_v32 = vcombine.high %v1179_v54, %v1179_v54  ;;  %v669_v16 = vmul.f32 %v6779_v48, %v632_v44  ;;  %v6843_v9 = vpop.xlane.xlu0 %490  ;;  %v6846_v49 = vrot.slane %v1179_v54, %v6791_v60 }
 0x158   : > { %8778 = vst [vmem:[#allocation10_spill] sm:$0xff] %v6837_v62  ;;  %v6849_v14 = vrot.slane %v1124_v29, %v6791_v60  ;;  %v1139_v52 = vcombine.high %v1131_v59, %v1131_v59  ;;  %v672_v5 = vmul.f32 %v6779_v48, %v635_v10  ;;  %v6856_v36 = vrot.slane %v1131_v59, %v6791_v60 }
 0x159   : > { %8779 = vst [vmem:[#allocation11_spill] sm:$0xff] %v6846_v49  ;;  %v6853_v15 = vrot.slane %v1187_v32, %v6791_v60  ;;  %v706_v20 = vadd.f32 %v6785_v53, %v669_v16  ;;  %v621_v2 = vmul.f32 %v6339_v56, %v6624_v42  ;;  %6344 = vrsqrt.f32 %v565_v40  ;;  %v308_v32 = vpop.xlane.xlu1 %307 }
 0x15a   : > { %8781 = vst [vmem:[#allocation13_spill] sm:$0xff] %v6856_v36  ;;  %v6341_v37 = vpop.eup %6340  ;;  %v709_v11 = vadd.f32 %v6785_v53, %v672_v5  ;;  %v534_v34 = vmul.f32 0.25, %v452_v18  ;;  %v537_v35 = vmul.f32 0.25, %v461_v38  ;;  %v6867_v56 = vrot.slane %v1139_v52, %v6791_v60 }
 0x15b   : > { %8780 = vst [vmem:[#allocation12_spill] sm:$0xff] %v6853_v15  ;;  %v6343_v46 = vpop.eup %6342  ;;  %v1220_v47 = vcombine.high %v706_v20, %v706_v20  ;;  %v1227_v55 = vrot.slane %v706_v20, %v6791_v60  ;;  %v658_v54 = vmul.f32 %v6779_v48, %v621_v2  ;;  %v623_v44 = vmul.f32 %v6341_v37, %v6639_v57  ;;  %v494_v16 = vpop.xlane.xlu0 %493 }
 0x15c   : > { %v1364_v29 = vcombine.high %v709_v11, %v709_v11  ;;  %v1371_v59 = vrot.slane %v709_v11, %v6791_v60  ;;  %v622_v10 = vmul.f32 %v6343_v46, %v6636_v13  ;;  %v564_v42 = vadd.f32 1e-06, %v534_v34  ;;  %8782 = vst [vmem:[#allocation14_spill] sm:$0xff] %v6867_v56 }
 0x15d   : > { %v6870_v18 = vrot.slane %v1220_v47, %v6791_v60  ;;  %v1235_v40 = vcombine.high %v1227_v55, %v1227_v55  ;;  %v695_v38 = vadd.f32 %v6785_v53, %v658_v54  ;;  %v6874_v5 = vrot.slane %v1227_v55, %v6791_v60 }
 0x15e   : > { %v6877_v57 = vrot.slane %v1364_v29, %v6791_v60  ;;  %v1379_v20 = vcombine.high %v1371_v59, %v1371_v59  ;;  %v660_v13 = vmul.f32 %v6779_v48, %v623_v44  ;;  %v6881_v52 = vrot.slane %v1371_v59, %v6791_v60 }
 0x15f   : > { %8783 = vst [vmem:[#allocation15_spill] sm:$0xff] %v6874_v5  ;;  %v732_v2 = vcombine.high %v695_v38, %v695_v38  ;;  %v739_v37 = vrot.slane %v695_v38, %v6791_v60  ;;  %v659_v11 = vmul.f32 %v6779_v48, %v622_v10  ;;  %v6886_v34 = vrot.slane %v1235_v40, %v6791_v60 }
 0x160   : > { %8784 = vst [vmem:[#allocation16_spill] sm:$0xff] %v6881_v52  ;;  %v697_v46 = vadd.f32 %v6785_v53, %v660_v13  ;;  %6346 = vrsqrt.f32 %v564_v42  ;;  %v567_v47 = vadd.f32 1e-06, %v537_v35  ;;  %v6895_v59 = vrot.slane %v1379_v20, %v6791_v60 }
 0x161   : > { %8785 = vst [vmem:[#allocation17_spill] sm:$0xff] %v6886_v34  ;;  %v746_v55 = vrot.slane %v732_v2, %v6791_v60  ;;  %v747_v54 = vcombine.high %v739_v37, %v739_v37  ;;  %v6891_v44 = vrot.slane %v739_v37, %v6791_v60  ;;  %v696_v29 = vadd.f32 %v6785_v53, %v659_v11  ;;  %v512_v2 = vpop.xlane.xlu1 %511  ;;  %v515_v37 = vpop.xlane.xlu0 %514 }
 0x162   : > { %8787 = vst [vmem:[#allocation19_spill] sm:$0xff] %v6895_v59  ;;  %v828_v38 = vcombine.high %v697_v46, %v697_v46  ;;  %v835_v10 = vrot.slane %v697_v46, %v6791_v60  ;;  %6348 = vrsqrt.f32 %v567_v47  ;;  %v536_v42 = vmul.f32 0.25, %v458_v33 }
 0x163   : > { %8786 = vst [vmem:[#allocation18_spill] sm:$0xff] %v6891_v44  ;;  %v748_v40 = vcombine.high %v746_v55, %v746_v55  ;;  %v6899_v13 = vrot.slane %v746_v55, %v6791_v60  ;;  %v6902_v35 = vrot.slane %v747_v54, %v6791_v60  ;;  %v6345_v19 = vpop.eup %6344  ;;  %v780_v46 = vcombine.high %v696_v29, %v696_v29 }
 0x164   : > { %v6907_v20 = vrot.slane %v828_v38, %v6791_v60  ;;  %v843_v31 = vcombine.high %v835_v10, %v835_v10  ;;  %v6919_v54 = vrot.slane %v835_v10, %v6791_v60  ;;  %v787_v1 = vrot.slane %v696_v29, %v6791_v60 }
 0x165   : > { %8788 = vst [vmem:[#allocation20_spill] sm:$0xff] %v6902_v35  ;;  %v6910_v47 = vrot.slane %v748_v40, %v6791_v60  ;;  %v6914_v55 = vcombine.high %v6899_v13, %v6899_v13  ;;  %v6931_v3 = vrot.slane %v780_v46, %v6791_v60  ;;  %v625_v33 = vmul.f32 %v6345_v19, %v6652_v7  ;;  %v497_v46 = vpop.xlane.xlu1 %496  ;;  %v500_v7 = vpop.xlane.xlu0 %499 }
 0x166   : > { %8789 = vst [vmem:[#allocation21_spill] sm:$0xff] %v6907_v20  ;;  %8790 = vst [vmem:[#allocation22_spill] sm:$0xff] %v6919_v54  ;;  %v6927_v40 = vrot.slane %v6907_v20, %v6791_v60  ;;  %v566_v4 = vadd.f32 1e-06, %v536_v42  ;;  %v547_v10 = vmul.f32 0.25, %v6843_v9  ;;  %v6936_v54 = vrot.slane %v843_v31, %v6791_v60 }
 0x167   : > { %8792 = vst [vmem:[#allocation24_spill] sm:$0xff] %v6931_v3  ;;  %v795_v11 = vcombine.high %v787_v1, %v787_v1  ;;  %v366_v8 = vmul.f32 0.25, %v308_v32  ;;  %v548_v38 = vmul.f32 0.25, %v494_v16  ;;  %v662_v29 = vmul.f32 %v6779_v48, %v625_v33 }
 0x168   : > { %8791 = vst [vmem:[#allocation23_spill] sm:$0xff] %v6927_v40  ;;  %8793 = vst [vmem:[#allocation25_spill] sm:$0xff] %v6936_v54  ;;  %v6941_v40 = vrot.slane %v787_v1, %v6791_v60  ;;  %6350 = vrsqrt.f32 %v566_v4  ;;  %v6946_v9 = vrot.slane %v6931_v3, %v6791_v60  ;;  %v577_v31 = vadd.f32 1e-06, %v547_v10 }
 0x169   : > { %v6949_v32 = vsub.f32 %v6681_v51, %v366_v8  ;;  %v578_v16 = vadd.f32 1e-06, %v548_v38  ;;  %v699_v42 = vadd.f32 %v6785_v53, %v662_v29  ;;  %v554_v20 = vmul.f32 0.25, %v512_v2 }
 0x16a   : > { %v6347_v19 = vpop.eup %6346  ;;  %v555_v54 = vmul.f32 0.25, %v515_v37  ;;  %6352 = vrsqrt.f32 %v577_v31  ;;  %v549_v35 = vmul.f32 0.25, %v497_v46  ;;  %v550_v44 = vmul.f32 0.25, %v500_v7 }
 0x16b   : > { %8794 = vst [vmem:[#allocation26_spill] sm:$0xff] %v6949_v32  ;;  %v624_v1 = vmul.f32 %v6347_v19, %v6649_v17  ;;  %v426_v4 = vmul.f32 %v6949_v32, %v6949_v32  ;;  %v924_v3 = vcombine.high %v699_v42, %v699_v42  ;;  %v931_v10 = vrot.slane %v699_v42, %v6791_v60 }
 0x16c   : > { %v6349_v33 = vpop.eup %6348  ;;  %6354 = vrsqrt.f32 %v578_v16  ;;  %v584_v38 = vadd.f32 1e-06, %v554_v20  ;;  %v585_v29 = vadd.f32 1e-06, %v555_v54  ;;  %v6960_v2 = vrot.slane %v795_v11, %v6791_v60 }
 0x16d   : > { %v661_v51 = vmul.f32 %v6779_v48, %v624_v1  ;;  %v627_v8 = vmul.f32 %v6349_v33, %v6664_v21  ;;  %v486_v17 = vsel %vm260_vm0, %v426_v4, 0.0  ;;  %v6963_v37 = vrot.slane %v924_v3, %v6791_v60 }
 0x16e   : > { %v939_v46 = vcombine.high %v931_v10, %v931_v10  ;;  %487 = vadd.xlane.f32.xlu1 %v486_v17  ;;  %v6967_v19 = vrot.slane %v931_v10, %v6791_v60  ;;  %6356 = vrsqrt.f32 %v584_v38  ;;  %v579_v20 = vadd.f32 1e-06, %v549_v35 }
 0x16f   : > { %v698_v7 = vadd.f32 %v6785_v53, %v661_v51  ;;  %v664_v21 = vmul.f32 %v6779_v48, %v627_v8  ;;  %v6974_v11 = vrot.slane %v6963_v37, %v6791_v60  ;;  %v580_v31 = vadd.f32 1e-06, %v550_v44 }
 0x170   : > { %8795 = vst [vmem:[#allocation27_spill] sm:$0xff] %v6967_v19  ;;  %v6977_v16 = vrot.slane %v939_v46, %v6791_v60  ;;  %6358 = vrsqrt.f32 %v585_v29  ;;  %v1091_v4 = vcombine.high %v6801_v61, %v6801_v61  ;;  %v1092_v10 = vcombine.high %v6813_v27, %v6813_v27 }
 0x171   : > { %8796 = vst [vmem:[#allocation28_spill] sm:$0xff] %v6974_v11  ;;  %v876_v3 = vcombine.high %v698_v7, %v698_v7  ;;  %v883_v42 = vrot.slane %v698_v7, %v6791_v60  ;;  %v701_v1 = vadd.f32 %v6785_v53, %v664_v21  ;;  %6360 = vrsqrt.f32 %v579_v20 }
 0x172   : > { %8797 = vst [vmem:[#allocation29_spill] sm:$0xff] %v6977_v16  ;;  %v6351_v33 = vpop.eup %6350  ;;  %v1099_v38 = vrot.slane %v6801_v61, %v6791_v60  ;;  %6362 = vrsqrt.f32 %v580_v31  ;;  %v7011_v54 = vrot.slane %v6813_v27, %v6791_v60  ;;  %v1113_v29 = vrot.slane %v1091_v4, %v6791_v60 }
 0x173   : > { %v6982_v35 = vrot.slane %v876_v3, %v6791_v60  ;;  %v891_v44 = vcombine.high %v883_v42, %v883_v42  ;;  %v1020_v51 = vcombine.high %v701_v1, %v701_v1  ;;  %v1027_v8 = vrot.slane %v701_v1, %v6791_v60 }
 0x174   : > { %v6994_v17 = vrot.slane %v883_v42, %v6791_v60  ;;  %v626_v7 = vmul.f32 %v6351_v33, %v6661_v23  ;;  %v6353_v21 = vpop.eup %6352  ;;  %v1414_v33 = vcombine.low %v1099_v38, %v1113_v29  ;;  %v5912_v32 = vcombine.high %v1099_v38, %v1113_v29 }
 0x175   : > { %v6998_v46 = vrot.slane %v6982_v35, %v6791_v60  ;;  %v7002_v20 = vrot.slane %v891_v44, %v6791_v60  ;;  %v7005_v3 = vrot.slane %v1020_v51, %v6791_v60  ;;  %v1035_v61 = vcombine.high %v1027_v8, %v1027_v8 }
 0x176   : > { %v663_v1 = vmul.f32 %v6779_v48, %v626_v7  ;;  %v637_v42 = vmul.f32 %v6353_v21, %v6673_v25  ;;  %v6355_v23 = vpop.eup %6354  ;;  %v7017_v44 = vrot.slane %v1027_v8, %v6791_v60  ;;  %v7024_v51 = vrot.slane %v1092_v10, %v6791_v60 }
 0x177   : > { %8798 = vst [vmem:[#allocation30_spill] sm:$0xff] %v7005_v3  ;;  %v7021_v31 = vrot.slane %v7005_v3, %v6791_v60  ;;  %v7027_v25 = vrot.slane %v1035_v61, %v6791_v60  ;;  %v638_v7 = vmul.f32 %v6355_v23, %v6686_v28  ;;  %v1122_v8 = vcombine.high %v7011_v54, %v7011_v54 }
 0x178   : > { %8799 = vst [vmem:[#allocation31_spill] sm:$0xff] %v7017_v44  ;;  %v700_v27 = vadd.f32 %v6785_v53, %v663_v1  ;;  %v674_v4 = vmul.f32 %v6779_v48, %v637_v42  ;;  %v6357_v21 = vpop.eup %6356  ;;  %v7042_v23 = vrot.slane %v1414_v33, %v6791_v60 }
 0x179   : > { %8800 = vst [vmem:[#allocation32_spill] sm:$0xff] %v7021_v31  ;;  %8801 = vst [vmem:[#allocation33_spill] sm:$0xff] %v7027_v25  ;;  %v1416_v31 = vcombine.low %v7011_v54, %v7024_v51  ;;  %v675_v1 = vmul.f32 %v6779_v48, %v638_v7  ;;  %v644_v42 = vmul.f32 %v6357_v21, %v6677_v43 }
 0x17a   : > { %v972_v10 = vcombine.high %v700_v27, %v700_v27  ;;  %v979_v44 = vrot.slane %v700_v27, %v6791_v60  ;;  %v711_v61 = vadd.f32 %v6785_v53, %v674_v4  ;;  %v6359_v25 = vpop.eup %6358  ;;  %v1417_v28 = vcombine.low %v1122_v8, %v6856_v36 }
 0x17b   : > { %v6361_v29 = vpop.eup %6360  ;;  %v1431_v4 = vrot.slane %v5912_v32, %v6791_v60  ;;  %v712_v43 = vadd.f32 %v6785_v53, %v675_v1  ;;  %v681_v21 = vmul.f32 %v6779_v48, %v644_v42  ;;  %v645_v33 = vmul.f32 %v6359_v25, %v6699_v6 }
 0x17c   : > { %v7047_v54 = vrot.slane %v972_v10, %v6791_v60  ;;  %v987_v51 = vcombine.high %v979_v44, %v979_v44  ;;  %v2713_v27 = vcombine.high %v711_v61, %v711_v61  ;;  %v2720_v7 = vrot.slane %v711_v61, %v6791_v60  ;;  %v6363_v3 = vpop.eup %6362 }
 0x17d   : > { %v7057_v38 = vrot.slane %v979_v44, %v6791_v60  ;;  %v2761_v42 = vcombine.high %v712_v43, %v712_v43  ;;  %v2768_v6 = vrot.slane %v712_v43, %v6791_v60  ;;  %v718_v44 = vadd.f32 %v6785_v53, %v681_v21 }
 0x17e   : > { %8802 = vst [vmem:[#allocation34_spill] sm:$0xff] %v7047_v54  ;;  %v7061_v10 = vrot.slane %v7047_v54, %v6791_v60  ;;  %v2727_v32 = vrot.slane %v2713_v27, %v6791_v60  ;;  %v2728_v61 = vcombine.high %v2720_v7, %v2720_v7  ;;  %v7065_v1 = vrot.slane %v2720_v7, %v6791_v60 }
 0x17f   : > { %8803 = vst [vmem:[#allocation35_spill] sm:$0xff] %v7057_v38  ;;  %v682_v38 = vmul.f32 %v6779_v48, %v645_v33  ;;  %v7080_v7 = vrot.slane %v2761_v42, %v6791_v60  ;;  %v2776_v54 = vcombine.high %v2768_v6, %v2768_v6  ;;  %v7089_v21 = vrot.slane %v2768_v6, %v6791_v60 }
 0x180   : > { %8804 = vst [vmem:[#allocation36_spill] sm:$0xff] %v7061_v10  ;;  %v2729_v25 = vcombine.high %v2727_v32, %v2727_v32  ;;  %v7069_v8 = vrot.slane %v2727_v32, %v6791_v60  ;;  %v7074_v10 = vrot.slane %v987_v51, %v6791_v60  ;;  %v7077_v27 = vrot.slane %v2728_v61, %v6791_v60 }
 0x181   : > { %8808 = vst [vmem:[#allocation40_spill] sm:$0xff] %v7080_v7  ;;  %v3490_v33 = vcombine.high %v718_v44, %v718_v44  ;;  %v7100_v43 = vrot.slane %v7080_v7, %v6791_v60  ;;  %v3497_v6 = vrot.slane %v718_v44, %v6791_v60  ;;  %v640_v42 = vmul.f32 %v6363_v3, %v6711_v22 }
 0x182   : > { %8805 = vst [vmem:[#allocation37_spill] sm:$0xff] %v7069_v8  ;;  %8806 = vst [vmem:[#allocation38_spill] sm:$0xff] %v7074_v10  ;;  %v7086_v32 = vcombine.high %v7069_v8, %v7069_v8  ;;  %v7092_v51 = vrot.slane %v2729_v25, %v6791_v60  ;;  %v7103_v8 = vrot.slane %v2776_v54, %v6791_v60 }
 0x183   : > { %8807 = vst [vmem:[#allocation39_spill] sm:$0xff] %v7077_v27  ;;  %8810 = vst [vmem:[#allocation42_spill] sm:$0xff] %v7100_v43  ;;  %v3504_v10 = vrot.slane %v3490_v33, %v6791_v60  ;;  %v7108_v25 = vadd.f32 %v6785_v53, %v682_v38  ;;  %v1445_v7 = vrot.slane %v1417_v28, %v6791_v60 }
 0x184   : > { %8809 = vst [vmem:[#allocation41_spill] sm:$0xff] %v7092_v51  ;;  %8811 = vst [vmem:[#allocation43_spill] sm:$0xff] %v7103_v8  ;;  %v639_v51 = vmul.f32 %v6361_v29, %v6691_v58  ;;  %v3505_v43 = vcombine.high %v3497_v6, %v3497_v6  ;;  %v1438_v44 = vrot.slane %v1416_v31, %v6791_v60 }
 0x185   : > { %8812 = vst [vmem:[#allocation44_spill] sm:$0xff] %v7108_v25  ;;  %v3506_v27 = vcombine.high %v3504_v10, %v3504_v10  ;;  %v7116_v54 = vrot.slane %v3504_v10, %v6791_v60  ;;  %v7120_v33 = vrot.slane %v3497_v6, %v6791_v60  ;;  %v7124_v38 = vrot.slane %v7108_v25, %v6791_v60 }
 0x186   : > { %v676_v58 = vmul.f32 %v6779_v48, %v639_v51  ;;  %v677_v22 = vmul.f32 %v6779_v48, %v640_v42  ;;  %v7129_v3 = vrot.slane %v3505_v43, %v6791_v60  ;;  %v1446_v29 = vcombine.low %v7042_v23, %v1431_v4  ;;  %v518_v43 = vpop.xlane.xlu1 %517 }
 0x187   : > { %8813 = vst [vmem:[#allocation45_spill] sm:$0xff] %v7124_v38  ;;  %v7132_v28 = vrot.slane %v3506_v27, %v6791_v60  ;;  %v3536_v31 = vcombine.high %v7116_v54, %v7116_v54  ;;  %v7139_v10 = vrot.slane %v7124_v38, %v6791_v60  ;;  %v1447_v42 = vcombine.low %v1438_v44, %v1445_v7 }
 0x188   : > { %v713_v6 = vadd.f32 %v6785_v53, %v676_v58  ;;  %v714_v51 = vadd.f32 %v6785_v53, %v677_v22  ;;  %v1454_v22 = vrot.slane %v1446_v29, %v6791_v60  ;;  %v7161_v27 = vrot.slane %v6823_v39, %v6791_v60 }
 0x189   : > { %8814 = vst [vmem:[#allocation46_spill] sm:$0xff] %v7132_v28  ;;  %8815 = vst [vmem:[#allocation47_spill] sm:$0xff] %v7139_v10  ;;  %v1461_v44 = vrot.slane %v1447_v42, %v6791_v60  ;;  %v8819_v23 = vcombine.high %v6823_v39, %v6823_v39  ;;  %v7186_v39 = vrot.slane %v6816_v30, %v6791_v60  ;;  %v8827_v28 = vmov 0.0  }
 0x18a   : > { %v2809_v4 = vcombine.high %v713_v6, %v713_v6  ;;  %v7152_v38 = vrot.slane %v713_v6, %v6791_v60  ;;  %v2857_v58 = vcombine.high %v714_v51, %v714_v51  ;;  %v7156_v7 = vrot.slane %v714_v51, %v6791_v60  ;;  %8818 = vst [vmem:[#allocation50_spill] sm:$0xff] %v7161_v27 }
 0x18b   : > { %v7167_v61 = vrot.slane %v8819_v23, %v6791_v60  ;;  %v7170_v6 = vcombine.low %v3536_v31, %v7139_v10  ;;  %v1462_v25 = vcombine.low %v1454_v22, %v1461_v44  ;;  %v7182_v8 = vcombine.high %v7161_v27, %v7161_v27  ;;  %8824 = vst [vmem:[#allocation55_spill] sm:$0xff] %v7186_v39  ;;  %v503_v23 = vpop.xlane.xlu0 %502 }
 0x18c   : > { %8816 = vst [vmem:[#allocation48_spill] sm:$0xff] %v7152_v38  ;;  %8817 = vst [vmem:[#allocation49_spill] sm:$0xff] %v7156_v7  ;;  %v7173_v29 = vrot.slane %v2809_v4, %v6791_v60  ;;  %v2824_v51 = vcombine.high %v7152_v38, %v7152_v38  ;;  %v7178_v42 = vrot.slane %v2857_v58, %v6791_v60  ;;  %v5936_v4 = vld [vmem:[%s8640_s1 + $0x8] sm:$0xf] }
 0x18d   : > { %8820 = vst [vmem:[#allocation51_spill] sm:$0xff] %v7167_v61  ;;  %8821 = vst [vmem:[#allocation52_spill] sm:$0xff] %v7170_v6  ;;  %v1361_v31 = vcombine.high %v6820_v41, %v6820_v41  ;;  %v2872_v22 = vcombine.high %v7156_v7, %v7156_v7  ;;  %v1363_v44 = vcombine.high %v6832_v45, %v6832_v45  ;;  %6106 = vmatmul.mubr.msk.f32.vlgmr.msra.gmra.mrb[0].mxu0 %vm260_vm0, %v1462_v25 }
 0x18e   : > { %8822 = vst [vmem:[#allocation53_spill] sm:$0xff] %v7173_v29  ;;  %8823 = vst [vmem:[#allocation54_spill] sm:$0xff] %v7182_v8  ;;  %v7194_v58 = vrot.slane %v2824_v51, %v6791_v60  ;;  %v1610_v29 = vcombine.low %v7161_v27, %v7167_v61  ;;  %v7204_v10 = vrot.slane %v7178_v42, %v6791_v60  ;;  %6108 = vmatprep.mubr.msk.f32.mxu0 %vm6397_vm2, %v8827_v28 }
 0x18f   : > { %v1611_v38 = vcombine.low %v7182_v8, %v6820_v41  ;;  %v1612_v51 = vcombine.low %v6832_v45, %v1361_v31  ;;  %v1613_v7 = vcombine.low %v1363_v44, %v7186_v39  ;;  %v551_v27 = vmul.f32 0.25, %v503_v23  ;;  %6150 = vmatpush3.msk.msra.mxu0 %vm1736_vm1, %v5936_v4 }
 0x190   : > { %8825 = vst [vmem:[#allocation56_spill] sm:$0xff] %v7194_v58  ;;  %8826 = vst [vmem:[#allocation57_spill] sm:$0xff] %v7204_v10  ;;  %v556_v58 = vmul.f32 0.25, %v518_v43  ;;  %v1620_v6 = vrot.slane %v1610_v29, %v6791_v60  ;;  %v1140_v61 = vcombine.high %v6849_v14, %v6849_v14  ;;  %v1154_v43 = vrot.slane %v6849_v14, %v6791_v60 }
 0x191   : > { %v1627_v25 = vrot.slane %v1611_v38, %v6791_v60  ;;  %v1634_v41 = vrot.slane %v1612_v51, %v6791_v60  ;;  %6195 = vmatprep.subr.mxu0 %v8827_v28  ;;  %v1641_v29 = vrot.slane %v1613_v7, %v6791_v60  ;;  %v581_v31 = vadd.f32 1e-06, %v551_v27  ;;  %v521_v27 = vpop.xlane.xlu1 %520 }
 0x192   : > { %v586_v8 = vadd.f32 1e-06, %v556_v58  ;;  %v1168_v23 = vrot.slane %v1140_v61, %v6791_v60  ;;  %v1169_v44 = vcombine.high %v6856_v36, %v6856_v36  ;;  %v7226_v4 = vcombine.high %v1154_v43, %v1154_v43 }
 0x193   : > { %v1642_v45 = vcombine.low %v1620_v6, %v1627_v25  ;;  %v1171_v38 = vcombine.high %v6867_v56, %v6867_v56  ;;  %v1643_v58 = vcombine.low %v1634_v41, %v1641_v29  ;;  %v1466_v7 = vcombine.low %v6846_v49, %v6853_v15 }
 0x194   : > { %6364 = vrsqrt.f32 %v586_v8  ;;  %v1463_v14 = vcombine.low %v6867_v56, %v1169_v44  ;;  %v1465_v36 = vcombine.low %v1168_v23, %v7226_v4  ;;  %v5117_v6 = vcombine.low %v1154_v43, %v1168_v23  ;;  %v524_v8 = vpop.xlane.xlu0 %523 }
 0x195   : > { %6366 = vrsqrt.f32 %v581_v31  ;;  %v1650_v61 = vrot.slane %v1642_v45, %v6791_v60  ;;  %v1464_v51 = vcombine.low %v1171_v38, %v1154_v43  ;;  %v7236_v25 = vrot.slane %v2872_v22, %v6791_v60 }
 0x196   : > { %v1657_v10 = vrot.slane %v1643_v58, %v6791_v60  ;;  %v1473_v41 = vrot.slane %v1463_v14, %v6791_v60  ;;  %v1494_v29 = vrot.slane %v1466_v7, %v6791_v60  ;;  %v1487_v44 = vrot.slane %v1465_v36, %v6791_v60  ;;  %v1068_v58 = vld [vmem:[%s8640_s1] sm:$0xf] }
 0x197   : > { %v1480_v31 = vrot.slane %v1464_v51, %v6791_v60  ;;  %v5118_v45 = vcombine.low %v7226_v4, %v6846_v49  ;;  %v557_v38 = vmul.f32 0.25, %v521_v27  ;;  %v7246_v43 = vrot.slane %v5117_v6, %v6791_v60 }
 0x198   : > { %v1658_v56 = vcombine.low %v1650_v61, %v1657_v10  ;;  %v558_v22 = vmul.f32 0.25, %v524_v8  ;;  %v1188_v23 = vcombine.high %v6840_v63, %v6840_v63  ;;  %v1496_v7 = vcombine.low %v1487_v44, %v1494_v29 }
 0x199   : > { %8828 = vst [vmem:[#allocation58_spill] sm:$0xff] %v7246_v43  ;;  %v1495_v14 = vcombine.low %v1473_v41, %v1480_v31  ;;  %v587_v51 = vadd.f32 1e-06, %v557_v38  ;;  %v7255_v36 = vrot.slane %v6840_v63, %v6791_v60  ;;  %v1265_v27 = vcombine.high %v6874_v5, %v6874_v5 }
 0x19a   : > { %6118 = vmatmul.mubr.msk.f32.vlgmr.msra.gmra.mrb[0].mxu1 %vm260_vm0, %v1658_v56  ;;  %v588_v10 = vadd.f32 1e-06, %v558_v22  ;;  %v7259_v4 = vrot.slane %v1188_v23, %v6791_v60  ;;  %v5913_v61 = vcombine.high %v6846_v49, %v6853_v15  ;;  %v1510_v8 = vrot.slane %v1496_v7, %v6791_v60 }
 0x19b   : > { %8829 = vst [vmem:[#allocation59_spill] sm:$0xff] %v7255_v36  ;;  %v1503_v6 = vrot.slane %v1495_v14, %v6791_v60  ;;  %6368 = vrsqrt.f32 %v587_v51  ;;  %6120 = vmatprep.mubr.msk.f32.mxu1 %vm6397_vm2, %v8827_v28  ;;  %v7271_v63 = vcombine.high %v7255_v36, %v7255_v36  ;;  %6127 = vmatpush3.msk.msra.mxu1 %vm1736_vm1, %v1068_v58 }
 0x19c   : > { %8830 = vst [vmem:[#allocation60_spill] sm:$0xff] %v7259_v4  ;;  %6370 = vrsqrt.f32 %v588_v10  ;;  %v1513_v56 = vcombine.low %v7255_v36, %v7259_v4  ;;  %v1515_v41 = vcombine.low %v6886_v34, %v1265_v27  ;;  %v1522_v29 = vrot.slane %v5913_v61, %v6791_v60  ;;  %6172 = vmatprep.subr.mxu1 %v8827_v28 }
 0x19d   : > { %8831 = vst [vmem:[#allocation61_spill] sm:$0xff] %v7271_v63  ;;  %v1511_v44 = vcombine.low %v1503_v6, %v1510_v8  ;;  %v1514_v38 = vcombine.low %v7271_v63, %v6874_v5  ;;  %v1332_v22 = vcombine.high %v6816_v30, %v6816_v30  ;;  %v7285_v23 = vcombine.high %v7186_v39, %v7186_v39 }
 0x19e   : > { %v6365_v31 = vpop.eup %6364  ;;  %v1529_v7 = vrot.slane %v1513_v56, %v6791_v60  ;;  %v1543_v51 = vrot.slane %v1515_v41, %v6791_v60  ;;  %v1380_v10 = vcombine.high %v6877_v57, %v6877_v57  ;;  %v7300_v6 = vrot.slane %v6877_v57, %v6791_v60 }
 0x19f   : > { %8832 = vst [vmem:[#allocation62_spill] sm:$0xff] %v7285_v23  ;;  %v6367_v58 = vpop.eup %6366  ;;  %v646_v14 = vmul.f32 %v6365_v31, %v6703_v0  ;;  %6109 = vmatmul.mubr.msk.f32.gmra.mrb[2].mxu0 %vm260_vm0, %v1511_v44  ;;  %v1536_v30 = vrot.slane %v1514_v38, %v6791_v60  ;;  %v7296_v61 = vrot.slane %v1332_v22, %v6791_v60  ;;  %v506_v38 = vpop.xlane.xlu1 %505 }
 0x1a0   : > { %v641_v27 = vmul.f32 %v6367_v58, %v6723_v24  ;;  %8834 = vst [vmem:[#allocation64_spill] sm:$0xff] %v7300_v6  ;;  %6111 = vmatprep.mubr.msk.f32.mxu0 %vm6397_vm2, %v8827_v28  ;;  %v1544_v8 = vcombine.low %v1522_v29, %v1529_v7  ;;  %v7306_v56 = vrot.slane %v1380_v10, %v6791_v60 }
 0x1a1   : > { %8833 = vst [vmem:[#allocation63_spill] sm:$0xff] %v7296_v61  ;;  %v683_v0 = vmul.f32 %v6779_v48, %v646_v14  ;;  %v1660_v24 = vcombine.low %v6881_v52, %v6895_v59  ;;  %v1545_v31 = vcombine.low %v1536_v30, %v1543_v51  ;;  %v1659_v44 = vcombine.low %v7296_v61, %v7285_v23  ;;  %v509_v30 = vpop.xlane.xlu0 %508 }
 0x1a2   : > { %8835 = vst [vmem:[#allocation65_spill] sm:$0xff] %v7306_v56  ;;  %v678_v41 = vmul.f32 %v6779_v48, %v641_v27  ;;  %v5915_v57 = vcombine.high %v6881_v52, %v6895_v59  ;;  %v7319_v29 = vrot.slane %v5118_v45, %v6791_v60  ;;  %v1662_v58 = vcombine.low %v7300_v6, %v7306_v56 }
 0x1a3   : > { %v7316_v22 = vadd.f32 %v6785_v53, %v683_v0  ;;  %v1676_v14 = vrot.slane %v1660_v24, %v6791_v60  ;;  %v1552_v51 = vrot.slane %v1544_v8, %v6791_v60  ;;  %v1559_v10 = vrot.slane %v1545_v31, %v6791_v60 }
 0x1a4   : > { %8836 = vst [vmem:[#allocation66_spill] sm:$0xff] %v7319_v29  ;;  %v715_v7 = vadd.f32 %v6785_v53, %v678_v41  ;;  %v1669_v27 = vrot.slane %v1659_v44, %v6791_v60  ;;  %v1683_v45 = vrot.slane %v5915_v57, %v6791_v60  ;;  %v1690_v39 = vrot.slane %v1662_v58, %v6791_v60 }
 0x1a5   : > { %v552_v61 = vmul.f32 0.25, %v506_v38  ;;  %v6369_v23 = vpop.eup %6368  ;;  %v1560_v41 = vcombine.low %v1552_v51, %v1559_v10  ;;  %v553_v5 = vmul.f32 0.25, %v509_v30  ;;  %v7338_v0 = vrot.slane %v7316_v22, %v6791_v60 }
 0x1a6   : > { %v2905_v59 = vcombine.high %v715_v7, %v715_v7  ;;  %v7333_v24 = vrot.slane %v715_v7, %v6791_v60  ;;  %v1691_v8 = vcombine.low %v1669_v27, %v1676_v14  ;;  %v6371_v52 = vpop.eup %6370  ;;  %v647_v31 = vmul.f32 %v6369_v23, %v6715_v26  ;;  %v527_v27 = vpop.xlane.xlu1 %526 }
 0x1a7   : > { %v1692_v44 = vcombine.low %v1683_v45, %v1690_v39  ;;  %v582_v36 = vadd.f32 1e-06, %v552_v61  ;;  %v648_v38 = vmul.f32 %v6371_v52, %v6735_v12  ;;  %6112 = vmatmul.mubr.msk.f32.gmra.mrb[4].mxu0 %vm260_vm0, %v1560_v41  ;;  %v583_v39 = vadd.f32 1e-06, %v553_v5 }
 0x1a8   : > { %v2920_v57 = vcombine.high %v7333_v24, %v7333_v24  ;;  %v1699_v58 = vrot.slane %v1691_v8, %v6791_v60  ;;  %v684_v14 = vmul.f32 %v6779_v48, %v647_v31  ;;  %6114 = vmatprep.mubr.msk.f32.mxu0 %vm6397_vm2, %v8827_v28  ;;  %v7350_v23 = vrot.slane %v2905_v59, %v6791_v60 }
 0x1a9   : > { %v1706_v26 = vrot.slane %v1692_v44, %v6791_v60  ;;  %6372 = vrsqrt.f32 %v582_v36  ;;  %v685_v61 = vmul.f32 %v6779_v48, %v648_v38  ;;  %v1236_v12 = vcombine.high %v6870_v18, %v6870_v18 }
 0x1aa   : > { %v7357_v52 = vrot.slane %v6870_v18, %v6791_v60  ;;  %v7360_v7 = vadd.f32 %v6785_v53, %v684_v14  ;;  %6374 = vrsqrt.f32 %v583_v39  ;;  %v1267_v5 = vcombine.high %v6886_v34, %v6886_v34 }
 0x1ab   : > { %v1707_v36 = vcombine.low %v1699_v58, %v1706_v26  ;;  %v7365_v59 = vadd.f32 %v6785_v53, %v685_v61  ;;  %v7368_v51 = vrot.slane %v1236_v12, %v6791_v60  ;;  %v1563_v18 = vcombine.low %v6827_v50, %v6837_v62 }
 0x1ac   : > { %8837 = vst [vmem:[#allocation67_spill] sm:$0xff] %v7357_v52  ;;  %v7372_v10 = vcombine.high %v7357_v52, %v7357_v52  ;;  %v7377_v30 = vrot.slane %v2920_v57, %v6791_v60  ;;  %v1561_v41 = vcombine.low %v1267_v5, %v7357_v52  ;;  %v5914_v8 = vcombine.high %v6827_v50, %v6837_v62  ;;  %v8841_v5 = vld [vmem:[#allocation18_spill] sm:$0xff] }
 0x1ad   : > { %8838 = vst [vmem:[#allocation68_spill] sm:$0xff] %v7368_v51  ;;  %6121 = vmatmul.mubr.msk.f32.gmra.mrb[2].mxu1 %vm260_vm0, %v1707_v36  ;;  %v7387_v31 = vrot.slane %v7360_v7, %v6791_v60  ;;  %v1585_v38 = vrot.slane %v1563_v18, %v6791_v60  ;;  %v7400_v26 = vcombine.high %v7300_v6, %v7300_v6  ;;  %v559_v39 = vmul.f32 0.25, %v527_v27  ;;  %v8842_v18 = vld [vmem:[#allocation20_spill] sm:$0xff] }
 0x1ae   : > { %8839 = vst [vmem:[#allocation69_spill] sm:$0xff] %v7372_v10  ;;  %6123 = vmatprep.mubr.msk.f32.mxu1 %vm6397_vm2, %v8827_v28  ;;  %v1562_v57 = vcombine.low %v7368_v51, %v7372_v10  ;;  %v1571_v58 = vrot.slane %v1561_v41, %v6791_v60  ;;  %v1592_v14 = vrot.slane %v5914_v8, %v6791_v60 }
 0x1af   : > { %8840 = vst [vmem:[#allocation70_spill] sm:$0xff] %v7400_v26  ;;  %v1842_v12 = vcombine.low %v6899_v13, %v6910_v47  ;;  %v1843_v36 = vcombine.low %v6914_v55, %v6941_v40  ;;  %v8843_v44 = vcombine.low %v8841_v5, %v8842_v18  ;;  %v1714_v8 = vrot.slane %v7400_v26, %v6791_v60 }
 0x1b0   : > { %v1578_v61 = vrot.slane %v1562_v57, %v6791_v60  ;;  %v1594_v45 = vcombine.low %v1585_v38, %v1592_v14  ;;  %v589_v6 = vadd.f32 1e-06, %v559_v39  ;;  %v8844_v62 = vcombine.high %v8841_v5, %v8842_v18  ;;  %v8845_v39 = vld [vmem:[#allocation2_spill] sm:$0xff] }
 0x1b1   : > { %v1850_v41 = vrot.slane %v8843_v44, %v6791_v60  ;;  %v1864_v52 = vrot.slane %v1842_v12, %v6791_v60  ;;  %v1871_v51 = vrot.slane %v1843_v36, %v6791_v60  ;;  %v1721_v38 = vrot.slane %v1714_v8, %v6791_v60  ;;  %v530_v8 = vpop.xlane.xlu1 %529 }
 0x1b2   : > { %v1593_v57 = vcombine.low %v1571_v58, %v1578_v61  ;;  %v1857_v10 = vrot.slane %v8844_v62, %v6791_v60  ;;  %v1608_v44 = vrot.slane %v1594_v45, %v6791_v60  ;;  %6376 = vrsqrt.f32 %v589_v6 }
 0x1b3   : > { %v6373_v50 = vpop.eup %6372  ;;  %v779_v14 = vcombine.high %v8842_v18, %v8842_v18  ;;  %v1873_v26 = vcombine.low %v1864_v52, %v1871_v51  ;;  %6124 = vmatmul.mubr.msk.f32.gmra.mrb[4].mxu1 %vm260_vm0, %v1721_v38  ;;  %v2265_v12 = vcombine.high %v6910_v47, %v6910_v47  ;;  %v8846_v45 = vcombine.high %v8841_v5, %v8841_v5  ;;  %v8847_v52 = vld [vmem:[#allocation4_spill] sm:$0xff] }
 0x1b4   : > { %v642_v58 = vmul.f32 %v6373_v50, %v8845_v39  ;;  %v1601_v61 = vrot.slane %v1593_v57, %v6791_v60  ;;  %v1872_v27 = vcombine.low %v1850_v41, %v1857_v10  ;;  %v6375_v62 = vpop.eup %6374  ;;  %v2276_v50 = vcombine.low %v6910_v47, %v6914_v55  ;;  %6128 = vmatprep.mubr.msk.f32.mxu1 %vm6397_vm2, %v8827_v28 }
 0x1b5   : > { %v2274_v6 = vcombine.low %v8842_v18, %v8846_v45  ;;  %v2275_v36 = vcombine.low %v779_v14, %v6899_v13  ;;  %v643_v51 = vmul.f32 %v6375_v62, %v8847_v52  ;;  %v1887_v5 = vrot.slane %v1873_v26, %v6791_v60  ;;  %v7468_v45 = vld [vmem:[%s8643_s4] ss:$0 sm:$0xff] }
 0x1b6   : > { %v679_v10 = vmul.f32 %v6779_v48, %v642_v58  ;;  %v1609_v41 = vcombine.low %v1601_v61, %v1608_v44  ;;  %v1880_v57 = vrot.slane %v1872_v27, %v6791_v60  ;;  %v2277_v18 = vcombine.low %v2265_v12, %v6960_v2  ;;  %v7450_v48 = vld [vmem:[%s8642_s3] ss:$0 sm:$0xff] }
 0x1b7   : > { %v2284_v13 = vrot.slane %v2274_v6, %v6791_v60  ;;  %v2291_v38 = vrot.slane %v2275_v36, %v6791_v60  ;;  %v680_v55 = vmul.f32 %v7450_v48, %v643_v51  ;;  %v2298_v27 = vrot.slane %v2276_v50, %v6791_v60  ;;  %v5951_v50 = vld [vmem:[%s8640_s1 + $0xc] sm:$0xf] }
 0x1b8   : > { %v716_v47 = vadd.f32 %v6785_v53, %v679_v10  ;;  %6115 = vmatmul.mubr.msk.f32.gmra.mrb[6].mxu0 %vm260_vm0, %v1609_v41  ;;  %v560_v26 = vmul.f32 0.25, %v530_v8  ;;  %v1888_v44 = vcombine.low %v1880_v57, %v1887_v5  ;;  %v2305_v14 = vrot.slane %v2277_v18, %v6791_v60  ;;  %v8848_v53 = vld [vmem:[#allocation24_spill] sm:$0xff] }
 0x1b9   : > { %6151 = vmatprep.mubr.msk.f32.mxu0 %vm6397_vm2, %v8827_v28  ;;  %v2306_v39 = vcombine.low %v2284_v13, %v2291_v38  ;;  %v8849_v58 = vcombine.high %v8848_v53, %v8848_v53  ;;  %v717_v6 = vadd.f32 %v7468_v45, %v680_v55  ;;  %v825_v52 = vcombine.high %v6941_v40, %v6941_v40 }
 0x1ba   : > { %v2953_v62 = vcombine.high %v716_v47, %v716_v47  ;;  %v7463_v12 = vrot.slane %v716_v47, %v6791_v60  ;;  %v590_v36 = vadd.f32 1e-06, %v560_v26  ;;  %6129 = vmatmul.mubr.msk.f32.vlgmr.msra.gmra.mrb[6].mxu1 %vm260_vm0, %v1888_v44  ;;  %v2307_v8 = vcombine.low %v2298_v27, %v2305_v14 }
 0x1bb   : > { %v824_v61 = vrot.slane %v8849_v58, %v6791_v60  ;;  %v2314_v10 = vrot.slane %v2306_v39, %v6791_v60  ;;  %v7480_v51 = vcombine.high %v6946_v9, %v6946_v9  ;;  %v3001_v5 = vcombine.high %v717_v6, %v717_v6  ;;  %6131 = vmatprep.mubr.msk.f32.mxu1 %vm6397_vm2, %v8827_v28  ;;  %v8850_v39 = vld [vmem:[#allocation3_spill] sm:$0xff] }
 0x1bc   : > { %v7483_v41 = vrot.slane %v2953_v62, %v6791_v60  ;;  %v2968_v57 = vcombine.high %v7463_v12, %v7463_v12  ;;  %v7488_v18 = vrot.slane %v717_v6, %v6791_v60  ;;  %v6377_v13 = vpop.eup %6376  ;;  %v2321_v38 = vrot.slane %v2307_v8, %v6791_v60  ;;  %6173 = vmatpush3.msk.msra.mxu1 %vm1736_vm1, %v5951_v50  ;;  %v8851_v50 = vld [vmem:[#allocation25_spill] sm:$0xff]  ;;  %v8852_v8 = vld [vmem:[#allocation22_spill] sm:$0xff] }
 0x1bd   : > { %6378 = vrsqrt.f32 %v590_v36  ;;  %v827_v47 = vcombine.high %v6960_v2, %v6960_v2  ;;  %v1889_v55 = vcombine.low %v6960_v2, %v825_v52  ;;  %v7499_v27 = vrot.slane %v7365_v59, %v6791_v60  ;;  %6218 = vmatprep.subr.mxu1 %v8827_v28 }
 0x1be   : > { %v7503_v26 = vrot.slane %v7483_v41, %v6791_v60  ;;  %v7506_v44 = vrot.slane %v2968_v57, %v6791_v60  ;;  %v7509_v14 = vrot.slane %v3001_v5, %v6791_v60  ;;  %v649_v53 = vmul.f32 %v6377_v13, %v8850_v39  ;;  %v5964_v5 = vld [vmem:[%s8640_s1 + $0x10] sm:$0xf] }
 0x1bf   : > { %v2322_v58 = vcombine.low %v2314_v10, %v2321_v38  ;;  %v1890_v62 = vcombine.low %v827_v47, %v6946_v9  ;;  %v1891_v6 = vcombine.low %v824_v61, %v7480_v51  ;;  %v3016_v36 = vcombine.high %v7488_v18, %v7488_v18 }
 0x1c0   : > { %v1892_v52 = vcombine.low %v8852_v8, %v8851_v50  ;;  %v1899_v57 = vrot.slane %v1889_v55, %v6791_v60  ;;  %v2266_v56 = vcombine.high %v824_v61, %v824_v61  ;;  %v686_v13 = vmul.f32 %v7450_v48, %v649_v53 }
 0x1c1   : > { %6152 = vmatmul.mubr.msk.f32.vlgmr.msra.gmra.mrb[8].mxu0 %vm260_vm0, %v2322_v58  ;;  %v1906_v10 = vrot.slane %v1890_v62, %v6791_v60  ;;  %v1913_v38 = vrot.slane %v1891_v6, %v6791_v60  ;;  %v873_v47 = vcombine.high %v8852_v8, %v8852_v8  ;;  %v5937_v34 = vcombine.high %v6941_v40, %v6960_v2 }
 0x1c2   : > { %6154 = vmatprep.mubr.msk.f32.mxu0 %vm6397_vm2, %v8827_v28  ;;  %v1920_v55 = vrot.slane %v1892_v52, %v6791_v60  ;;  %v5550_v39 = vcombine.low %v2266_v56, %v8851_v50  ;;  %v2324_v53 = vcombine.low %v6946_v9, %v824_v61  ;;  %v7537_v58 = vadd.f32 %v7468_v45, %v686_v13 }
 0x1c3   : > { %v1921_v62 = vcombine.low %v1899_v57, %v1906_v10  ;;  %v5938_v6 = vcombine.high %v6946_v9, %v824_v61  ;;  %v2326_v4 = vcombine.low %v8851_v50, %v873_v47  ;;  %6196 = vmatpush3.msk.msra.mxu0 %vm1736_vm1, %v5964_v5  ;;  %v2333_v56 = vrot.slane %v5937_v34, %v6791_v60 }
 0x1c4   : > { %v1922_v63 = vcombine.low %v1913_v38, %v1920_v55  ;;  %v5557_v52 = vrot.slane %v5550_v39, %v6791_v60  ;;  %v7545_v15 = vrot.slane %v2324_v53, %v6791_v60  ;;  %6241 = vmatprep.subr.mxu0 %v8827_v28  ;;  %v7549_v13 = vrot.slane %v3016_v36, %v6791_v60  ;;  %v8853_v53 = vld [vmem:[#allocation21_spill] sm:$0xff] }
 0x1c5   : > { %v1929_v61 = vrot.slane %v1921_v62, %v6791_v60  ;;  %v2347_v57 = vrot.slane %v5938_v6, %v6791_v60  ;;  %v7557_v34 = vrot.slane %v2326_v4, %v6791_v60  ;;  %v4752_v36 = vcombine.low %v6941_v40, %v6960_v2  ;;  %v8857_v4 = vld [vmem:[#allocation5_spill] sm:$0xff] }
 0x1c6   : > { %v1936_v5 = vrot.slane %v1922_v63, %v6791_v60  ;;  %v5558_v10 = vcombine.low %v1913_v38, %v5557_v52  ;;  %v2355_v47 = vcombine.low %v2333_v56, %v7545_v15  ;;  %v4753_v39 = vcombine.low %v7480_v51, %v8852_v8  ;;  %v8856_v63 = vld [vmem:[#allocation23_spill] sm:$0xff] }
 0x1c7   : > { %v6379_v55 = vpop.eup %6378  ;;  %v8854_v62 = vcombine.high %v8853_v53, %v8853_v53  ;;  %v874_v38 = vcombine.high %v8856_v63, %v8856_v63  ;;  %v2356_v43 = vcombine.low %v2347_v57, %v7557_v34  ;;  %v4760_v2 = vrot.slane %v4752_v36, %v6791_v60 }
 0x1c8   : > { %v650_v52 = vmul.f32 %v6379_v55, %v8857_v4  ;;  %v1937_v9 = vcombine.low %v1929_v61, %v1936_v5  ;;  %v5565_v49 = vrot.slane %v5558_v10, %v6791_v60  ;;  %v2363_v40 = vrot.slane %v2355_v47, %v6791_v60 }
 0x1c9   : > { %v7568_v6 = vrot.slane %v8854_v62, %v6791_v60  ;;  %v7578_v51 = vrot.slane %v4753_v39, %v6791_v60  ;;  %v921_v53 = vcombine.high %v6994_v17, %v6994_v17  ;;  %v2370_v5 = vrot.slane %v2356_v43, %v6791_v60 }
 0x1ca   : > { %v687_v62 = vmul.f32 %v7450_v48, %v650_v52  ;;  %6132 = vmatmul.mubr.msk.f32.gmra.mrb[8].mxu1 %vm260_vm0, %v1937_v9  ;;  %v7584_v55 = vcombine.low %v1929_v61, %v5565_v49  ;;  %v5925_v57 = vcombine.high %v8852_v8, %v8851_v50  ;;  %v4768_v10 = vcombine.low %v4760_v2, %v2333_v56 }
 0x1cb   : > { %8855 = vst [vmem:[#allocation18_spill] sm:$0xff] %v7568_v6  ;;  %6134 = vmatprep.mubr.msk.f32.mxu1 %vm6397_vm2, %v8827_v28  ;;  %v1939_v36 = vcombine.low %v8856_v63, %v7568_v6  ;;  %v1940_v48 = vcombine.low %v874_v38, %v6994_v17  ;;  %v7598_v49 = vrot.slane %v7537_v58, %v6791_v60 }
 0x1cc   : > { %8858 = vst [vmem:[#allocation20_spill] sm:$0xff] %v7584_v55  ;;  %v7601_v43 = vadd.f32 %v7468_v45, %v687_v62  ;;  %v2371_v8 = vcombine.low %v2363_v40, %v2370_v5  ;;  %v1941_v56 = vcombine.low %v7002_v20, %v921_v53  ;;  %v7605_v9 = vrot.slane %v4768_v10, %v6791_v60 }
 0x1cd   : > { %v1948_v61 = vrot.slane %v5925_v57, %v6791_v60  ;;  %v1955_v39 = vrot.slane %v1939_v36, %v6791_v60  ;;  %v1962_v4 = vrot.slane %v1940_v48, %v6791_v60  ;;  %v875_v40 = vcombine.high %v8851_v50, %v8851_v50 }
 0x1ce   : > { %v7614_v2 = vrot.slane %v7601_v43, %v6791_v60  ;;  %6155 = vmatmul.mubr.msk.f32.gmra.mrb[10].mxu0 %vm260_vm0, %v2371_v8  ;;  %v7618_v45 = vrot.slane %v1941_v56, %v6791_v60  ;;  %v2267_v62 = vcombine.high %v7568_v6, %v7568_v6  ;;  %v2373_v5 = vcombine.low %v7568_v6, %v874_v38 }
 0x1cf   : > { %6157 = vmatprep.mubr.msk.f32.mxu0 %vm6397_vm2, %v8827_v28  ;;  %v1970_v53 = vcombine.low %v1948_v61, %v1955_v39  ;;  %v5939_v57 = vcombine.high %v6994_v17, %v7002_v20  ;;  %v2372_v36 = vcombine.low %v875_v40, %v8856_v63  ;;  %v8860_v50 = vcombine.high %v6982_v35, %v6982_v35 }
 0x1d0   : > { %8859 = vst [vmem:[#allocation2_spill] sm:$0xff] %v7618_v45  ;;  %v1971_v10 = vcombine.low %v1962_v4, %v7618_v45  ;;  %v7639_v8 = vcombine.high %v6998_v46, %v6998_v46  ;;  %v2374_v38 = vcombine.low %v2267_v62, %v7002_v20  ;;  %v7646_v61 = vrot.slane %v2373_v5, %v6791_v60 }
 0x1d1   : > { %v7635_v48 = vrot.slane %v8860_v50, %v6791_v60  ;;  %v7642_v56 = vrot.slane %v1970_v53, %v6791_v60  ;;  %v7649_v39 = vrot.slane %v5939_v57, %v6791_v60  ;;  %v7653_v35 = vrot.slane %v2372_v36, %v6791_v60 }
 0x1d2   : > { %8862 = vst [vmem:[#allocation24_spill] sm:$0xff] %v7639_v8  ;;  %8864 = vst [vmem:[#allocation25_spill] sm:$0xff] %v7646_v61  ;;  %v1985_v4 = vrot.slane %v1971_v10, %v6791_v60  ;;  %v923_v40 = vcombine.high %v7002_v20, %v7002_v20  ;;  %v2396_v50 = vrot.slane %v2374_v38, %v6791_v60 }
 0x1d3   : > { %8861 = vst [vmem:[#allocation4_spill] sm:$0xff] %v7635_v48  ;;  %8863 = vst [vmem:[#allocation3_spill] sm:$0xff] %v7642_v56  ;;  %v1988_v53 = vcombine.low %v7635_v48, %v7639_v8  ;;  %v1989_v62 = vcombine.low %v6967_v19, %v6977_v16  ;;  %v5926_v5 = vcombine.high %v6967_v19, %v6977_v16 }
 0x1d4   : > { %8865 = vst [vmem:[#allocation22_spill] sm:$0xff] %v7649_v39  ;;  %v969_v57 = vcombine.high %v6967_v19, %v6967_v19  ;;  %v1986_v10 = vcombine.low %v7642_v56, %v1985_v4  ;;  %v2404_v36 = vcombine.low %v7653_v35, %v7646_v61  ;;  %v1987_v47 = vcombine.low %v923_v40, %v6998_v46  ;;  %v8916_v61 = vld [vmem:[#allocation53_spill] sm:$0xff] }
 0x1d5   : > { %v2004_v52 = vrot.slane %v1988_v53, %v6791_v60  ;;  %v2405_v38 = vcombine.low %v2396_v50, %v7649_v39  ;;  %v2011_v55 = vrot.slane %v1989_v62, %v6791_v60  ;;  %v7674_v45 = vrot.slane %v5926_v5, %v6791_v60 }
 0x1d6   : > { %v971_v63 = vcombine.high %v6977_v16, %v6977_v16  ;;  %6135 = vmatmul.mubr.msk.f32.gmra.mrb[10].mxu1 %vm260_vm0, %v1986_v10  ;;  %v2412_v4 = vrot.slane %v2404_v36, %v6791_v60  ;;  %v1997_v56 = vrot.slane %v1987_v47, %v6791_v60  ;;  %v2421_v40 = vcombine.low %v6998_v46, %v7635_v48 }
 0x1d7   : > { %8866 = vst [vmem:[#allocation21_spill] sm:$0xff] %v7674_v45  ;;  %v5940_v53 = vcombine.high %v6998_v46, %v7635_v48  ;;  %v2419_v50 = vrot.slane %v2405_v38, %v6791_v60  ;;  %6137 = vmatprep.mubr.msk.f32.mxu1 %vm6397_vm2, %v8827_v28  ;;  %v2020_v62 = vcombine.low %v2011_v55, %v7674_v45 }
 0x1d8   : > { %v2423_v5 = vcombine.low %v6977_v16, %v969_v57  ;;  %v2424_v10 = vcombine.low %v971_v63, %v6974_v11  ;;  %v2019_v36 = vcombine.low %v1997_v56, %v2004_v52  ;;  %v7692_v47 = vrot.slane %v2421_v40, %v6791_v60 }
 0x1d9   : > { %v2438_v6 = vrot.slane %v5940_v53, %v6791_v60  ;;  %v8868_v46 = vcombine.high %v6963_v37, %v6963_v37  ;;  %v2420_v48 = vcombine.low %v2412_v4, %v2419_v50  ;;  %v2034_v29 = vrot.slane %v2020_v62, %v6791_v60  ;;  %v8873_v37 = vld [vmem:[#allocation35_spill] sm:$0xff]  ;;  %v8874_v53 = vld [vmem:[#allocation38_spill] sm:$0xff] }
 0x1da   : > { %8867 = vst [vmem:[#allocation5_spill] sm:$0xff] %v7692_v47  ;;  %v7703_v55 = vrot.slane %v2423_v5, %v6791_v60  ;;  %v7706_v63 = vrot.slane %v2424_v10, %v6791_v60  ;;  %v7709_v52 = vrot.slane %v2019_v36, %v6791_v60  ;;  %v970_v57 = vcombine.high %v6974_v11, %v6974_v11  ;;  %v8875_v5 = vld [vmem:[#allocation34_spill] sm:$0xff] }
 0x1db   : > { %v7699_v38 = vrot.slane %v8868_v46, %v6791_v60  ;;  %v2453_v56 = vcombine.low %v7692_v47, %v2438_v6  ;;  %v1017_v40 = vcombine.high %v8873_v37, %v8873_v37  ;;  %6158 = vmatmul.mubr.msk.f32.gmra.mrb[12].mxu0 %vm260_vm0, %v2420_v48  ;;  %v1019_v50 = vcombine.high %v8874_v53, %v8874_v53  ;;  %v8907_v47 = vld [vmem:[#allocation40_spill] sm:$0xff] }
 0x1dc   : > { %8870 = vst [vmem:[#allocation72_spill] sm:$0xff] %v7703_v55  ;;  %8871 = vst [vmem:[#allocation73_spill] sm:$0xff] %v7706_v63  ;;  %v2454_v4 = vcombine.low %v7703_v55, %v7706_v63  ;;  %v8876_v6 = vcombine.high %v8875_v5, %v8875_v5  ;;  %6160 = vmatprep.mubr.msk.f32.mxu0 %vm6397_vm2, %v8827_v28  ;;  %v2035_v48 = vcombine.low %v7709_v52, %v2034_v29 }
 0x1dd   : > { %8869 = vst [vmem:[#allocation71_spill] sm:$0xff] %v7699_v38  ;;  %8872 = vst [vmem:[#allocation74_spill] sm:$0xff] %v7709_v52  ;;  %v2036_v62 = vcombine.low %v6974_v11, %v7699_v38  ;;  %v2461_v36 = vrot.slane %v2453_v56, %v6791_v60  ;;  %v2037_v46 = vcombine.low %v970_v57, %v8873_v37  ;;  %v8878_v11 = vld [vmem:[#allocation36_spill] sm:$0xff] }
 0x1de   : > { %v7727_v10 = vrot.slane %v8876_v6, %v6791_v60  ;;  %v2038_v45 = vcombine.low %v8874_v53, %v1017_v40  ;;  %v2468_v16 = vrot.slane %v2454_v4, %v6791_v60  ;;  %v2039_v63 = vcombine.low %v1019_v50, %v8878_v11  ;;  %6138 = vmatmul.mubr.msk.f32.gmra.mrb[12].mxu1 %vm260_vm0, %v2035_v48 }
 0x1df   : > { %v7738_v55 = vrot.slane %v2036_v62, %v6791_v60  ;;  %v2269_v5 = vcombine.high %v7699_v38, %v7699_v38  ;;  %v2053_v29 = vrot.slane %v2037_v46, %v6791_v60  ;;  %v2470_v6 = vcombine.low %v7699_v38, %v970_v57  ;;  %6140 = vmatprep.mubr.msk.f32.mxu1 %vm6397_vm2, %v8827_v28  ;;  %v8890_v38 = vld [vmem:[#allocation32_spill] sm:$0xff] }
 0x1e0   : > { %8877 = vst [vmem:[#allocation34_spill] sm:$0xff] %v7727_v10  ;;  %v2060_v56 = vrot.slane %v2038_v45, %v6791_v60  ;;  %v5941_v40 = vcombine.high %v8873_v37, %v8874_v53  ;;  %v2469_v4 = vcombine.low %v2461_v36, %v2468_v16  ;;  %v2067_v50 = vrot.slane %v2039_v63, %v6791_v60 }
 0x1e1   : > { %8879 = vst [vmem:[#allocation36_spill] sm:$0xff] %v7738_v55  ;;  %v2471_v62 = vcombine.low %v2269_v5, %v8874_v53  ;;  %v2473_v48 = vcombine.low %v8878_v11, %v7727_v10  ;;  %v2068_v46 = vcombine.low %v7738_v55, %v2053_v29  ;;  %v7756_v45 = vrot.slane %v2470_v6, %v6791_v60  ;;  %v8884_v29 = vld [vmem:[#allocation30_spill] sm:$0xff] }
 0x1e2   : > { %v7759_v57 = vrot.slane %v5941_v40, %v6791_v60  ;;  %v7763_v16 = vcombine.high %v8878_v11, %v8878_v11  ;;  %6161 = vmatmul.mubr.msk.f32.gmra.mrb[14].mxu0 %vm260_vm0, %v2469_v4  ;;  %v2069_v63 = vcombine.low %v2060_v56, %v2067_v50  ;;  %v8885_v6 = vcombine.high %v8884_v29, %v8884_v29  ;;  %v8887_v56 = vld [vmem:[#allocation33_spill] sm:$0xff]  ;;  %v8888_v50 = vld [vmem:[#allocation31_spill] sm:$0xff] }
 0x1e3   : > { %8880 = vst [vmem:[#allocation75_spill] sm:$0xff] %v7756_v45  ;;  %v2487_v36 = vrot.slane %v2471_v62, %v6791_v60  ;;  %v7768_v5 = vrot.slane %v2473_v48, %v6791_v60  ;;  %6163 = vmatprep.mubr.msk.f32.mxu0 %vm6397_vm2, %v8827_v28  ;;  %v2076_v40 = vrot.slane %v2068_v46, %v6791_v60 }
 0x1e4   : > { %8881 = vst [vmem:[#allocation76_spill] sm:$0xff] %v7759_v57  ;;  %8882 = vst [vmem:[#allocation77_spill] sm:$0xff] %v7763_v16  ;;  %v7774_v52 = vrot.slane %v8885_v6, %v6791_v60  ;;  %v2085_v4 = vcombine.low %v7727_v10, %v7763_v16  ;;  %v2086_v62 = vcombine.low %v8888_v50, %v8887_v56 }
 0x1e5   : > { %8883 = vst [vmem:[#allocation78_spill] sm:$0xff] %v7768_v5  ;;  %v5927_v48 = vcombine.high %v8888_v50, %v8887_v56  ;;  %v7786_v55 = vrot.slane %v2069_v63, %v6791_v60  ;;  %v2502_v29 = vcombine.low %v7756_v45, %v2487_v36  ;;  %v2503_v6 = vcombine.low %v7759_v57, %v7768_v5 }
 0x1e6   : > { %8886 = vst [vmem:[#allocation30_spill] sm:$0xff] %v7774_v52  ;;  %v2088_v46 = vcombine.low %v8890_v38, %v7774_v52  ;;  %v7794_v37 = vrot.slane %v2085_v4, %v6791_v60  ;;  %v2102_v16 = vrot.slane %v2086_v62, %v6791_v60  ;;  %v1065_v39 = vcombine.high %v8888_v50, %v8888_v50 }
 0x1e7   : > { %8889 = vst [vmem:[#allocation79_spill] sm:$0xff] %v7786_v55  ;;  %v2109_v53 = vrot.slane %v5927_v48, %v6791_v60  ;;  %v2084_v63 = vcombine.low %v2076_v40, %v7786_v55  ;;  %v2510_v36 = vrot.slane %v2502_v29, %v6791_v60  ;;  %v2517_v45 = vrot.slane %v2503_v6, %v6791_v60 }
 0x1e8   : > { %8891 = vst [vmem:[#allocation80_spill] sm:$0xff] %v7794_v37  ;;  %v2116_v5 = vrot.slane %v2088_v46, %v6791_v60  ;;  %v2117_v57 = vcombine.low %v7794_v37, %v2102_v16  ;;  %v1066_v4 = vcombine.high %v8890_v38, %v8890_v38  ;;  %v1067_v62 = vcombine.high %v8887_v56, %v8887_v56 }
 0x1e9   : > { %v5942_v48 = vcombine.high %v8878_v11, %v7727_v10  ;;  %6141 = vmatmul.mubr.msk.f32.gmra.mrb[14].mxu1 %vm260_vm0, %v2084_v63  ;;  %v2518_v40 = vcombine.low %v2510_v36, %v2517_v45  ;;  %v2520_v29 = vcombine.low %v8887_v56, %v1065_v39  ;;  %v2271_v6 = vcombine.high %v7774_v52, %v7774_v52  ;;  %v8896_v36 = vld [vmem:[#allocation41_spill] sm:$0xff] }
 0x1ea   : > { %v2118_v55 = vcombine.low %v2109_v53, %v2116_v5  ;;  %6143 = vmatprep.mubr.msk.f32.mxu1 %vm6397_vm2, %v8827_v28  ;;  %v2125_v16 = vrot.slane %v2117_v57, %v6791_v60  ;;  %v2521_v46 = vcombine.low %v1067_v62, %v8890_v38  ;;  %v2522_v37 = vcombine.low %v7774_v52, %v1066_v4  ;;  %v8897_v62 = vld [vmem:[#allocation37_spill] sm:$0xff] }
 0x1eb   : > { %v2529_v11 = vrot.slane %v5942_v48, %v6791_v60  ;;  %6164 = vmatmul.mubr.msk.f32.gmra.mrb[16].mxu0 %vm260_vm0, %v2518_v40  ;;  %v7826_v39 = vrot.slane %v2520_v29, %v6791_v60  ;;  %v2140_v45 = vrot.slane %v1066_v4, %v6791_v60  ;;  %v2574_v5 = vrot.slane %v2271_v6, %v6791_v60  ;;  %v8898_v48 = vld [vmem:[#allocation39_spill] sm:$0xff] }
 0x1ec   : > { %v7823_v53 = vrot.slane %v2118_v55, %v6791_v60  ;;  %6166 = vmatprep.mubr.msk.f32.mxu0 %vm6397_vm2, %v8827_v28  ;;  %v7833_v57 = vrot.slane %v2521_v46, %v6791_v60  ;;  %v7836_v63 = vrot.slane %v2522_v37, %v6791_v60  ;;  %v3053_v55 = vcombine.low %v8897_v62, %v8896_v36 }
 0x1ed   : > { %8893 = vst [vmem:[#allocation82_spill] sm:$0xff] %v7826_v39  ;;  %v8899_v40 = vcombine.low %v7065_v1, %v8898_v48  ;;  %v2551_v6 = vcombine.low %v2529_v11, %v7826_v39  ;;  %v2147_v38 = vrot.slane %v2140_v45, %v6791_v60  ;;  %v2581_v46 = vrot.slane %v2574_v5, %v6791_v60 }
 0x1ee   : > { %8892 = vst [vmem:[#allocation81_spill] sm:$0xff] %v7823_v53  ;;  %8894 = vst [vmem:[#allocation83_spill] sm:$0xff] %v7833_v57  ;;  %v2133_v4 = vcombine.low %v2125_v16, %v7823_v53  ;;  %v2552_v37 = vcombine.low %v7833_v57, %v7836_v63  ;;  %v8900_v52 = vcombine.high %v7065_v1, %v8898_v48  ;;  %v8906_v57 = vld [vmem:[#allocation52_spill] sm:$0xff] }
 0x1ef   : > { %8895 = vst [vmem:[#allocation84_spill] sm:$0xff] %v7836_v63  ;;  %v3061_v29 = vrot.slane %v8899_v40, %v6791_v60  ;;  %v3075_v10 = vrot.slane %v3053_v55, %v6791_v60  ;;  %v8901_v16 = vcombine.low %v7086_v32, %v7089_v21  ;;  %v2559_v11 = vrot.slane %v2551_v6, %v6791_v60  ;;  %v8904_v55 = vld [vmem:[#allocation46_spill] sm:$0xff] }
 0x1f0   : > { %v3068_v56 = vrot.slane %v8900_v52, %v6791_v60  ;;  %6144 = vmatmul.mubr.msk.f32.gmra.mrb[16].mxu1 %vm260_vm0, %v2133_v4  ;;  %v8902_v45 = vcombine.low %v7120_v33, %v7129_v3  ;;  %v8903_v52 = vcombine.high %v7120_v33, %v7129_v3  ;;  %v8905_v63 = vcombine.low %v7116_v54, %v8904_v55 }
 0x1f1   : > { %v3082_v40 = vrot.slane %v8901_v16, %v6791_v60  ;;  %v2566_v16 = vrot.slane %v2552_v37, %v6791_v60  ;;  %6146 = vmatprep.mubr.msk.f32.mxu1 %vm6397_vm2, %v8827_v28  ;;  %v2777_v33 = vcombine.high %v8907_v47, %v8907_v47  ;;  %v2806_v3 = vcombine.high %v7089_v21, %v7089_v21  ;;  %v8909_v47 = vld [vmem:[#allocation43_spill] sm:$0xff] }
 0x1f2   : > { %v3838_v5 = vrot.slane %v8902_v45, %v6791_v60  ;;  %v3845_v53 = vrot.slane %v8903_v52, %v6791_v60  ;;  %v3852_v39 = vrot.slane %v8905_v63, %v6791_v60  ;;  %v3083_v4 = vcombine.low %v3061_v29, %v3068_v56  ;;  %v8908_v52 = vld [vmem:[#allocation42_spill] sm:$0xff]  ;;  %v8910_v29 = vld [vmem:[#allocation48_spill] sm:$0xff] }
 0x1f3   : > { %v3084_v6 = vcombine.low %v3075_v10, %v3082_v40  ;;  %v3859_v45 = vrot.slane %v8906_v57, %v6791_v60  ;;  %v2807_v54 = vcombine.high %v8908_v52, %v8908_v52  ;;  %v2567_v63 = vcombine.low %v2559_v11, %v2566_v16  ;;  %v8911_v16 = vld [vmem:[#allocation56_spill] sm:$0xff] }
 0x1f4   : > { %v3860_v50 = vcombine.low %v3838_v5, %v3845_v53  ;;  %v3091_v37 = vrot.slane %v3083_v4, %v6791_v60  ;;  %6147 = vmatmul.mubr.msk.f32.gmra.mrb[18].mxu1 %vm260_vm0, %v2147_v38  ;;  %v7889_v53 = vrot.slane %v2777_v33, %v6791_v60  ;;  %v2808_v57 = vcombine.high %v8909_v47, %v8909_v47 }
 0x1f5   : > { %v3098_v55 = vrot.slane %v3084_v6, %v6791_v60  ;;  %v3861_v56 = vcombine.low %v3852_v39, %v3859_v45  ;;  %v7895_v40 = vrot.slane %v8910_v29, %v6791_v60  ;;  %6167 = vmatmul.mubr.msk.f32.gmra.mrb[18].mxu0 %vm260_vm0, %v2567_v63  ;;  %6174 = vmatprep.mubr.msk.f32.mxu1 %vm6397_vm2, %v8827_v28  ;;  %v8912_v6 = vld [vmem:[#allocation44_spill] sm:$0xff] }
 0x1f6   : > { %v3868_v10 = vrot.slane %v3860_v50, %v6791_v60  ;;  %v3100_v50 = vcombine.low %v8909_v47, %v2806_v3  ;;  %6169 = vmatprep.mubr.msk.f32.mxu0 %vm6397_vm2, %v8827_v28  ;;  %v3101_v11 = vcombine.low %v2808_v57, %v8908_v52  ;;  %v3102_v5 = vcombine.low %v7889_v53, %v2807_v54 }
 0x1f7   : > { %v3099_v39 = vcombine.low %v3091_v37, %v3098_v55  ;;  %v3875_v38 = vrot.slane %v3861_v56, %v6791_v60  ;;  %v3103_v4 = vcombine.low %v7895_v40, %v8911_v16  ;;  %v8913_v45 = vcombine.high %v8912_v6, %v8912_v6  ;;  %v8914_v55 = vld [vmem:[#allocation45_spill] sm:$0xff]  ;;  %v8915_v56 = vld [vmem:[#allocation47_spill] sm:$0xff] }
 0x1f8   : > { %v3110_v37 = vrot.slane %v3100_v50, %v6791_v60  ;;  %v3553_v3 = vcombine.high %v8914_v55, %v8914_v55  ;;  %v3583_v29 = vcombine.high %v8915_v56, %v8915_v56  ;;  %v3117_v54 = vrot.slane %v3101_v11, %v6791_v60 }
 0x1f9   : > { %v3552_v33 = vrot.slane %v8913_v45, %v6791_v60  ;;  %v3876_v63 = vcombine.low %v3868_v10, %v3875_v38  ;;  %6175 = vmatmul.mubr.msk.f32.vlgmr.msra.gmra.mrb[20].mxu1 %vm260_vm0, %v3099_v39  ;;  %v3124_v57 = vrot.slane %v3102_v5, %v6791_v60  ;;  %v3131_v8 = vrot.slane %v3103_v4, %v6791_v60  ;;  %v5977_v10 = vld [vmem:[%s8640_s1 + $0x14] sm:$0xf] }
 0x1fa   : > { %6170 = vmatmul.mubr.msk.f32.gmra.mrb[20].mxu0 %vm260_vm0, %v2581_v46  ;;  %6177 = vmatprep.mubr.msk.f32.mxu1 %vm6397_vm2, %v8827_v28  ;;  %v3575_v39 = vrot.slane %v3553_v3, %v6791_v60  ;;  %v3601_v50 = vcombine.high %v7338_v0, %v7338_v0  ;;  %v3132_v11 = vcombine.low %v3110_v37, %v3117_v54 }
 0x1fb   : > { %v3554_v19 = vcombine.high %v3552_v33, %v3552_v33  ;;  %v3568_v38 = vrot.slane %v3552_v33, %v6791_v60  ;;  %6197 = vmatprep.mubr.msk.f32.mxu0 %vm6397_vm2, %v8827_v28  ;;  %v3133_v5 = vcombine.low %v3124_v57, %v3131_v8  ;;  %v3609_v46 = vrot.slane %v7338_v0, %v6791_v60  ;;  %v5992_v0 = vld [vmem:[%s8640_s1 + $0x18] sm:$0xf] }
 0x1fc   : > { %v3585_v45 = vcombine.high %v3575_v39, %v3575_v39  ;;  %v3623_v55 = vrot.slane %v3601_v50, %v6791_v60  ;;  %v3877_v33 = vcombine.low %v3575_v39, %v3583_v29  ;;  %6219 = vmatpush3.msk.msra.mxu1 %vm1736_vm1, %v5977_v10  ;;  %v3140_v3 = vrot.slane %v3132_v11, %v6791_v60  ;;  %v8920_v50 = vld [vmem:[#allocation49_spill] sm:$0xff] }
 0x1fd   : > { %v3582_v4 = vrot.slane %v3554_v19, %v6791_v60  ;;  %v3584_v6 = vcombine.high %v3568_v38, %v3568_v38  ;;  %v3147_v56 = vrot.slane %v3133_v5, %v6791_v60  ;;  %v2825_v37 = vcombine.high %v8916_v61, %v8916_v61  ;;  %6264 = vmatprep.subr.mxu1 %v8827_v28 }
 0x1fe   : > { %v7944_v19 = vrot.slane %v8916_v61, %v6791_v60  ;;  %6198 = vmatmul.mubr.msk.f32.vlgmr.msra.gmra.mrb[22].mxu0 %vm260_vm0, %v3876_v63  ;;  %v3878_v8 = vcombine.low %v3585_v45, %v3568_v38  ;;  %v3880_v54 = vcombine.low %v3609_v46, %v3623_v55  ;;  %v3887_v57 = vrot.slane %v3877_v33, %v6791_v60 }
 0x1ff   : > { %v3879_v29 = vcombine.low %v3582_v4, %v3584_v6  ;;  %6200 = vmatprep.mubr.msk.f32.mxu0 %vm6397_vm2, %v8827_v28  ;;  %v3148_v10 = vcombine.low %v3140_v3, %v3147_v56  ;;  %v7955_v61 = vrot.slane %v2825_v37, %v6791_v60  ;;  %v7963_v11 = vrot.slane %v8920_v50, %v6791_v60 }
 0x200   : > { %8917 = vst [vmem:[#allocation41_spill] sm:$0xff] %v7944_v19  ;;  %v7959_v39 = vcombine.high %v7944_v19, %v7944_v19  ;;  %v3894_v63 = vrot.slane %v3878_v8, %v6791_v60  ;;  %v3908_v5 = vrot.slane %v3880_v54, %v6791_v60  ;;  %v5953_v4 = vcombine.high %v7895_v40, %v8911_v16 }
 0x201   : > { %8918 = vst [vmem:[#allocation37_spill] sm:$0xff] %v7955_v61  ;;  %8921 = vst [vmem:[#allocation46_spill] sm:$0xff] %v7963_v11  ;;  %v3901_v38 = vrot.slane %v3879_v29, %v6791_v60  ;;  %6242 = vmatpush3.msk.msra.mxu0 %vm1736_vm1, %v5992_v0  ;;  %6178 = vmatmul.mubr.msk.f32.gmra.mrb[22].mxu1 %vm260_vm0, %v3148_v10  ;;  %v2902_v6 = vcombine.high %v7963_v11, %v7963_v11 }
 0x202   : > { %8919 = vst [vmem:[#allocation39_spill] sm:$0xff] %v7959_v39  ;;  %v3150_v45 = vcombine.low %v7944_v19, %v7955_v61  ;;  %v3151_v33 = vcombine.low %v7959_v39, %v7963_v11  ;;  %v8922_v3 = vcombine.high %v7316_v22, %v7316_v22  ;;  %v3909_v37 = vcombine.low %v3887_v57, %v3894_v63 }
 0x203   : > { %v3910_v8 = vcombine.low %v3901_v38, %v3908_v5  ;;  %6180 = vmatprep.mubr.msk.f32.mxu1 %vm6397_vm2, %v8827_v28  ;;  %v3159_v0 = vrot.slane %v5953_v4, %v6791_v60  ;;  %v3649_v29 = vcombine.high %v7387_v31, %v7387_v31  ;;  %v3152_v54 = vcombine.low %v7236_v25, %v2902_v6 }
 0x204   : > { %v3600_v56 = vrot.slane %v8922_v3, %v6791_v60  ;;  %v3166_v10 = vrot.slane %v3150_v45, %v6791_v60  ;;  %v3173_v50 = vrot.slane %v3151_v33, %v6791_v60  ;;  %6287 = vmatprep.subr.mxu0 %v8827_v28  ;;  %v3917_v22 = vrot.slane %v3909_v37, %v6791_v60 }
 0x205   : > { %v3924_v57 = vrot.slane %v3910_v8, %v6791_v60  ;;  %v3657_v38 = vrot.slane %v7387_v31, %v6791_v60  ;;  %v3180_v5 = vrot.slane %v3152_v54, %v6791_v60  ;;  %v3671_v45 = vrot.slane %v3649_v29, %v6791_v60 }
 0x206   : > { %v3602_v11 = vcombine.high %v3600_v56, %v3600_v56  ;;  %v3616_v63 = vrot.slane %v3600_v56, %v6791_v60  ;;  %v3181_v4 = vcombine.low %v3159_v0, %v3166_v10  ;;  %v5966_v39 = vcombine.high %v3609_v46, %v3623_v55 }
 0x207   : > { %v3925_v33 = vcombine.low %v3917_v22, %v3924_v57  ;;  %v3679_v19 = vcombine.high %v3657_v38, %v3657_v38  ;;  %v3182_v61 = vcombine.low %v3173_v50, %v3180_v5  ;;  %v2873_v56 = vcombine.high %v7178_v42, %v7178_v42 }
 0x208   : > { %v3630_v6 = vrot.slane %v3602_v11, %v6791_v60  ;;  %v3632_v3 = vcombine.high %v3616_v63, %v3616_v63  ;;  %v3189_v37 = vrot.slane %v3181_v4, %v6791_v60  ;;  %v3936_v0 = vrot.slane %v5966_v39, %v6791_v60  ;;  %v8923_v11 = vld [vmem:[#allocation57_spill] sm:$0xff] }
 0x209   : > { %6201 = vmatmul.mubr.msk.f32.gmra.mrb[24].mxu0 %vm260_vm0, %v3925_v33  ;;  %v3929_v54 = vcombine.low %v3671_v45, %v3679_v19  ;;  %v2903_v29 = vcombine.high %v8923_v11, %v8923_v11  ;;  %v3196_v46 = vrot.slane %v3182_v61, %v6791_v60  ;;  %v8011_v10 = vrot.slane %v2873_v56, %v6791_v60 }
 0x20a   : > { %v3927_v8 = vcombine.low %v3616_v63, %v3630_v6  ;;  %v3928_v31 = vcombine.low %v3632_v3, %v3657_v38  ;;  %6203 = vmatprep.mubr.msk.f32.mxu0 %vm6397_vm2, %v8827_v28  ;;  %v2904_v42 = vcombine.high %v7236_v25, %v7236_v25  ;;  %v8019_v50 = vrot.slane %v7333_v24, %v6791_v60 }
 0x20b   : > { %v3957_v39 = vrot.slane %v3929_v54, %v6791_v60  ;;  %v8924_v61 = vcombine.high %v7360_v7, %v7360_v7  ;;  %v3197_v57 = vcombine.low %v3189_v37, %v3196_v46  ;;  %v3199_v5 = vcombine.low %v8011_v10, %v2903_v29 }
 0x20c   : > { %v3943_v55 = vrot.slane %v3927_v8, %v6791_v60  ;;  %v3950_v19 = vrot.slane %v3928_v31, %v6791_v60  ;;  %v3198_v38 = vcombine.low %v2904_v42, %v8923_v11  ;;  %v3200_v6 = vcombine.low %v8019_v50, %v7377_v30 }
 0x20d   : > { %v3648_v22 = vrot.slane %v8924_v61, %v6791_v60  ;;  %v5954_v33 = vcombine.high %v8019_v50, %v7377_v30  ;;  %6181 = vmatmul.mubr.msk.f32.gmra.mrb[24].mxu1 %vm260_vm0, %v3197_v57  ;;  %v3215_v37 = vrot.slane %v3199_v5, %v6791_v60  ;;  %v3697_v42 = vcombine.high %v7499_v27, %v7499_v27 }
 0x20e   : > { %v3958_v63 = vcombine.low %v3936_v0, %v3943_v55  ;;  %v3959_v4 = vcombine.low %v3950_v19, %v3957_v39  ;;  %v3208_v7 = vrot.slane %v3198_v38, %v6791_v60  ;;  %6183 = vmatprep.mubr.msk.f32.mxu1 %vm6397_vm2, %v8827_v28  ;;  %v3222_v31 = vrot.slane %v3200_v6, %v6791_v60 }
 0x20f   : > { %v3650_v24 = vcombine.high %v3648_v22, %v3648_v22  ;;  %v3664_v8 = vrot.slane %v3648_v22, %v6791_v60  ;;  %v3229_v54 = vrot.slane %v5954_v33, %v6791_v60  ;;  %v3681_v55 = vcombine.high %v3671_v45, %v3671_v45 }
 0x210   : > { %v3966_v3 = vrot.slane %v3958_v63, %v6791_v60  ;;  %v3973_v56 = vrot.slane %v3959_v4, %v6791_v60  ;;  %v3230_v29 = vcombine.low %v3208_v7, %v3215_v37  ;;  %v3705_v61 = vrot.slane %v7499_v27, %v6791_v60 }
 0x211   : > { %v3678_v0 = vrot.slane %v3650_v24, %v6791_v60  ;;  %v3680_v46 = vcombine.high %v3664_v8, %v3664_v8  ;;  %v3231_v39 = vcombine.low %v3222_v31, %v3229_v54  ;;  %v2921_v22 = vcombine.high %v7350_v23, %v7350_v23 }
 0x212   : > { %v3974_v19 = vcombine.low %v3966_v3, %v3973_v56  ;;  %v3238_v57 = vrot.slane %v3230_v29, %v6791_v60  ;;  %v3719_v63 = vrot.slane %v3697_v42, %v6791_v60  ;;  %v3975_v38 = vcombine.low %v3681_v55, %v3664_v8 }
 0x213   : > { %v3976_v5 = vcombine.low %v3678_v0, %v3680_v46  ;;  %v3245_v45 = vrot.slane %v3231_v39, %v6791_v60  ;;  %v8054_v4 = vrot.slane %v7350_v23, %v6791_v60  ;;  %v8057_v6 = vrot.slane %v2921_v22, %v6791_v60 }
 0x214   : > { %6204 = vmatmul.mubr.msk.f32.gmra.mrb[26].mxu0 %vm260_vm0, %v3974_v19  ;;  %v8061_v27 = vrot.slane %v7463_v12, %v6791_v60  ;;  %v3977_v33 = vcombine.low %v3705_v61, %v3719_v63  ;;  %v5967_v24 = vcombine.high %v3705_v61, %v3719_v63  ;;  %v3985_v3 = vrot.slane %v3975_v38, %v6791_v60 }
 0x215   : > { %6206 = vmatprep.mubr.msk.f32.mxu0 %vm6397_vm2, %v8827_v28  ;;  %v3992_v7 = vrot.slane %v3976_v5, %v6791_v60  ;;  %v3246_v37 = vcombine.low %v3238_v57, %v3245_v45  ;;  %v8069_v23 = vcombine.high %v8054_v4, %v8054_v4  ;;  %v3000_v12 = vcombine.high %v7506_v44, %v7506_v44 }
 0x216   : > { %v2998_v8 = vcombine.high %v8061_v27, %v8061_v27  ;;  %v3999_v56 = vrot.slane %v3977_v33, %v6791_v60  ;;  %v4006_v31 = vrot.slane %v5967_v24, %v6791_v60  ;;  %v3247_v0 = vcombine.low %v8054_v4, %v8057_v6 }
 0x217   : > { %v4007_v54 = vcombine.low %v3985_v3, %v3992_v7  ;;  %6184 = vmatmul.mubr.msk.f32.gmra.mrb[26].mxu1 %vm260_vm0, %v3246_v37  ;;  %v3248_v29 = vcombine.low %v8069_v23, %v8061_v27  ;;  %v3250_v55 = vcombine.low %v3000_v12, %v7503_v26  ;;  %v8925_v42 = vcombine.high %v7365_v59, %v7365_v59 }
 0x218   : > { %v3249_v46 = vcombine.low %v7506_v44, %v2998_v8  ;;  %v4008_v39 = vcombine.low %v3999_v56, %v4006_v31  ;;  %6186 = vmatprep.mubr.msk.f32.mxu1 %vm6397_vm2, %v8827_v28  ;;  %v3257_v22 = vrot.slane %v3247_v0, %v6791_v60  ;;  %v8926_v57 = vcombine.high %v7537_v58, %v7537_v58 }
 0x219   : > { %v3696_v19 = vrot.slane %v8925_v42, %v6791_v60  ;;  %v4015_v61 = vrot.slane %v4007_v54, %v6791_v60  ;;  %v3264_v38 = vrot.slane %v3248_v29, %v6791_v60  ;;  %v3278_v59 = vrot.slane %v3250_v55, %v6791_v60 }
 0x21a   : > { %v3744_v63 = vrot.slane %v8926_v57, %v6791_v60  ;;  %v3271_v5 = vrot.slane %v3249_v46, %v6791_v60  ;;  %v4022_v33 = vrot.slane %v4008_v39, %v6791_v60  ;;  %v3745_v3 = vcombine.high %v7598_v49, %v7598_v49 }
 0x21b   : > { %v3698_v45 = vcombine.high %v3696_v19, %v3696_v19  ;;  %v3712_v24 = vrot.slane %v3696_v19, %v6791_v60  ;;  %v3753_v7 = vrot.slane %v7598_v49, %v6791_v60  ;;  %v3279_v37 = vcombine.low %v3257_v22, %v3264_v38 }
 0x21c   : > { %v3280_v58 = vcombine.low %v3271_v5, %v3278_v59  ;;  %v3760_v12 = vrot.slane %v3744_v63, %v6791_v60  ;;  %v4023_v56 = vcombine.low %v4015_v61, %v4022_v33  ;;  %v3767_v54 = vrot.slane %v3745_v3, %v6791_v60 }
 0x21d   : > { %v3726_v8 = vrot.slane %v3698_v45, %v6791_v60  ;;  %v3728_v31 = vcombine.high %v3712_v24, %v3712_v24  ;;  %v3775_v0 = vcombine.high %v3753_v7, %v3753_v7  ;;  %v3287_v29 = vrot.slane %v3279_v37, %v6791_v60 }
 0x21e   : > { %v3294_v46 = vrot.slane %v3280_v58, %v6791_v60  ;;  %v2969_v42 = vcombine.high %v7483_v41, %v7483_v41  ;;  %6207 = vmatmul.mubr.msk.f32.gmra.mrb[28].mxu0 %vm260_vm0, %v4023_v56  ;;  %v3777_v49 = vcombine.high %v3767_v54, %v3767_v54  ;;  %v2999_v61 = vcombine.high %v7503_v26, %v7503_v26 }
 0x21f   : > { %v4024_v55 = vcombine.low %v3712_v24, %v3726_v8  ;;  %v4025_v19 = vcombine.low %v3728_v31, %v3753_v7  ;;  %v4026_v39 = vcombine.low %v3767_v54, %v3775_v0  ;;  %6209 = vmatprep.mubr.msk.f32.mxu0 %vm6397_vm2, %v8827_v28  ;;  %v3017_v41 = vcombine.high %v7509_v14, %v7509_v14 }
 0x220   : > { %v3295_v22 = vcombine.low %v3287_v29, %v3294_v46  ;;  %v8119_v38 = vrot.slane %v2969_v42, %v6791_v60  ;;  %v4027_v5 = vcombine.low %v3777_v49, %v3760_v12  ;;  %v8127_v33 = vrot.slane %v7488_v18, %v6791_v60 }
 0x221   : > { %v4034_v57 = vrot.slane %v4024_v55, %v6791_v60  ;;  %v4041_v59 = vrot.slane %v4025_v19, %v6791_v60  ;;  %v4048_v45 = vrot.slane %v4026_v39, %v6791_v60  ;;  %v8132_v24 = vrot.slane %v7509_v14, %v6791_v60 }
 0x222   : > { %6187 = vmatmul.mubr.msk.f32.gmra.mrb[28].mxu1 %vm260_vm0, %v3295_v22  ;;  %v8135_v3 = vrot.slane %v3017_v41, %v6791_v60  ;;  %v3296_v7 = vcombine.low %v8119_v38, %v2999_v61  ;;  %v3746_v37 = vcombine.high %v3744_v63, %v3744_v63  ;;  %v4055_v58 = vrot.slane %v4027_v5, %v6791_v60 }
 0x223   : > { %v4056_v8 = vcombine.low %v4034_v57, %v4041_v59  ;;  %6189 = vmatprep.mubr.msk.f32.mxu1 %vm6397_vm2, %v8827_v28  ;;  %v3297_v18 = vcombine.low %v8127_v33, %v7549_v13  ;;  %v5955_v56 = vcombine.high %v8127_v33, %v7549_v13  ;;  %v3776_v63 = vcombine.high %v3760_v12, %v3760_v12 }
 0x224   : > { %v3299_v14 = vcombine.low %v8132_v24, %v8135_v3  ;;  %v3306_v31 = vrot.slane %v3296_v7, %v6791_v60  ;;  %v3774_v54 = vrot.slane %v3746_v37, %v6791_v60  ;;  %v4057_v0 = vcombine.low %v4048_v45, %v4055_v58 }
 0x225   : > { %v4064_v29 = vrot.slane %v4056_v8, %v6791_v60  ;;  %v3313_v46 = vrot.slane %v3297_v18, %v6791_v60  ;;  %v3320_v55 = vrot.slane %v5955_v56, %v6791_v60  ;;  %v8927_v49 = vcombine.high %v7601_v43, %v7601_v43 }
 0x226   : > { %v3327_v42 = vrot.slane %v3299_v14, %v6791_v60  ;;  %v3793_v39 = vcombine.high %v7614_v2, %v7614_v2  ;;  %v3801_v12 = vrot.slane %v7614_v2, %v6791_v60  ;;  %v4071_v61 = vrot.slane %v4057_v0, %v6791_v60 }
 0x227   : > { %v3792_v19 = vrot.slane %v8927_v49, %v6791_v60  ;;  %v3328_v22 = vcombine.low %v3306_v31, %v3313_v46  ;;  %v4073_v57 = vcombine.low %v3774_v54, %v3776_v63  ;;  %v8164_v41 = vcombine.high %v8132_v24, %v8132_v24 }
 0x228   : > { %v3329_v5 = vcombine.low %v3320_v55, %v3327_v42  ;;  %v3815_v43 = vrot.slane %v3793_v39, %v6791_v60  ;;  %v8928_v7 = vcombine.low %v7545_v15, %v7578_v51  ;;  %v4072_v2 = vcombine.low %v4064_v29, %v4071_v61 }
 0x229   : > { %v3794_v59 = vcombine.high %v3792_v19, %v3792_v19  ;;  %v3808_v45 = vrot.slane %v3792_v19, %v6791_v60  ;;  %v3336_v58 = vrot.slane %v3328_v22, %v6791_v60  ;;  %v3351_v8 = vrot.slane %v8164_v41, %v6791_v60 }
 0x22a   : > { %v8172_v37 = vrot.slane %v8928_v7, %v6791_v60  ;;  %v3343_v18 = vrot.slane %v3329_v5, %v6791_v60  ;;  %v4074_v14 = vcombine.low %v3801_v12, %v3815_v43  ;;  %v5968_v31 = vcombine.high %v3801_v12, %v3815_v43  ;;  %6210 = vmatmul.mubr.msk.f32.gmra.mrb[30].mxu0 %vm260_vm0, %v4072_v2 }
 0x22b   : > { %v3822_v56 = vrot.slane %v3794_v59, %v6791_v60  ;;  %v4083_v54 = vrot.slane %v4073_v57, %v6791_v60  ;;  %v3358_v15 = vrot.slane %v3351_v8, %v6791_v60  ;;  %v3824_v51 = vcombine.high %v3808_v45, %v3808_v45  ;;  %6212 = vmatprep.mubr.msk.f32.mxu0 %vm6397_vm2, %v8827_v28 }
 0x22c   : > { %v2760_v63 = vcombine.high %v8898_v48, %v8898_v48  ;;  %v3344_v0 = vcombine.low %v3336_v58, %v3343_v18  ;;  %v4090_v46 = vrot.slane %v4074_v14, %v6791_v60  ;;  %v4517_v55 = vcombine.low %v8135_v3, %v8164_v41 }
 0x22d   : > { %v4076_v29 = vcombine.low %v3808_v45, %v3822_v56  ;;  %v4097_v42 = vrot.slane %v5968_v31, %v6791_v60  ;;  %v4260_v49 = vcombine.high %v8896_v36, %v8896_v36  ;;  %v8929_v19 = vcombine.high %v7065_v1, %v7065_v1 }
 0x22e   : > { %v4270_v12 = vcombine.low %v2760_v63, %v8897_v62  ;;  %6190 = vmatmul.mubr.msk.f32.gmra.mrb[30].mxu1 %vm260_vm0, %v3344_v0  ;;  %v4105_v22 = vcombine.low %v4083_v54, %v4090_v46  ;;  %v4271_v57 = vcombine.low %v8896_v36, %v7086_v32  ;;  %v4784_v5 = vcombine.low %v7605_v9, %v8172_v37  ;;  %v8930_v46 = vld [vmem:[#allocation25_spill] sm:$0xff] }
 0x22f   : > { %v4269_v39 = vcombine.low %v8898_v48, %v8929_v19  ;;  %v4104_v61 = vrot.slane %v4076_v29, %v6791_v60  ;;  %6192 = vmatprep.mubr.msk.f32.mxu1 %vm6397_vm2, %v8827_v28  ;;  %v4128_v1 = vrot.slane %v3824_v51, %v6791_v60  ;;  %v4272_v48 = vcombine.low %v4260_v49, %v8909_v47  ;;  %v8931_v49 = vld [vmem:[#allocation37_spill] sm:$0xff] }
 0x230   : > { %v4286_v59 = vrot.slane %v4270_v12, %v6791_v60  ;;  %v4113_v43 = vrot.slane %v4105_v22, %v6791_v60  ;;  %v4293_v7 = vrot.slane %v4271_v57, %v6791_v60  ;;  %v2854_v32 = vcombine.high %v7895_v40, %v7895_v40  ;;  %v464_v57 = vpop.xlane.xlu0 %463 }
 0x231   : > { %v4279_v62 = vrot.slane %v4269_v39, %v6791_v60  ;;  %v4106_v45 = vcombine.low %v4097_v42, %v4104_v61  ;;  %v4300_v36 = vrot.slane %v4272_v48, %v6791_v60  ;;  %v5978_v58 = vcombine.high %v7089_v21, %v8909_v47  ;;  %v8932_v39 = vld [vmem:[#allocation39_spill] sm:$0xff] }
 0x232   : > { %v4319_v8 = vcombine.low %v8908_v52, %v7889_v53  ;;  %6193 = vmatmul.mubr.msk.f32.gmra.mrb[32].mxu1 %vm260_vm0, %v3358_v15  ;;  %v5979_v56 = vcombine.high %v8908_v52, %v7889_v53  ;;  %v4321_v14 = vcombine.low %v8911_v16, %v2854_v32  ;;  %v4785_v40 = vcombine.low %v6994_v17, %v7002_v20  ;;  %v8935_v32 = vld [vmem:[#allocation27_spill] sm:$0xff] }
 0x233   : > { %v4301_v2 = vcombine.low %v4279_v62, %v4286_v59  ;;  %v4120_v18 = vrot.slane %v4106_v45, %v6791_v60  ;;  %6220 = vmatprep.mubr.msk.f32.mxu1 %vm6397_vm2, %v8827_v28  ;;  %v4302_v31 = vcombine.low %v4293_v7, %v4300_v36  ;;  %v4328_v47 = vrot.slane %v5978_v58, %v6791_v60  ;;  %v8934_v45 = vld [vmem:[#allocation46_spill] sm:$0xff]  ;;  %v8936_v36 = vld [vmem:[#allocation24_spill] sm:$0xff]  ;;  %v8937_v58 = vld [vmem:[#allocation5_spill] sm:$0xff] }
 0x234   : > { %v4335_v54 = vrot.slane %v4319_v8, %v6791_v60  ;;  %v4342_v15 = vrot.slane %v5979_v56, %v6791_v60  ;;  %v4349_v52 = vrot.slane %v4321_v14, %v6791_v60  ;;  %v4792_v53 = vrot.slane %v4785_v40, %v6791_v60  ;;  %v8938_v8 = vld [vmem:[#allocation22_spill] sm:$0xff]  ;;  %v6002_v56 = vld [vmem:[%s8640_s1 + $0x1c] sm:$0xf] }
 0x235   : > { %v4309_v21 = vrot.slane %v4301_v2, %v6791_v60  ;;  %v4121_v51 = vcombine.low %v4113_v43, %v4120_v18  ;;  %v4316_v63 = vrot.slane %v4302_v31, %v6791_v60  ;;  %v4793_v20 = vcombine.low %v7557_v34, %v7653_v35 }
 0x236   : > { %v4350_v17 = vcombine.low %v4328_v47, %v4335_v54  ;;  %v2856_v0 = vcombine.high %v8911_v16, %v8911_v16  ;;  %v4351_v29 = vcombine.low %v4342_v15, %v4349_v52  ;;  %v4794_v42 = vcombine.low %v8930_v46, %v4792_v53  ;;  %v8933_v16 = vld [vmem:[#allocation41_spill] sm:$0xff]  ;;  %v8940_v46 = vld [vmem:[#allocation38_spill] sm:$0xff] }
 0x237   : > { %6213 = vmatmul.mubr.msk.f32.gmra.mrb[32].mxu0 %vm260_vm0, %v4121_v51  ;;  %v4262_v19 = vcombine.high %v8931_v49, %v8931_v49  ;;  %v4368_v12 = vcombine.low %v8931_v49, %v8932_v39  ;;  %v4135_v61 = vrot.slane %v4128_v1, %v6791_v60  ;;  %v4317_v34 = vcombine.low %v4309_v21, %v4316_v63  ;;  %v6015_v49 = vld [vmem:[%s8640_s1 + $0x20] sm:$0xf] }
 0x238   : > { %6215 = vmatprep.mubr.msk.f32.mxu0 %vm6397_vm2, %v8827_v28  ;;  %v4358_v35 = vrot.slane %v4350_v17, %v6791_v60  ;;  %v4367_v22 = vcombine.low %v2856_v0, %v8933_v16  ;;  %v4365_v48 = vrot.slane %v4351_v29, %v6791_v60  ;;  %v4801_v62 = vrot.slane %v4793_v20, %v6791_v60  ;;  %v8939_v0 = vld [vmem:[#allocation72_spill] sm:$0xff] }
 0x239   : > { %v4369_v59 = vcombine.low %v4262_v19, %v7236_v25  ;;  %v5980_v43 = vcombine.high %v8934_v45, %v7236_v25  ;;  %6221 = vmatmul.mubr.msk.f32.vlgmr.msra.gmra.mrb[34].mxu1 %vm260_vm0, %v4317_v34  ;;  %v4384_v1 = vrot.slane %v4368_v12, %v6791_v60  ;;  %v4810_v2 = vcombine.low %v8936_v36, %v8935_v32  ;;  %v8944_v45 = vld [vmem:[#allocation76_spill] sm:$0xff] }
 0x23a   : > { %v4377_v7 = vrot.slane %v4367_v22, %v6791_v60  ;;  %v4818_v18 = vcombine.low %v8938_v8, %v8937_v58  ;;  %6223 = vmatprep.mubr.msk.f32.mxu1 %vm6397_vm2, %v8827_v28  ;;  %v4366_v25 = vcombine.low %v4358_v35, %v4365_v48  ;;  %v4808_v14 = vrot.slane %v4794_v42, %v6791_v60  ;;  %v488_v35 = vpop.xlane.xlu1 %487  ;;  %v8943_v48 = vld [vmem:[#allocation73_spill] sm:$0xff] }
 0x23b   : > { %6216 = vmatmul.mubr.msk.f32.gmra.mrb[34].mxu0 %vm260_vm0, %v4135_v61  ;;  %v4391_v40 = vrot.slane %v4369_v59, %v6791_v60  ;;  %v538_v31 = vmul.f32 0.25, %v464_v57  ;;  %v4398_v21 = vrot.slane %v5980_v43, %v6791_v60  ;;  %v4817_v54 = vrot.slane %v4810_v2, %v6791_v60  ;;  %6265 = vmatpush3.msk.msra.mxu1 %vm1736_vm1, %v6002_v56  ;;  %v8942_v57 = vld [vmem:[#allocation75_spill] sm:$0xff] }
 0x23c   : > { %6243 = vmatprep.mubr.msk.f32.mxu0 %vm6397_vm2, %v8827_v28  ;;  %v4399_v47 = vcombine.low %v4377_v7, %v4384_v1  ;;  %v4826_v51 = vrot.slane %v4818_v18, %v6791_v60  ;;  %v2950_v15 = vcombine.high %v8019_v50, %v8019_v50  ;;  %v2952_v52 = vcombine.high %v7377_v30, %v7377_v30  ;;  %v8941_v50 = vld [vmem:[#allocation35_spill] sm:$0xff] }
 0x23d   : > { %v4416_v53 = vcombine.low %v8923_v11, %v8011_v10  ;;  %v5981_v63 = vcombine.high %v8923_v11, %v8011_v10  ;;  %6224 = vmatmul.mubr.msk.f32.gmra.mrb[36].mxu1 %vm260_vm0, %v4366_v25  ;;  %v4400_v17 = vcombine.low %v4391_v40, %v4398_v21  ;;  %v4819_v29 = vcombine.low %v4817_v54, %v8939_v0  ;;  %v8945_v40 = vld [vmem:[#allocation31_spill] sm:$0xff]  ;;  %v8948_v21 = vld [vmem:[#allocation82_spill] sm:$0xff] }
 0x23e   : > { %v4407_v20 = vrot.slane %v4399_v47, %v6791_v60  ;;  %v4835_v42 = vcombine.low %v8941_v50, %v8940_v46  ;;  %6226 = vmatprep.mubr.msk.f32.mxu1 %vm6397_vm2, %v8827_v28  ;;  %v4418_v11 = vcombine.low %v7377_v30, %v2950_v15  ;;  %v4419_v10 = vcombine.low %v2952_v52, %v8054_v4  ;;  %v8949_v50 = vld [vmem:[#allocation78_spill] sm:$0xff] }
 0x23f   : > { %6244 = vmatmul.mubr.msk.f32.vlgmr.msra.gmra.mrb[36].mxu0 %vm260_vm0, %v4784_v5  ;;  %v4426_v19 = vrot.slane %v4416_v53, %v6791_v60  ;;  %v8300_v39 = vadd.f32 1e-06, %v538_v31  ;;  %v4414_v12 = vrot.slane %v4400_v17, %v6791_v60  ;;  %v4833_v9 = vrot.slane %v4819_v29, %v6791_v60  ;;  %v8946_v31 = vld [vmem:[#allocation77_spill] sm:$0xff] }
 0x240   : > { %6246 = vmatprep.mubr.msk.f32.mxu0 %vm6397_vm2, %v8827_v28  ;;  %v4433_v37 = vrot.slane %v5981_v63, %v6791_v60  ;;  %v4842_v5 = vrot.slane %v4835_v42, %v6791_v60  ;;  %v4809_v61 = vcombine.low %v4801_v62, %v4808_v14  ;;  %v4440_v30 = vrot.slane %v4418_v11, %v6791_v60 }
 0x241   : > { %v4447_v4 = vrot.slane %v4419_v10, %v6791_v60  ;;  %v4264_v34 = vcombine.high %v8057_v6, %v8057_v6  ;;  %6288 = vmatpush3.msk.msra.mxu0 %vm1736_vm1, %v6015_v49  ;;  %v4415_v16 = vcombine.low %v4407_v20, %v4414_v12  ;;  %v4843_v59 = vcombine.low %v8943_v48, %v8942_v57  ;;  %v8950_v10 = vld [vmem:[#allocation14_spill] sm:$0xff] }
 0x242   : > { %v4448_v22 = vcombine.low %v4426_v19, %v4433_v37  ;;  %v4844_v43 = vcombine.low %v4842_v5, %v8944_v45  ;;  %v4834_v62 = vcombine.low %v4826_v51, %v4833_v9  ;;  %v4465_v1 = vcombine.low %v8057_v6, %v8069_v23  ;;  %v8951_v19 = vld [vmem:[#allocation13_spill] sm:$0xff]  ;;  %v8953_v37 = vld [vmem:[#allocation58_spill] sm:$0xff] }
 0x243   : > { %6247 = vmatmul.mubr.msk.f32.gmra.mrb[38].mxu0 %vm260_vm0, %v4809_v61  ;;  %v4449_v7 = vcombine.low %v4440_v30, %v4447_v4  ;;  %v4466_v32 = vcombine.low %v4264_v34, %v7506_v44  ;;  %6227 = vmatmul.mubr.msk.f32.gmra.mrb[38].mxu1 %vm260_vm0, %v4415_v16  ;;  %v5982_v58 = vcombine.high %v8061_v27, %v7506_v44  ;;  %v546_v8 = vmul.f32 0.25, %v488_v35  ;;  %v8947_v27 = vld [vmem:[#allocation83_spill] sm:$0xff] }
 0x244   : > { %6249 = vmatprep.mubr.msk.f32.mxu0 %vm6397_vm2, %v8827_v28  ;;  %v4456_v36 = vrot.slane %v4448_v22, %v6791_v60  ;;  %v4858_v2 = vrot.slane %v4844_v43, %v6791_v60  ;;  %6229 = vmatprep.mubr.msk.f32.mxu1 %vm6397_vm2, %v8827_v28  ;;  %v4468_v23 = vcombine.low %v7503_v26, %v8119_v38  ;;  %6380 = vrsqrt.f32 %v8300_v39  ;;  %v8955_v39 = vld [vmem:[#allocation12_spill] sm:$0xff] }
 0x245   : > { %v4463_v6 = vrot.slane %v4449_v7, %v6791_v60  ;;  %v4475_v18 = vrot.slane %v4465_v1, %v6791_v60  ;;  %v4482_v56 = vrot.slane %v4466_v32, %v6791_v60  ;;  %v4851_v25 = vrot.slane %v4843_v59, %v6791_v60  ;;  %v8954_v59 = vld [vmem:[#allocation11_spill] sm:$0xff]  ;;  %v8957_v7 = vld [vmem:[#allocation60_spill] sm:$0xff]  ;;  %v8958_v32 = vld [vmem:[#allocation17_spill] sm:$0xff] }
 0x246   : > { %v4489_v14 = vrot.slane %v5982_v58, %v6791_v60  ;;  %v4860_v44 = vcombine.low %v8946_v31, %v8945_v40  ;;  %v4869_v47 = vcombine.low %v8948_v21, %v8947_v27  ;;  %v4496_v51 = vrot.slane %v4468_v23, %v6791_v60  ;;  %v8961_v23 = vld [vmem:[#allocation8_spill] sm:$0xff] }
 0x247   : > { %6250 = vmatmul.mubr.msk.f32.gmra.mrb[40].mxu0 %vm260_vm0, %v4834_v62  ;;  %v4464_v54 = vcombine.low %v4456_v36, %v4463_v6  ;;  %v4497_v15 = vcombine.low %v4475_v18, %v4482_v56  ;;  %v3046_v52 = vcombine.high %v8127_v33, %v8127_v33  ;;  %v4859_v53 = vcombine.low %v4851_v25, %v4858_v2  ;;  %v8956_v62 = vld [vmem:[#allocation61_spill] sm:$0xff]  ;;  %v8959_v36 = vld [vmem:[#allocation15_spill] sm:$0xff]  ;;  %v8962_v21 = vld [vmem:[#allocation68_spill] sm:$0xff] }
 0x248   : > { %6252 = vmatprep.mubr.msk.f32.mxu0 %vm6397_vm2, %v8827_v28  ;;  %v4867_v63 = vrot.slane %v4860_v44, %v6791_v60  ;;  %v3048_v17 = vcombine.high %v7549_v13, %v7549_v13  ;;  %v5983_v20 = vcombine.high %v7503_v26, %v8119_v38  ;;  %v4498_v0 = vcombine.low %v4489_v14, %v4496_v51 }
 0x249   : > { %6230 = vmatmul.mubr.msk.f32.gmra.mrb[40].mxu1 %vm260_vm0, %v4464_v54  ;;  %v4505_v29 = vrot.slane %v4497_v15, %v6791_v60  ;;  %v4883_v46 = vrot.slane %v4869_v47, %v6791_v60  ;;  %v4515_v33 = vcombine.low %v7549_v13, %v3046_v52  ;;  %v4545_v26 = vrot.slane %v4517_v55, %v6791_v60  ;;  %v8952_v55 = vld [vmem:[#allocation66_spill] sm:$0xff]  ;;  %v8963_v47 = vld [vmem:[#allocation67_spill] sm:$0xff]  ;;  %v8964_v15 = vld [vmem:[#allocation69_spill] sm:$0xff] }
 0x24a   : > { %6232 = vmatprep.mubr.msk.f32.mxu1 %vm6397_vm2, %v8827_v28  ;;  %v4868_v42 = vcombine.low %v8949_v50, %v4867_v63  ;;  %v4516_v49 = vcombine.low %v3048_v17, %v8132_v24  ;;  %v4524_v11 = vrot.slane %v5983_v20, %v6791_v60  ;;  %v4512_v38 = vrot.slane %v4498_v0, %v6791_v60 }
 0x24b   : > { %6253 = vmatmul.mubr.msk.f32.gmra.mrb[42].mxu0 %vm260_vm0, %v4859_v53  ;;  %v4531_v13 = vrot.slane %v4515_v33, %v6791_v60  ;;  %v5115_v12 = vcombine.low %v8951_v19, %v8950_v10  ;;  %v6003_v9 = vcombine.high %v8951_v19, %v8950_v10  ;;  %v5148_v5 = vcombine.low %v8953_v37, %v8952_v55  ;;  %v8965_v53 = vld [vmem:[#allocation10_spill] sm:$0xff]  ;;  %v8971_v37 = vld [vmem:[#allocation16_spill] sm:$0xff] }
 0x24c   : > { %6255 = vmatprep.mubr.msk.f32.mxu0 %vm6397_vm2, %v8827_v28  ;;  %v4876_v24 = vrot.slane %v4868_v42, %v6791_v60  ;;  %v4538_v41 = vrot.slane %v4516_v49, %v6791_v60  ;;  %v4513_v61 = vcombine.low %v4505_v29, %v4512_v38  ;;  %v4266_v4 = vcombine.high %v8135_v3, %v8135_v3  ;;  %v8966_v49 = vld [vmem:[#allocation54_spill] sm:$0xff] }
 0x24d   : > { %v4546_v30 = vcombine.low %v4524_v11, %v4531_v13  ;;  %v576_v34 = vadd.f32 1e-06, %v546_v8  ;;  %v5125_v22 = vrot.slane %v5115_v12, %v6791_v60  ;;  %v5132_v57 = vrot.slane %v6003_v9, %v6791_v60  ;;  %v8960_v8 = vld [vmem:[#allocation59_spill] sm:$0xff]  ;;  %v8968_v19 = vld [vmem:[#allocation50_spill] sm:$0xff]  ;;  %v8969_v9 = vld [vmem:[#allocation9_spill] sm:$0xff] }
 0x24e   : > { %v4884_v35 = vcombine.low %v4876_v24, %v4883_v46  ;;  %v4547_v16 = vcombine.low %v4538_v41, %v4545_v26  ;;  %6233 = vmatmul.mubr.msk.f32.gmra.mrb[42].mxu1 %vm260_vm0, %v4513_v61  ;;  %v1217_v45 = vcombine.high %v8954_v59, %v8954_v59  ;;  %v1219_v43 = vcombine.high %v8955_v39, %v8955_v39  ;;  %v6381_v46 = vpop.eup %6380  ;;  %v8967_v11 = vld [vmem:[#allocation51_spill] sm:$0xff] }
 0x24f   : > { %v4554_v48 = vrot.slane %v4546_v30, %v6791_v60  ;;  %6235 = vmatprep.mubr.msk.f32.mxu1 %vm6397_vm2, %v8827_v28  ;;  %v5166_v1 = vcombine.low %v8957_v7, %v8956_v62  ;;  %v5167_v2 = vcombine.low %v8959_v36, %v8958_v32  ;;  %v1313_v18 = vcombine.high %v8961_v23, %v8961_v23  ;;  %v8970_v24 = vld [vmem:[#allocation7_spill] sm:$0xff] }
 0x250   : > { %6256 = vmatmul.mubr.msk.f32.gmra.mrb[44].mxu0 %vm260_vm0, %v4884_v35  ;;  %v4561_v3 = vrot.slane %v4547_v16, %v6791_v60  ;;  %v5164_v58 = vcombine.low %v8955_v39, %v1217_v45  ;;  %v5165_v6 = vcombine.low %v1219_v43, %v8960_v8  ;;  %6382 = vrsqrt.f32 %v576_v34 }
 0x251   : > { %6258 = vmatprep.mubr.msk.f32.mxu0 %vm6397_vm2, %v8827_v28  ;;  %v4569_v25 = vrot.slane %v4266_v4, %v6791_v60  ;;  %v5147_v14 = vcombine.low %v5125_v22, %v5132_v57  ;;  %v5195_v40 = vrot.slane %v5167_v2, %v6791_v60  ;;  %v5188_v44 = vrot.slane %v5166_v1, %v6791_v60  ;;  %v8972_v22 = vld [vmem:[#allocation19_spill] sm:$0xff] }
 0x252   : > { %v4562_v56 = vcombine.low %v4554_v48, %v4561_v3  ;;  %v5181_v31 = vrot.slane %v5165_v6, %v6791_v60  ;;  %v6004_v27 = vcombine.high %v8959_v36, %v8958_v32  ;;  %v5214_v54 = vcombine.low %v8963_v47, %v8962_v21  ;;  %v8973_v48 = vld [vmem:[#allocation62_spill] sm:$0xff]  ;;  %v8975_v32 = vld [vmem:[#allocation63_spill] sm:$0xff] }
 0x253   : > { %v5162_v51 = vrot.slane %v5148_v5, %v6791_v60  ;;  %v5215_v52 = vcombine.low %v8964_v15, %v8961_v23  ;;  %v5216_v63 = vcombine.low %v8965_v53, %v1313_v18  ;;  %v5174_v17 = vrot.slane %v5164_v58, %v6791_v60  ;;  %v8974_v3 = vld [vmem:[#allocation6_spill] sm:$0xff]  ;;  %v8976_v36 = vld [vmem:[#allocation55_spill] sm:$0xff]  ;;  %v8977_v58 = vld [vmem:[#allocation64_spill] sm:$0xff] }
 0x254   : > { %6236 = vmatmul.mubr.msk.f32.gmra.mrb[44].mxu1 %vm260_vm0, %v4562_v56  ;;  %v5197_v20 = vcombine.low %v5188_v44, %v5195_v40  ;;  %v5230_v0 = vrot.slane %v5214_v54, %v6791_v60  ;;  %v1315_v29 = vcombine.high %v8965_v53, %v8965_v53  ;;  %v4576_v33 = vrot.slane %v4569_v25, %v6791_v60  ;;  %v6386_v56 = vld [vmem:[%s8642_s3] ss:$0 sm:$0xff] }
 0x255   : > { %6238 = vmatprep.mubr.msk.f32.mxu1 %vm6397_vm2, %v8827_v28  ;;  %v5155_v50 = vrot.slane %v5147_v14, %v6791_v60  ;;  %v5237_v42 = vrot.slane %v5215_v52, %v6791_v60  ;;  %v5263_v26 = vcombine.low %v8967_v11, %v8966_v49  ;;  %v5196_v38 = vcombine.low %v5174_v17, %v5181_v31  ;;  %v8978_v44 = vld [vmem:[#allocation26_spill] sm:$0xff] }
 0x256   : > { %v5223_v13 = vrot.slane %v6004_v27, %v6791_v60  ;;  %v5244_v10 = vrot.slane %v5216_v63, %v6791_v60  ;;  %v5262_v12 = vcombine.low %v1315_v29, %v8968_v19  ;;  %v5264_v41 = vcombine.low %v8970_v24, %v8969_v9  ;;  %v6387_v47 = vld [vmem:[%s8643_s4] ss:$0 sm:$0xff] }
 0x257   : > { %v6005_v55 = vcombine.high %v8970_v24, %v8969_v9  ;;  %v1409_v5 = vcombine.high %v8971_v37, %v8971_v37  ;;  %v5163_v61 = vcombine.low %v5155_v50, %v5162_v51  ;;  %v5211_v30 = vrot.slane %v5197_v20, %v6791_v60 }
 0x258   : > { %6239 = vmatmul.mubr.msk.f32.gmra.mrb[46].mxu1 %vm260_vm0, %v4576_v33  ;;  %v5245_v4 = vcombine.low %v5223_v13, %v5230_v0  ;;  %v5246_v34 = vcombine.low %v5237_v42, %v5244_v10  ;;  %v5272_v35 = vrot.slane %v5262_v12, %v6791_v60  ;;  %v5279_v16 = vrot.slane %v5263_v26, %v6791_v60 }
 0x259   : > { %6266 = vmatprep.mubr.msk.f32.mxu1 %vm6397_vm2, %v8827_v28  ;;  %v1411_v57 = vcombine.high %v8972_v22, %v8972_v22  ;;  %v5312_v59 = vcombine.low %v8973_v48, %v8971_v37  ;;  %v5204_v39 = vrot.slane %v5196_v38, %v6791_v60  ;;  %v5313_v43 = vcombine.low %v8972_v22, %v1409_v5 }
 0x25a   : > { %v6383_v45 = vpop.eup %6382  ;;  %v628_v62 = vmul.f32 %v6381_v46, %v8974_v3  ;;  %v5286_v7 = vrot.slane %v5264_v41, %v6791_v60  ;;  %v5293_v1 = vrot.slane %v6005_v55, %v6791_v60  ;;  %v5311_v2 = vcombine.low %v8976_v36, %v8975_v32  ;;  %v8979_v3 = vld [vmem:[#allocation84_spill] sm:$0xff]  ;;  %v8980_v32 = vld [vmem:[#allocation65_spill] sm:$0xff]  ;;  %v8981_v36 = vld [vmem:[#allocation70_spill] sm:$0xff] }
 0x25b   : > { %v5314_v8 = vcombine.low %v1411_v57, %v8977_v58  ;;  %v5212_v6 = vcombine.low %v5204_v39, %v5211_v30  ;;  %v5253_v23 = vrot.slane %v5245_v4, %v6791_v60  ;;  %v5260_v18 = vrot.slane %v5246_v34, %v6791_v60 }
 0x25c   : > { %6267 = vmatmul.mubr.msk.f32.vlgmr.msra.gmra.mrb[48].mxu1 %vm260_vm0, %v5163_v61  ;;  %v665_v25 = vmul.f32 %v6386_v56, %v628_v62  ;;  %v5294_v14 = vcombine.low %v5272_v35, %v5279_v16  ;;  %v5328_v40 = vrot.slane %v5312_v59, %v6791_v60  ;;  %v636_v27 = vmul.f32 %v6383_v45, %v8978_v44 }
 0x25d   : > { %6269 = vmatprep.mubr.msk.f32.mxu1 %vm6397_vm2, %v8827_v28  ;;  %v5342_v31 = vrot.slane %v5314_v8, %v6791_v60  ;;  %v5335_v21 = vrot.slane %v5313_v43, %v6791_v60  ;;  %v5295_v51 = vcombine.low %v5286_v7, %v5293_v1  ;;  %v5321_v15 = vrot.slane %v5311_v2, %v6791_v60 }
 0x25e   : > { %v702_v54 = vadd.f32 %v6387_v47, %v665_v25  ;;  %v673_v52 = vmul.f32 %v6386_v56, %v636_v27  ;;  %v5261_v20 = vcombine.low %v5253_v23, %v5260_v18  ;;  %v5302_v0 = vrot.slane %v5294_v14, %v6791_v60  ;;  %v8984_v27 = vld [vmem:[#allocation18_spill] sm:$0xff] }
 0x25f   : > { %v5344_v53 = vcombine.low %v5335_v21, %v5342_v31  ;;  %v5343_v29 = vcombine.low %v5321_v15, %v5328_v40  ;;  %v5309_v42 = vrot.slane %v5295_v51, %v6791_v60  ;;  %v8982_v2 = vcombine.low %v8980_v32, %v8981_v36  ;;  %v8985_v21 = vld [vmem:[#allocation23_spill] sm:$0xff]  ;;  %v8986_v51 = vld [vmem:[#allocation29_spill] sm:$0xff]  ;;  %v8995_v32 = vld [vmem:[#allocation36_spill] sm:$0xff] }
 0x260   : > { %6270 = vmatmul.mubr.msk.f32.gmra.mrb[50].mxu1 %vm260_vm0, %v5212_v6  ;;  %v4702_v63 = vcombine.high %v702_v54, %v702_v54  ;;  %v4709_v17 = vrot.slane %v702_v54, %v6791_v60  ;;  %v710_v46 = vadd.f32 %v6387_v47, %v673_v52  ;;  %v8509_v45 = vpop.f32.mrb[0].mxu0  ;;  %v8983_v6 = vld [vmem:[#allocation4_spill] sm:$0xff]  ;;  %v6016_v47 = vcombine.high %v8985_v21, %v8984_v27 }
 0x261   : > { %6272 = vmatprep.mubr.msk.f32.mxu1 %vm6397_vm2, %v8827_v28  ;;  %v5358_v26 = vrot.slane %v5344_v53, %v6791_v60  ;;  %v5310_v19 = vcombine.low %v5302_v0, %v5309_v42  ;;  %v5351_v12 = vrot.slane %v5343_v29, %v6791_v60  ;;  %v6107_v7 = vpop.f32.mrb[1].mxu0  ;;  %v5370_v58 = vrot.slane %v8982_v2, %v6791_v60  ;;  %v8987_v42 = vld [vmem:[#allocation2_spill] sm:$0xff] }
 0x262   : > { %v4716_v33 = vrot.slane %v4702_v63, %v6791_v60  ;;  %v4717_v50 = vcombine.high %v4709_v17, %v4709_v17  ;;  %v5065_v49 = vcombine.high %v710_v46, %v710_v46  ;;  %v5072_v11 = vrot.slane %v710_v46, %v6791_v60  ;;  %v8996_v2 = vld [vmem:[#allocation74_spill] sm:$0xff] }
 0x263   : > { %v8482_v13 = vrot.slane %v4709_v17, %v6791_v60  ;;  %v5359_v34 = vcombine.low %v5351_v12, %v5358_v26  ;;  %v2268_v23 = vcombine.high %v8983_v6, %v8983_v6  ;;  %v5574_v0 = vrot.slane %v6016_v47, %v6791_v60  ;;  %v8989_v12 = vld [vmem:[#allocation71_spill] sm:$0xff] }
 0x264   : > { %6273 = vmatmul.mubr.msk.f32.gmra.mrb[52].mxu1 %vm260_vm0, %v5261_v20  ;;  %v4718_v38 = vcombine.high %v4716_v33, %v4716_v33  ;;  %v8485_v10 = vrot.slane %v4717_v50, %v6791_v60  ;;  %v5079_v9 = vrot.slane %v5065_v49, %v6791_v60  ;;  %v5080_v24 = vcombine.high %v5072_v11, %v5072_v11 }
 0x265   : > { %6275 = vmatprep.mubr.msk.f32.mxu1 %vm6397_vm2, %v8827_v28  ;;  %v8490_v41 = vrot.slane %v4716_v33, %v6791_v60  ;;  %v5088_v30 = vrot.slane %v5072_v11, %v6791_v60  ;;  %v5584_v15 = vcombine.low %v2268_v23, %v8986_v51  ;;  %v5575_v49 = vcombine.low %v5574_v0, %v8987_v42  ;;  %v8988_v11 = vld [vmem:[#allocation34_spill] sm:$0xff] }
 0x266   : > { %v8493_v55 = vrot.slane %v4718_v38, %v6791_v60  ;;  %v4885_v37 = vcombine.low %v8482_v13, %v8485_v10  ;;  %v5993_v5 = vcombine.high %v8482_v13, %v8485_v10  ;;  %v5081_v61 = vcombine.high %v5079_v9, %v5079_v9  ;;  %v8998_v23 = vld [vmem:[#allocation30_spill] sm:$0xff] }
 0x267   : > { %v5102_v4 = vrot.slane %v5080_v24, %v6791_v60  ;;  %v5095_v22 = vrot.slane %v5079_v9, %v6791_v60  ;;  %v4748_v56 = vcombine.high %v8490_v41, %v8490_v41  ;;  %v5591_v46 = vrot.slane %v5584_v15, %v6791_v60  ;;  %v8990_v9 = vld [vmem:[#allocation28_spill] sm:$0xff] }
 0x268   : > { %6276 = vmatmul.mubr.msk.f32.gmra.mrb[54].mxu1 %vm260_vm0, %v5310_v19  ;;  %v4887_v35 = vcombine.low %v8490_v41, %v8493_v55  ;;  %v4894_v16 = vrot.slane %v4885_v37, %v6791_v60  ;;  %v5109_v57 = vrot.slane %v5081_v61, %v6791_v60  ;;  %v4901_v39 = vrot.slane %v5993_v5, %v6791_v60  ;;  %v8991_v37 = vld [vmem:[#allocation21_spill] sm:$0xff] }
 0x269   : > { %6278 = vmatprep.mubr.msk.f32.mxu1 %vm6397_vm2, %v8827_v28  ;;  %v5361_v48 = vcombine.low %v5088_v30, %v5102_v4  ;;  %v6006_v59 = vcombine.high %v5088_v30, %v5102_v4  ;;  %v5111_v52 = vcombine.high %v5095_v22, %v5095_v22  ;;  %v4932_v63 = vrot.slane %v4748_v56, %v6791_v60  ;;  %v8992_v4 = vld [vmem:[#allocation33_spill] sm:$0xff] }
 0x26a   : > { %v4908_v43 = vrot.slane %v4887_v35, %v6791_v60  ;;  %v4909_v62 = vcombine.low %v8979_v3, %v4894_v16  ;;  %v5363_v1 = vcombine.low %v5095_v22, %v5109_v57  ;;  %v2270_v26 = vcombine.high %v8988_v11, %v8988_v11  ;;  %v8993_v22 = vld [vmem:[#allocation20_spill] sm:$0xff]  ;;  %v8994_v3 = vld [vmem:[#allocation3_spill] sm:$0xff] }
 0x26b   : > { %v5377_v8 = vrot.slane %v5361_v48, %v6791_v60  ;;  %v5384_v25 = vrot.slane %v6006_v59, %v6791_v60  ;;  %v5415_v33 = vrot.slane %v5111_v52, %v6791_v60  ;;  %v4939_v50 = vrot.slane %v4932_v63, %v6791_v60 }
 0x26c   : > { %6279 = vmatmul.mubr.msk.f32.gmra.mrb[56].mxu1 %vm260_vm0, %v5359_v34  ;;  %v4910_v18 = vcombine.low %v4901_v39, %v4908_v43  ;;  %v5391_v14 = vrot.slane %v5363_v1, %v6791_v60  ;;  %v4917_v31 = vrot.slane %v4909_v62, %v6791_v60  ;;  %v6017_v24 = vcombine.high %v8990_v9, %v8989_v12 }
 0x26d   : > { %6281 = vmatprep.mubr.msk.f32.mxu1 %vm6397_vm2, %v8827_v28  ;;  %v5392_v40 = vcombine.low %v5370_v58, %v5377_v8  ;;  %v8546_v38 = vpop.f32.mrb[0].mxu1  ;;  %v5592_v5 = vcombine.low %v5591_v46, %v8991_v37  ;;  %v5422_v61 = vrot.slane %v5415_v33, %v6791_v60  ;;  %v5582_v30 = vrot.slane %v5575_v49, %v6791_v60  ;;  %v8997_v8 = vld [vmem:[#allocation80_spill] sm:$0xff] }
 0x26e   : > { %v4924_v44 = vrot.slane %v4910_v18, %v6791_v60  ;;  %v5393_v54 = vcombine.low %v5384_v25, %v5391_v14  ;;  %v6119_v19 = vpop.f32.mrb[1].mxu1  ;;  %v5618_v34 = vcombine.low %v2270_v26, %v8992_v4  ;;  %v4749_v35 = vcombine.high %v8485_v10, %v8485_v10  ;;  %v8999_v18 = vld [vmem:[#allocation32_spill] sm:$0xff] }
 0x26f   : > { %v5400_v17 = vrot.slane %v5392_v40, %v6791_v60  ;;  %v5608_v57 = vrot.slane %v6017_v24, %v6791_v60  ;;  %v4747_v48 = vcombine.high %v8482_v13, %v8482_v13  ;;  %v5599_v39 = vrot.slane %v5592_v5, %v6791_v60 }
 0x270   : > { %v4925_v53 = vcombine.low %v4917_v31, %v4924_v44  ;;  %v5407_v20 = vrot.slane %v5393_v54, %v6791_v60  ;;  %v5638_v43 = vcombine.low %v8493_v55, %v4748_v56  ;;  %v5583_v62 = vcombine.low %v8994_v3, %v5582_v30  ;;  %v9000_v44 = vld [vmem:[#allocation79_spill] sm:$0xff] }
 0x271   : > { %v5625_v7 = vrot.slane %v5618_v34, %v6791_v60  ;;  %v5637_v1 = vcombine.low %v4749_v35, %v8490_v41  ;;  %v5609_v36 = vcombine.low %v8995_v32, %v5608_v57  ;;  %v5636_v13 = vcombine.low %v8485_v10, %v4747_v48 }
 0x272   : > { %6259 = vmatmul.mubr.msk.f32.gmra.mrb[46].mxu0 %vm260_vm0, %v4925_v53  ;;  %v5408_v29 = vcombine.low %v5400_v17, %v5407_v20  ;;  %v1811_v16 = vpop.f32.mrb[2].mxu0  ;;  %v5600_v58 = vcombine.low %v8996_v2, %v5599_v39  ;;  %v6018_v56 = vcombine.high %v8999_v18, %v8998_v23  ;;  %v5666_v41 = vrot.slane %v5638_v43, %v6791_v60  ;;  %v9001_v53 = vld [vmem:[#allocation81_spill] sm:$0xff] }
 0x273   : > { %6261 = vmatprep.mubr.msk.f32.mxu0 %vm6397_vm2, %v8827_v28  ;;  %v6110_v59 = vpop.f32.mrb[3].mxu0  ;;  %v5626_v6 = vcombine.low %v8997_v8, %v5625_v7  ;;  %v5659_v25 = vrot.slane %v5637_v1, %v6791_v60  ;;  %v5616_v40 = vrot.slane %v5609_v36, %v6791_v60  ;;  %v5652_v10 = vrot.slane %v5636_v13, %v6791_v60 }
 0x274   : > { %6282 = vmatmul.mubr.msk.f32.gmra.mrb[58].mxu1 %vm260_vm0, %v5408_v29  ;;  %v5645_v47 = vrot.slane %v6018_v56, %v6791_v60  ;;  %v5547_v20 = vcombine.high %v8493_v55, %v8493_v55 }
 0x275   : > { %6284 = vmatprep.mubr.msk.f32.mxu1 %vm6397_vm2, %v8827_v28  ;;  %v5617_v27 = vcombine.low %v5616_v40, %v9000_v44  ;;  %v5633_v21 = vrot.slane %v5626_v6, %v6791_v60  ;;  %v5668_v54 = vcombine.low %v5659_v25, %v5666_v41 }
 0x276   : > { %6262 = vmatmul.mubr.msk.f32.gmra.mrb[48].mxu0 %vm260_vm0, %v4939_v50  ;;  %v5667_v51 = vcombine.low %v5645_v47, %v5652_v10  ;;  %v5690_v46 = vrot.slane %v5547_v20, %v6791_v60 }
 0x277   : > { %6289 = vmatprep.mubr.msk.f32.mxu0 %vm6397_vm2, %v8827_v28  ;;  %v5634_v63 = vcombine.low %v5633_v21, %v9001_v53  ;;  %v5682_v17 = vrot.slane %v5668_v54, %v6791_v60 }
 0x278   : > { %6285 = vmatmul.mubr.msk.f32.gmra.mrb[60].mxu1 %vm260_vm0, %v5422_v61  ;;  %v5675_v0 = vrot.slane %v5667_v51, %v6791_v60  ;;  %v5697_v42 = vrot.slane %v5690_v46, %v6791_v60 }
 0x27a   : > { %6290 = vmatmul.mubr.msk.f32.vlgmr.msra.gmra.mrb[50].mxu0 %vm260_vm0, %v8993_v22  ;;  %v1816_v14 = vpop.f32.mrb[4].mxu0  ;;  %v5683_v29 = vcombine.low %v5675_v0, %v5682_v17 }
 0x27b   : > { %6292 = vmatprep.mubr.msk.f32.mxu0 %vm6397_vm2, %v8827_v28  ;;  %v6113_v31 = vpop.f32.mrb[5].mxu0 }
 0x27e   : > { %6293 = vmatmul.mubr.msk.f32.gmra.mrb[52].mxu0 %vm260_vm0, %v5583_v62 }
 0x27f   : > { %6295 = vmatprep.mubr.msk.f32.mxu0 %vm6397_vm2, %v8827_v28 }
 0x280   : > { %v1831_v15 = vpop.f32.mrb[2].mxu1 }
 0x281   : > { %v6122_v52 = vpop.f32.mrb[3].mxu1 }
 0x282   : > { %6296 = vmatmul.mubr.msk.f32.gmra.mrb[54].mxu0 %vm260_vm0, %v5600_v58 }
 0x283   : > { %6298 = vmatprep.mubr.msk.f32.mxu0 %vm6397_vm2, %v8827_v28 }
 0x286   : > { %6299 = vmatmul.mubr.msk.f32.gmra.mrb[56].mxu0 %vm260_vm0, %v5617_v27  ;;  %v1836_v33 = vpop.f32.mrb[4].mxu1 }
 0x287   : > { %6301 = vmatprep.mubr.msk.f32.mxu0 %vm6397_vm2, %v8827_v28  ;;  %v6125_v50 = vpop.f32.mrb[5].mxu1 }
 0x28a   : > { %6302 = vmatmul.mubr.msk.f32.gmra.mrb[58].mxu0 %vm260_vm0, %v5634_v63 }
 0x28b   : > { %6304 = vmatprep.mubr.msk.f32.mxu0 %vm6397_vm2, %v8827_v28  ;;  %v1821_v55 = vpop.f32.mrb[6].mxu0 }
 0x28c   : > { %v6116_v49 = vpop.f32.mrb[7].mxu0 }
 0x28d   : > { %v2231_v11 = vpop.f32.mrb[6].mxu1 }
 0x28e   : > { %6305 = vmatmul.mubr.msk.f32.gmra.mrb[60].mxu0 %vm260_vm0, %v5683_v29  ;;  %v2232_v26 = vadd.f32 %v2231_v11, %v8509_v45  ;;  %v6130_v19 = vpop.f32.mrb[7].mxu1 }
 0x28f   : > { %6307 = vmatprep.mubr.msk.f32.mxu0 %vm6397_vm2, %v8827_v28 }
 0x292   : > { %6308 = vmatmul.mubr.msk.f32.gmra.mrb[62].mxu0 %vm260_vm0, %v5697_v42 }
 0x294   : > { %v2665_v12 = vpop.f32.mrb[8].mxu0 }
 0x295   : > { %v2699_v9 = vadd.f32 %v2665_v12, %v2232_v26  ;;  %v6153_v24 = vpop.f32.mrb[9].mxu0 }
 0x29d   : > { %v2236_v37 = vpop.f32.mrb[8].mxu1 }
 0x29e   : > { %v2237_v5 = vadd.f32 %v2236_v37, %v1811_v16  ;;  %v6133_v61 = vpop.f32.mrb[9].mxu1 }
 0x2a1   : > { %v2670_v30 = vpop.f32.mrb[10].mxu0 }
 0x2a2   : > { %v2700_v4 = vadd.f32 %v2670_v30, %v2237_v5  ;;  %v6156_v28 = vpop.f32.mrb[11].mxu0 }
 0x2a9   : > { %v2241_v34 = vpop.f32.mrb[10].mxu1 }
 0x2aa   : > { %v2242_v35 = vadd.f32 %v2241_v34, %v1816_v14  ;;  %v6136_v60 = vpop.f32.mrb[11].mxu1 }
 0x2ae   : > { %v2675_v22 = vpop.f32.mrb[12].mxu0 }
 0x2af   : > { %v2701_v57 = vadd.f32 %v2675_v22, %v2242_v35  ;;  %v6159_v48 = vpop.f32.mrb[13].mxu0 }
 0x2b1   : > { %v2246_v59 = vpop.f32.mrb[12].mxu1 }
 0x2b2   : > { %v2247_v39 = vadd.f32 %v2246_v59, %v1821_v55  ;;  %v6139_v43 = vpop.f32.mrb[13].mxu1 }
 0x2b5   : > { %v2680_v45 = vpop.f32.mrb[14].mxu0 }
 0x2b6   : > { %v2702_v3 = vadd.f32 %v2680_v45, %v2247_v39  ;;  %v6162_v62 = vpop.f32.mrb[15].mxu0 }
 0x2bc   : > { %v2251_v7 = vpop.f32.mrb[14].mxu1 }
 0x2bd   : > { %v2252_v1 = vadd.f32 %v2251_v7, %v8546_v38  ;;  %v6142_v16 = vpop.f32.mrb[15].mxu1 }
 0x2be   : > { %v2685_v32 = vpop.f32.mrb[16].mxu0 }
 0x2bf   : > { %v2703_v36 = vadd.f32 %v2685_v32, %v2252_v1  ;;  %v6165_v13 = vpop.f32.mrb[17].mxu0 }
 0x2c3   : > { %v2256_v2 = vpop.f32.mrb[16].mxu1 }
 0x2c4   : > { %v2257_v58 = vadd.f32 %v2256_v2, %v1831_v15  ;;  %v6145_v8 = vpop.f32.mrb[17].mxu1 }
 0x2c7   : > { %v2261_v6 = vpop.f32.mrb[18].mxu1 }
 0x2c8   : > { %v2690_v23 = vpop.f32.mrb[18].mxu0  ;;  %v2262_v18 = vadd.f32 %v2261_v6, %v1836_v33  ;;  %v6148_v56 = vpop.f32.mrb[19].mxu1 }
 0x2c9   : > { %v2704_v25 = vadd.f32 %v2690_v23, %v2257_v58  ;;  %v6168_v41 = vpop.f32.mrb[19].mxu0 }
 0x2cc   : > { %v3442_v14 = vpop.f32.mrb[20].mxu1 }
 0x2cd   : > { %v2695_v40 = vpop.f32.mrb[20].mxu0  ;;  %v3476_v10 = vadd.f32 %v3442_v14, %v2699_v9  ;;  %v6176_v31 = vpop.f32.mrb[21].mxu1 }
 0x2ce   : > { %v2705_v44 = vadd.f32 %v2695_v40, %v2262_v18  ;;  %v6171_v27 = vpop.f32.mrb[21].mxu0 }
 0x2d1   : > { %v4219_v38 = vpop.f32.mrb[22].mxu0 }
 0x2d2   : > { %v4253_v21 = vadd.f32 %v4219_v38, %v3476_v10  ;;  %v6199_v47 = vpop.f32.mrb[23].mxu0 }
 0x2d4   : > { %v3447_v54 = vpop.f32.mrb[22].mxu1 }
 0x2d5   : > { %v3477_v51 = vadd.f32 %v3447_v54, %v2700_v4  ;;  %v6179_v52 = vpop.f32.mrb[23].mxu1 }
 0x2dc   : > { %v4224_v15 = vpop.f32.mrb[24].mxu0 }
 0x2dd   : > { %v4254_v53 = vadd.f32 %v4224_v15, %v3477_v51  ;;  %v6202_v63 = vpop.f32.mrb[25].mxu0 }
 0x2e0   : > { %v3452_v17 = vpop.f32.mrb[24].mxu1 }
 0x2e1   : > { %v3478_v20 = vadd.f32 %v3452_v17, %v2701_v57  ;;  %v6182_v0 = vpop.f32.mrb[25].mxu1 }
 0x2e7   : > { %v4229_v29 = vpop.f32.mrb[26].mxu0 }
 0x2e8   : > { %v4255_v46 = vadd.f32 %v4229_v29, %v3478_v20  ;;  %v6205_v33 = vpop.f32.mrb[27].mxu0 }
 0x2ea   : > { %v3457_v50 = vpop.f32.mrb[26].mxu1 }
 0x2eb   : > { %v3479_v42 = vadd.f32 %v3457_v50, %v2702_v3  ;;  %v6185_v55 = vpop.f32.mrb[27].mxu1 }
 0x2f1   : > { %v4234_v49 = vpop.f32.mrb[28].mxu0 }
 0x2f2   : > { %v4256_v11 = vadd.f32 %v4234_v49, %v3479_v42  ;;  %v6208_v26 = vpop.f32.mrb[29].mxu0 }
 0x2f5   : > { %v3462_v19 = vpop.f32.mrb[28].mxu1 }
 0x2f6   : > { %v3480_v12 = vadd.f32 %v3462_v19, %v2703_v36  ;;  %v6188_v9 = vpop.f32.mrb[29].mxu1 }
 0x2fd   : > { %v4239_v24 = vpop.f32.mrb[30].mxu0 }
 0x2fe   : > { %v4257_v37 = vadd.f32 %v4239_v24, %v3480_v12  ;;  %v6211_v5 = vpop.f32.mrb[31].mxu0 }
 0x301   : > { %v3467_v61 = vpop.f32.mrb[30].mxu1 }
 0x302   : > { %v3481_v30 = vadd.f32 %v3467_v61, %v2704_v25  ;;  %v6191_v4 = vpop.f32.mrb[31].mxu1 }
 0x305   : > { %v3472_v28 = vpop.f32.mrb[32].mxu1 }
 0x306   : > { %v3482_v34 = vadd.f32 %v3472_v28, %v2705_v44  ;;  %v6194_v35 = vpop.f32.mrb[33].mxu1 }
 0x30a   : > { %v4244_v60 = vpop.f32.mrb[32].mxu0 }
 0x30b   : > { %v4258_v22 = vadd.f32 %v4244_v60, %v3481_v30  ;;  %v6214_v57 = vpop.f32.mrb[33].mxu0 }
 0x30c   : > { %v4660_v48 = vpop.f32.mrb[34].mxu1 }
 0x30d   : > { %v4694_v39 = vadd.f32 %v4660_v48, %v4253_v21  ;;  %v6222_v43 = vpop.f32.mrb[35].mxu1 }
 0x30e   : > { %v4249_v59 = vpop.f32.mrb[34].mxu0 }
 0x30f   : > { %v4259_v45 = vadd.f32 %v4249_v59, %v3482_v34  ;;  %v6217_v3 = vpop.f32.mrb[35].mxu0  ;;  %v6027_v59 = vld [vmem:[%s8641_s2] ss:$0 sm:$0xff] }
 0x310   : > { %v4665_v62 = vpop.f32.mrb[36].mxu1 }
 0x311   : > { %v4695_v1 = vadd.f32 %v4665_v62, %v4254_v53  ;;  %v6225_v16 = vpop.f32.mrb[37].mxu1 }
 0x312   : > { %v5023_v7 = vpop.f32.mrb[36].mxu0 }
 0x313   : > { %v5057_v32 = vadd.f32 %v5023_v7, %v4694_v39  ;;  %v6245_v36 = vpop.f32.mrb[37].mxu0 }
 0x316   : > { %v5028_v13 = vpop.f32.mrb[38].mxu0  ;;  %v4670_v8 = vpop.f32.mrb[38].mxu1 }
 0x317   : > { %v5058_v2 = vadd.f32 %v5028_v13, %v4695_v1  ;;  %v6248_v58 = vpop.f32.mrb[39].mxu0  ;;  %v4696_v6 = vadd.f32 %v4670_v8, %v4255_v46  ;;  %v6228_v23 = vpop.f32.mrb[39].mxu1 }
 0x31a   : > { %v5033_v18 = vpop.f32.mrb[40].mxu0 }
 0x31b   : > { %v5059_v56 = vadd.f32 %v5033_v18, %v4696_v6  ;;  %v6251_v25 = vpop.f32.mrb[41].mxu0 }
 0x31c   : > { %v4675_v41 = vpop.f32.mrb[40].mxu1 }
 0x31d   : > { %v4697_v14 = vadd.f32 %v4675_v41, %v4256_v11  ;;  %v6231_v40 = vpop.f32.mrb[41].mxu1 }
 0x31e   : > { %v5038_v10 = vpop.f32.mrb[42].mxu0 }
 0x31f   : > { %v5060_v31 = vadd.f32 %v5038_v10, %v4697_v14  ;;  %v6254_v44 = vpop.f32.mrb[43].mxu0 }
 0x321   : > { %v4680_v27 = vpop.f32.mrb[42].mxu1 }
 0x322   : > { %v4698_v38 = vadd.f32 %v4680_v27, %v4257_v37  ;;  %v6234_v47 = vpop.f32.mrb[43].mxu1 }
 0x323   : > { %v5043_v21 = vpop.f32.mrb[44].mxu0 }
 0x324   : > { %v6257_v54 = vpop.f32.mrb[45].mxu0  ;;  %v5061_v51 = vadd.f32 %v5043_v21, %v4698_v38 }
 0x327   : > { %v4685_v52 = vpop.f32.mrb[44].mxu1 }
 0x328   : > { %v4699_v15 = vadd.f32 %v4685_v52, %v4258_v22  ;;  %v6237_v53 = vpop.f32.mrb[45].mxu1 }
 0x32b   : > { %v4690_v63 = vpop.f32.mrb[46].mxu1 }
 0x32c   : > { %v4700_v17 = vadd.f32 %v4690_v63, %v4259_v45  ;;  %v6240_v20 = vpop.f32.mrb[47].mxu1 }
 0x32f   : > { %v5506_v0 = vpop.f32.mrb[48].mxu1 }
 0x330   : > { %v5540_v29 = vadd.f32 %v5506_v0, %v5057_v32  ;;  %v6268_v46 = vpop.f32.mrb[49].mxu1 }
 0x333   : > { %v5511_v33 = vpop.f32.mrb[50].mxu1 }
 0x334   : > { %v5541_v50 = vadd.f32 %v5511_v33, %v5058_v2  ;;  %v6271_v42 = vpop.f32.mrb[51].mxu1 }
 0x337   : > { %v5516_v55 = vpop.f32.mrb[52].mxu1 }
 0x338   : > { %v5542_v49 = vadd.f32 %v5516_v55, %v5059_v56  ;;  %v6274_v11 = vpop.f32.mrb[53].mxu1 }
 0x33b   : > { %v5521_v26 = vpop.f32.mrb[54].mxu1 }
 0x33c   : > { %v5543_v19 = vadd.f32 %v5521_v26, %v5060_v31  ;;  %v6277_v12 = vpop.f32.mrb[55].mxu1 }
 0x33f   : > { %v5526_v9 = vpop.f32.mrb[56].mxu1 }
 0x340   : > { %v5544_v24 = vadd.f32 %v5526_v9, %v5061_v51  ;;  %v6280_v37 = vpop.f32.mrb[57].mxu1 }
 0x345   : > { %v5048_v5 = vpop.f32.mrb[46].mxu0 }
 0x346   : > { %v5062_v61 = vadd.f32 %v5048_v5, %v4699_v15  ;;  %v6260_v30 = vpop.f32.mrb[47].mxu0 }
 0x347   : > { %v5531_v4 = vpop.f32.mrb[58].mxu1 }
 0x348   : > { %v5545_v34 = vadd.f32 %v5531_v4, %v5062_v61  ;;  %v6283_v35 = vpop.f32.mrb[59].mxu1 }
 0x349   : > { %v5053_v28 = vpop.f32.mrb[48].mxu0 }
 0x34a   : > { %v5063_v60 = vadd.f32 %v5053_v28, %v4700_v17  ;;  %v6263_v22 = vpop.f32.mrb[49].mxu0 }
 0x34b   : > { %v5536_v57 = vpop.f32.mrb[60].mxu1 }
 0x34c   : > { %v5546_v39 = vadd.f32 %v5536_v57, %v5063_v60  ;;  %v6286_v43 = vpop.f32.mrb[61].mxu1 }
 0x34d   : > { %v5781_v48 = vpop.f32.mrb[50].mxu0 }
 0x34e   : > { %v5815_v45 = vadd.f32 %v5781_v48, %v5540_v29  ;;  %v6291_v3 = vpop.f32.mrb[51].mxu0 }
 0x350   : > { %v5829_v62 = vadd.f32 %v6027_v59, %v5815_v45 }
 0x351   : > { %v5786_v7 = vpop.f32.mrb[52].mxu0 }
 0x352   : > { %5837 = vst.msk [vmem:[%s8621_s12] sm:$0xff] %vm5836_vm3, %v5829_v62  ;;  %v5816_v1 = vadd.f32 %v5786_v7, %v5541_v50  ;;  %v6294_v16 = vpop.f32.mrb[53].mxu0 }
 0x354   : > { %v5830_v32 = vadd.f32 %v6027_v59, %v5816_v1 }
 0x355   : > { %v5791_v36 = vpop.f32.mrb[54].mxu0 }
 0x356   : > { %5838 = vst.msk [vmem:[%s8621_s12 + $0x8] sm:$0xff] %vm5836_vm3, %v5830_v32  ;;  %v5817_v13 = vadd.f32 %v5791_v36, %v5542_v49  ;;  %v6297_v2 = vpop.f32.mrb[55].mxu0 }
 0x358   : > { %v5831_v58 = vadd.f32 %v6027_v59, %v5817_v13 }
 0x359   : > { %v5796_v8 = vpop.f32.mrb[56].mxu0 }
 0x35a   : > { %5839 = vst.msk [vmem:[%s8621_s12 + $0x10] sm:$0xff] %vm5836_vm3, %v5831_v58  ;;  %v5818_v6 = vadd.f32 %v5796_v8, %v5543_v19  ;;  %v6300_v23 = vpop.f32.mrb[57].mxu0 }
 0x35c   : > { %v5832_v18 = vadd.f32 %v6027_v59, %v5818_v6 }
 0x35d   : > { %v5801_v56 = vpop.f32.mrb[58].mxu0 }
 0x35e   : > { %5840 = vst.msk [vmem:[%s8621_s12 + $0x18] sm:$0xff] %vm5836_vm3, %v5832_v18  ;;  %v5819_v25 = vadd.f32 %v5801_v56, %v5544_v24  ;;  %v6303_v41 = vpop.f32.mrb[59].mxu0 }
 0x360   : > { %v5833_v14 = vadd.f32 %v6027_v59, %v5819_v25 }
 0x361   : > { %v5806_v40 = vpop.f32.mrb[60].mxu0 }
 0x362   : > { %5841 = vst.msk [vmem:[%s8621_s12 + $0x20] sm:$0xff] %vm5836_vm3, %v5833_v14  ;;  %v5820_v10 = vadd.f32 %v5806_v40, %v5545_v34  ;;  %v6306_v31 = vpop.f32.mrb[61].mxu0 }
 0x364   : > { %v5834_v44 = vadd.f32 %v6027_v59, %v5820_v10 }
 0x365   : > { %v5811_v27 = vpop.f32.mrb[62].mxu0 }
 0x366   : > { %5842 = vst.msk [vmem:[%s8621_s12 + $0x28] sm:$0xff] %vm5836_vm3, %v5834_v44  ;;  %v5821_v38 = vadd.f32 %v5811_v27, %v5546_v39  ;;  %v6309_v21 = vpop.f32.mrb[63].mxu0 }
 0x368   : > { %v5835_v47 = vadd.f32 %v6027_v59, %v5821_v38 }
 0x36a   : > { %5844 = vst.msk [vmem:[%s8621_s12 + $0x30] sm:$0x1] %vm5843_vm4, %v5835_v47 }
 0x36b PF: > { %s15_s18 = sadd.s32 1, %s6394_s18  }
 0x36c   : > { %p12_p5 = scmp.ge.s32.totalorder %s15_s18, 4  }
 0x36e   :  { %14 = sbr.rel (!%p12_p5) target bundleno = 1 (0x1), region = 78 }

</bundles_post_ra>
